<compile_context>
chip_gen: v5e
topology: v5e:2x2
jax: 0.10.0
libtpu: 0.0.40
codegen_flags: <defaults>
</compile_context>

<pallas_src>
import functools
import math

import jax
import jax.numpy as jnp
from jax import lax
from jax.experimental import pallas as pl
from jax.experimental.pallas import tpu as pltpu

_VMEM_LIMIT = 48 * 1024 * 1024  # safe on v5e/v6e (128 MiB VMEM) and v7x (64 MiB VMEM)


def _pick_tile(dim, pref):
    """Use the preferred tile if it divides the dim, else fall back to the full dim."""
    return pref if dim % pref == 0 else dim


# ----------------------------------------------------------------------------
# Tiled linear: o = x @ w + b   (c_attn / c_proj)
# ----------------------------------------------------------------------------
def _linear_kernel(x_ref, w_ref, b_ref, o_ref, acc_ref):
    k = pl.program_id(2)

    @pl.when(k == 0)
    def _():
        acc_ref[...] = jnp.zeros_like(acc_ref)

    # bf16 MXU operands, f32 accumulation
    acc_ref[...] += jnp.dot(
        x_ref[...].astype(jnp.bfloat16),
        w_ref[...].astype(jnp.bfloat16),
        preferred_element_type=jnp.float32,
    )

    @pl.when(k == pl.num_programs(2) - 1)
    def _():
        # bias added exactly once, on the final K step
        o_ref[...] = (acc_ref[...] + b_ref[...].astype(jnp.float32)).astype(o_ref.dtype)


def pallas_linear(x2d, w, b, *, out_dtype=jnp.float32, tm=256, tn=256, tk=256):
    """x2d: (M, K), w: (K, N), b: (N,) -> (M, N)."""
    M, K = x2d.shape
    Kw, N = w.shape
    assert Kw == K
    tm, tn, tk = _pick_tile(M, tm), _pick_tile(N, tn), _pick_tile(K, tk)
    grid = (M // tm, N // tn, K // tk)

    cost = pl.CostEstimate(
        flops=2 * M * N * K,
        transcendentals=0,
        bytes_accessed=int(
            M * K * x2d.dtype.itemsize
            + K * N * w.dtype.itemsize
            + N * b.dtype.itemsize
            + M * N * jnp.dtype(out_dtype).itemsize
        ),
    )

    return pl.pallas_call(
        _linear_kernel,
        out_shape=jax.ShapeDtypeStruct((M, N), out_dtype),
        grid_spec=pltpu.PrefetchScalarGridSpec(
            num_scalar_prefetch=0,
            grid=grid,
            in_specs=[
                pl.BlockSpec((tm, tk), lambda i, j, k: (i, k)),
                pl.BlockSpec((tk, tn), lambda i, j, k: (k, j)),
                pl.BlockSpec((1, tn), lambda i, j, k: (0, j)),
            ],
            out_specs=pl.BlockSpec((tm, tn), lambda i, j, k: (i, j)),
            scratch_shapes=[pltpu.VMEM((tm, tn), jnp.float32)],
        ),
        compiler_params=pltpu.CompilerParams(
            dimension_semantics=("parallel", "parallel", "arbitrary"),
            vmem_limit_bytes=_VMEM_LIMIT,
        ),
        cost_estimate=cost,
    )(x2d, w, b.reshape(1, N))


# ----------------------------------------------------------------------------
# Flash-style causal attention, reading q/k/v straight from the fused qkv buffer
# ----------------------------------------------------------------------------
def _flash_attn_kernel(q_ref, k_ref, v_ref, o_ref, m_ref, l_ref, acc_ref,
                       *, sm_scale, tq, tkv):
    qi = pl.program_id(2)
    kv = pl.program_id(3)

    @pl.when(kv == 0)
    def _():
        m_ref[...] = jnp.full_like(m_ref, -jnp.inf)
        l_ref[...] = jnp.zeros_like(l_ref)
        acc_ref[...] = jnp.zeros_like(acc_ref)

    # Skip KV blocks that lie entirely above the causal diagonal (dead MXU work).
    @pl.when(kv * tkv < (qi + 1) * tq)
    def _():
        # fold 1/sqrt(hd) into q: O(tq*hd) multiply instead of scaling O(tq*tkv) scores
        q = (q_ref[0].astype(jnp.float32) * sm_scale).astype(jnp.bfloat16)
        k = k_ref[0].astype(jnp.bfloat16)
        v = v_ref[0].astype(jnp.bfloat16)

        s = jnp.dot(q, k.T, preferred_element_type=jnp.float32)       # (tq, tkv), f32
        row = qi * tq + lax.broadcasted_iota(jnp.int32, s.shape, 0)
        col = kv * tkv + lax.broadcasted_iota(jnp.int32, s.shape, 1)
        s = jnp.where(col <= row, s, -1e30)                           # finite mask value

        m_prev = m_ref[...]
        m_new = jnp.maximum(m_prev, jnp.max(s, axis=-1, keepdims=True))
        alpha = jnp.exp(m_prev - m_new)
        p = jnp.exp(s - m_new)
        l_ref[...] = alpha * l_ref[...] + jnp.sum(p, axis=-1, keepdims=True)
        acc_ref[...] = alpha * acc_ref[...] + jnp.dot(
            p.astype(jnp.bfloat16), v, preferred_element_type=jnp.float32)
        m_ref[...] = m_new

    @pl.when(kv == pl.num_programs(3) - 1)
    def _():
        inv_l = pl.reciprocal(l_ref[...], approx=True)   # EUP op, frees the VALU slot
        o_ref[0] = (acc_ref[...] * inv_l).astype(o_ref.dtype)


def pallas_flash_attention(qkv, n_head, *, tq=128, tkv=128):
    """qkv: (B, T, 3C) fused projections -> (B, T, C) attention output (heads merged)."""
    B, T, C3 = qkv.shape
    C = C3 // 3
    hd = C // n_head
    # Direct head-slicing of the fused qkv buffer needs a lane-aligned head_dim.
    # TODO(synk): for head_dim not a multiple of 128, fall back to a head-split layout.
    assert hd % 128 == 0, "head_dim must be a multiple of 128 for this layout"
    tq, tkv = _pick_tile(T, tq), _pick_tile(T, tkv)
    grid = (B, n_head, T // tq, T // tkv)

    # q head h lives at columns [h*hd, (h+1)*hd) of qkv; k at C + h*hd; v at 2C + h*hd.
    q_spec = pl.BlockSpec((1, tq, hd), lambda b, h, qi, kv: (b, qi, h))
    k_spec = pl.BlockSpec((1, tkv, hd), lambda b, h, qi, kv: (b, kv, n_head + h))
    v_spec = pl.BlockSpec((1, tkv, hd), lambda b, h, qi, kv: (b, kv, 2 * n_head + h))
    o_spec = pl.BlockSpec((1, tq, hd), lambda b, h, qi, kv: (b, qi, h))

    kernel = functools.partial(
        _flash_attn_kernel, sm_scale=1.0 / math.sqrt(hd), tq=tq, tkv=tkv)

    cost = pl.CostEstimate(
        flops=4 * B * n_head * T * T * hd,
        transcendentals=B * n_head * T * T,
        bytes_accessed=int(B * T * C3 * qkv.dtype.itemsize + B * T * C * 2),
    )

    return pl.pallas_call(
        kernel,
        out_shape=jax.ShapeDtypeStruct((B, T, C), jnp.bfloat16),
        grid_spec=pltpu.PrefetchScalarGridSpec(
            num_scalar_prefetch=0,
            grid=grid,
            in_specs=[q_spec, k_spec, v_spec],
            out_specs=o_spec,
            scratch_shapes=[
                pltpu.VMEM((tq, 1), jnp.float32),    # running max  m
                pltpu.VMEM((tq, 1), jnp.float32),    # running sum  l
                pltpu.VMEM((tq, hd), jnp.float32),   # output accumulator
            ],
        ),
        compiler_params=pltpu.CompilerParams(
            dimension_semantics=("parallel", "parallel", "parallel", "arbitrary"),
            vmem_limit_bytes=_VMEM_LIMIT,
        ),
        cost_estimate=cost,
    )(qkv, qkv, qkv)


# ----------------------------------------------------------------------------
# Module wrapper: qkv projection -> flash attention -> output projection
# ----------------------------------------------------------------------------
def causal_self_attention(x, params, n_head):
    B, T, C = x.shape
    # qkv = c_attn(x), emitted in bf16 so attention reads half the HBM bytes
    qkv = pallas_linear(x.reshape(B * T, C), params["w_attn"], params["b_attn"],
                        out_dtype=jnp.bfloat16)
    qkv = qkv.reshape(B, T, 3 * C)
    # y = scaled_dot_product_attention(q, k, v, is_causal=True), heads already merged
    y = pallas_flash_attention(qkv, n_head)
    # y = c_proj(y)
    y = pallas_linear(y.reshape(B * T, C), params["w_proj"], params["b_proj"],
                      out_dtype=jnp.float32)
    return y.reshape(B, T, C)


# pure-JAX f32 reference for the correctness check
def _reference(x, params, n_head):
    B, T, C = x.shape
    hd = C // n_head
    qkv = x @ params["w_attn"] + params["b_attn"]
    q, k, v = jnp.split(qkv, 3, axis=2)
    q = q.reshape(B, T, n_head, hd).transpose(0, 2, 1, 3)
    k = k.reshape(B, T, n_head, hd).transpose(0, 2, 1, 3)
    v = v.reshape(B, T, n_head, hd).transpose(0, 2, 1, 3)
    s = (q @ jnp.swapaxes(k, -1, -2)) / math.sqrt(hd)
    mask = jnp.tril(jnp.ones((T, T), dtype=bool))
    s = jnp.where(mask[None, None], s, -jnp.inf)
    p = jax.nn.softmax(s, axis=-1)
    y = (p @ v).transpose(0, 2, 1, 3).reshape(B, T, C)
    return y @ params["w_proj"] + params["b_proj"]


if __name__ == "__main__":
    # small config consistent with the module: n_embd % n_head == 0, head_dim = 128
    B, T, C, n_head = 2, 256, 256, 2

    key = jax.random.PRNGKey(0)
    k_x, k_wa, k_ba, k_wp, k_bp = jax.random.split(key, 5)

    x = jax.random.normal(k_x, (B, T, C), dtype=jnp.float32)

    # weights stored as (in_features, out_features): forward is x @ W + b
    params = {
        "w_attn": 0.02 * jax.random.normal(k_wa, (C, 3 * C), dtype=jnp.float32),
        "b_attn": 0.02 * jax.random.normal(k_ba, (3 * C,), dtype=jnp.float32),
        "w_proj": 0.02 * jax.random.normal(k_wp, (C, C), dtype=jnp.float32),
        "b_proj": 0.02 * jax.random.normal(k_bp, (C,), dtype=jnp.float32),
    }

    fwd = jax.jit(functools.partial(causal_self_attention, n_head=n_head))
    y = jax.block_until_ready(fwd(x, params))

    y_ref = _reference(x, params, n_head)
    assert y.shape == (B, T, C)
    err = float(jnp.max(jnp.abs(y.astype(jnp.float32) - y_ref)))
    # bf16 MXU operands with f32 accumulation -> loosened tolerance vs f32 reference
    assert err < 1e-2, f"mismatch vs reference: max abs err = {err}"

    print("KERNEL_OK")
</pallas_src>

<mosaic_0001>
module attributes {stable_mosaic.version = 11 : i64} {
  func.func @_linear_kernel(%arg0: i32, %arg1: i32, %arg2: i32, %arg3: memref<256x256xbf16, #tpu.memory_space<vmem>>, %arg4: memref<256x256xf32, #tpu.memory_space<vmem>>, %arg5: memref<1x256xf32, #tpu.memory_space<vmem>>, %arg6: memref<256x256xf32, #tpu.memory_space<vmem>>, %arg7: memref<256x256xf32, #tpu.memory_space<vmem>>) attributes {dimension_semantics = [#tpu.dimension_semantics<parallel>, #tpu.dimension_semantics<parallel>, #tpu.dimension_semantics<arbitrary>], iteration_bounds = array<i64: 2, 1, 1>, scalar_prefetch = 0 : i64, scratch_operands = 1 : i64, tpu.core_type = #tpu.core_type<tc>, window_params = [{transform_indices = @transform_0, window_bounds = array<i64: 256, 256>}, {transform_indices = @transform_1, window_bounds = array<i64: 256, 256>}, {transform_indices = @transform_2, window_bounds = array<i64: 1, 256>}, {transform_indices = @transform_3, window_bounds = array<i64: 256, 256>}]} {
    %c0_i32 = arith.constant 0 : i32
    %0 = arith.cmpi eq, %arg2, %c0_i32 : i32
    %1 = arith.extui %0 : i1 to i32
    %c0_i32_0 = arith.constant 0 : i32
    %2 = arith.cmpi ne, %1, %c0_i32_0 : i32
    scf.if %2 {
      %cst_10 = arith.constant 0.000000e+00 : f32
      %13 = vector.broadcast %cst_10 : f32 to vector<256x256xf32>
      %c0_11 = arith.constant 0 : index
      %c0_12 = arith.constant 0 : index
      %14 = vector.load %arg7[%c0_11, %c0_12] : memref<256x256xf32, #tpu.memory_space<vmem>>, vector<256x256xf32>
      tpu.vector_store %arg7[%c0_11, %c0_12], %13 {strides = array<i32>} : memref<256x256xf32, #tpu.memory_space<vmem>>, vector<256x256xf32>,
    } else {
    }
    %c0 = arith.constant 0 : index
    %c0_1 = arith.constant 0 : index
    %3 = vector.load %arg7[%c0, %c0_1] : memref<256x256xf32, #tpu.memory_space<vmem>>, vector<256x256xf32>
    %c0_2 = arith.constant 0 : index
    %c0_3 = arith.constant 0 : index
    %4 = vector.load %arg3[%c0_2, %c0_3] : memref<256x256xbf16, #tpu.memory_space<vmem>>, vector<256x256xbf16>
    %c0_4 = arith.constant 0 : index
    %c0_5 = arith.constant 0 : index
    %5 = vector.load %arg4[%c0_4, %c0_5] : memref<256x256xf32, #tpu.memory_space<vmem>>, vector<256x256xf32>
    %6 = arith.truncf %5 : vector<256x256xf32> to vector<256x256xbf16>
    %cst = arith.constant dense<0.000000e+00> : vector<256x256xf32>
    %7 = tpu.matmul %4, %6, %cst {dimension_numbers = #tpu.dot_dimension_numbers<[1], [0], [0], [1], [0, 0, 1, 1], [], []>} : vector<256x256xbf16>, vector<256x256xbf16>, vector<256x256xf32> -> vector<256x256xf32>
    %8 = arith.addf %3, %7 : vector<256x256xf32>
    %c0_6 = arith.constant 0 : index
    %c0_7 = arith.constant 0 : index
    %9 = vector.load %arg7[%c0_6, %c0_7] : memref<256x256xf32, #tpu.memory_space<vmem>>, vector<256x256xf32>
    tpu.vector_store %arg7[%c0_6, %c0_7], %8 {strides = array<i32>} : memref<256x256xf32, #tpu.memory_space<vmem>>, vector<256x256xf32>,
    %c0_i32_8 = arith.constant 0 : i32
    %10 = arith.cmpi eq, %arg2, %c0_i32_8 : i32
    %11 = arith.extui %10 : i1 to i32
    %c0_i32_9 = arith.constant 0 : i32
    %12 = arith.cmpi ne, %11, %c0_i32_9 : i32
    scf.if %12 {
      %c0_10 = arith.constant 0 : index
      %c0_11 = arith.constant 0 : index
      %13 = vector.load %arg7[%c0_10, %c0_11] : memref<256x256xf32, #tpu.memory_space<vmem>>, vector<256x256xf32>
      %c0_12 = arith.constant 0 : index
      %c0_13 = arith.constant 0 : index
      %14 = vector.load %arg5[%c0_12, %c0_13] : memref<1x256xf32, #tpu.memory_space<vmem>>, vector<1x256xf32>
      %15 = vector.broadcast %14 : vector<1x256xf32> to vector<256x256xf32>
      %16 = arith.addf %13, %15 : vector<256x256xf32>
      %c0_14 = arith.constant 0 : index
      %c0_15 = arith.constant 0 : index
      %17 = vector.load %arg6[%c0_14, %c0_15] : memref<256x256xf32, #tpu.memory_space<vmem>>, vector<256x256xf32>
      tpu.vector_store %arg6[%c0_14, %c0_15], %16 {strides = array<i32>} : memref<256x256xf32, #tpu.memory_space<vmem>>, vector<256x256xf32>,
    } else {
    }
    return
  }
  func.func @transform_0(%arg0: i32, %arg1: i32, %arg2: i32) -> (i32, i32) {
    %c0_i32 = arith.constant 0 : i32
    return %arg0, %arg2 : i32, i32
  }
  func.func @transform_1(%arg0: i32, %arg1: i32, %arg2: i32) -> (i32, i32) {
    %c0_i32 = arith.constant 0 : i32
    return %arg2, %arg1 : i32, i32
  }
  func.func @transform_2(%arg0: i32, %arg1: i32, %arg2: i32) -> (i32, i32) {
    %c0_i32 = arith.constant 0 : i32
    %c0_i32_0 = arith.constant 0 : i32
    return %c0_i32, %arg1 : i32, i32
  }
  func.func @transform_3(%arg0: i32, %arg1: i32, %arg2: i32) -> (i32, i32) {
    %c0_i32 = arith.constant 0 : i32
    return %arg0, %arg1 : i32, i32
  }
}

module attributes {stable_mosaic.version = 11 : i64} {
  func.func @_linear_kernel(%arg0: i32, %arg1: i32, %arg2: i32, %arg3: memref<256x256xf32, #tpu.memory_space<vmem>>, %arg4: memref<256x256xf32, #tpu.memory_space<vmem>>, %arg5: memref<1x256xf32, #tpu.memory_space<vmem>>, %arg6: memref<256x256xbf16, #tpu.memory_space<vmem>>, %arg7: memref<256x256xf32, #tpu.memory_space<vmem>>) attributes {dimension_semantics = [#tpu.dimension_semantics<parallel>, #tpu.dimension_semantics<parallel>, #tpu.dimension_semantics<arbitrary>], iteration_bounds = array<i64: 2, 3, 1>, scalar_prefetch = 0 : i64, scratch_operands = 1 : i64, tpu.core_type = #tpu.core_type<tc>, window_params = [{transform_indices = @transform_0, window_bounds = array<i64: 256, 256>}, {transform_indices = @transform_1, window_bounds = array<i64: 256, 256>}, {transform_indices = @transform_2, window_bounds = array<i64: 1, 256>}, {transform_indices = @transform_3, window_bounds = array<i64: 256, 256>}]} {
    %c0_i32 = arith.constant 0 : i32
    %0 = arith.cmpi eq, %arg2, %c0_i32 : i32
    %1 = arith.extui %0 : i1 to i32
    %c0_i32_0 = arith.constant 0 : i32
    %2 = arith.cmpi ne, %1, %c0_i32_0 : i32
    scf.if %2 {
      %cst_10 = arith.constant 0.000000e+00 : f32
      %14 = vector.broadcast %cst_10 : f32 to vector<256x256xf32>
      %c0_11 = arith.constant 0 : index
      %c0_12 = arith.constant 0 : index
      %15 = vector.load %arg7[%c0_11, %c0_12] : memref<256x256xf32, #tpu.memory_space<vmem>>, vector<256x256xf32>
      tpu.vector_store %arg7[%c0_11, %c0_12], %14 {strides = array<i32>} : memref<256x256xf32, #tpu.memory_space<vmem>>, vector<256x256xf32>,
    } else {
    }
    %c0 = arith.constant 0 : index
    %c0_1 = arith.constant 0 : index
    %3 = vector.load %arg7[%c0, %c0_1] : memref<256x256xf32, #tpu.memory_space<vmem>>, vector<256x256xf32>
    %c0_2 = arith.constant 0 : index
    %c0_3 = arith.constant 0 : index
    %4 = vector.load %arg3[%c0_2, %c0_3] : memref<256x256xf32, #tpu.memory_space<vmem>>, vector<256x256xf32>
    %5 = arith.truncf %4 : vector<256x256xf32> to vector<256x256xbf16>
    %c0_4 = arith.constant 0 : index
    %c0_5 = arith.constant 0 : index
    %6 = vector.load %arg4[%c0_4, %c0_5] : memref<256x256xf32, #tpu.memory_space<vmem>>, vector<256x256xf32>
    %7 = arith.truncf %6 : vector<256x256xf32> to vector<256x256xbf16>
    %cst = arith.constant dense<0.000000e+00> : vector<256x256xf32>
    %8 = tpu.matmul %5, %7, %cst {dimension_numbers = #tpu.dot_dimension_numbers<[1], [0], [0], [1], [0, 0, 1, 1], [], []>} : vector<256x256xbf16>, vector<256x256xbf16>, vector<256x256xf32> -> vector<256x256xf32>
    %9 = arith.addf %3, %8 : vector<256x256xf32>
    %c0_6 = arith.constant 0 : index
    %c0_7 = arith.constant 0 : index
    %10 = vector.load %arg7[%c0_6, %c0_7] : memref<256x256xf32, #tpu.memory_space<vmem>>, vector<256x256xf32>
    tpu.vector_store %arg7[%c0_6, %c0_7], %9 {strides = array<i32>} : memref<256x256xf32, #tpu.memory_space<vmem>>, vector<256x256xf32>,
    %c0_i32_8 = arith.constant 0 : i32
    %11 = arith.cmpi eq, %arg2, %c0_i32_8 : i32
    %12 = arith.extui %11 : i1 to i32
    %c0_i32_9 = arith.constant 0 : i32
    %13 = arith.cmpi ne, %12, %c0_i32_9 : i32
    scf.if %13 {
      %c0_10 = arith.constant 0 : index
      %c0_11 = arith.constant 0 : index
      %14 = vector.load %arg7[%c0_10, %c0_11] : memref<256x256xf32, #tpu.memory_space<vmem>>, vector<256x256xf32>
      %c0_12 = arith.constant 0 : index
      %c0_13 = arith.constant 0 : index
      %15 = vector.load %arg5[%c0_12, %c0_13] : memref<1x256xf32, #tpu.memory_space<vmem>>, vector<1x256xf32>
      %16 = vector.broadcast %15 : vector<1x256xf32> to vector<256x256xf32>
      %17 = arith.addf %14, %16 : vector<256x256xf32>
      %18 = arith.truncf %17 : vector<256x256xf32> to vector<256x256xbf16>
      %c0_14 = arith.constant 0 : index
      %c0_15 = arith.constant 0 : index
      %19 = vector.load %arg6[%c0_14, %c0_15] : memref<256x256xbf16, #tpu.memory_space<vmem>>, vector<256x256xbf16>
      tpu.vector_store %arg6[%c0_14, %c0_15], %18 {strides = array<i32>} : memref<256x256xbf16, #tpu.memory_space<vmem>>, vector<256x256xbf16>,
    } else {
    }
    return
  }
  func.func @transform_0(%arg0: i32, %arg1: i32, %arg2: i32) -> (i32, i32) {
    %c0_i32 = arith.constant 0 : i32
    return %arg0, %arg2 : i32, i32
  }
  func.func @transform_1(%arg0: i32, %arg1: i32, %arg2: i32) -> (i32, i32) {
    %c0_i32 = arith.constant 0 : i32
    return %arg2, %arg1 : i32, i32
  }
  func.func @transform_2(%arg0: i32, %arg1: i32, %arg2: i32) -> (i32, i32) {
    %c0_i32 = arith.constant 0 : i32
    %c0_i32_0 = arith.constant 0 : i32
    return %c0_i32, %arg1 : i32, i32
  }
  func.func @transform_3(%arg0: i32, %arg1: i32, %arg2: i32) -> (i32, i32) {
    %c0_i32 = arith.constant 0 : i32
    return %arg0, %arg1 : i32, i32
  }
}

module attributes {stable_mosaic.version = 11 : i64} {
  func.func @_flash_attn_kernel(%arg0: i32, %arg1: i32, %arg2: i32, %arg3: i32, %arg4: memref<1x128x128xbf16, #tpu.memory_space<vmem>>, %arg5: memref<1x128x128xbf16, #tpu.memory_space<vmem>>, %arg6: memref<1x128x128xbf16, #tpu.memory_space<vmem>>, %arg7: memref<1x128x128xbf16, #tpu.memory_space<vmem>>, %arg8: memref<128x1xf32, #tpu.memory_space<vmem>>, %arg9: memref<128x1xf32, #tpu.memory_space<vmem>>, %arg10: memref<128x128xf32, #tpu.memory_space<vmem>>) attributes {dimension_semantics = [#tpu.dimension_semantics<parallel>, #tpu.dimension_semantics<parallel>, #tpu.dimension_semantics<parallel>, #tpu.dimension_semantics<arbitrary>], iteration_bounds = array<i64: 2, 2, 2, 2>, scalar_prefetch = 0 : i64, scratch_operands = 3 : i64, tpu.core_type = #tpu.core_type<tc>, window_params = [{transform_indices = @transform_0, window_bounds = array<i64: 1, 128, 128>}, {transform_indices = @transform_1, window_bounds = array<i64: 1, 128, 128>}, {transform_indices = @transform_2, window_bounds = array<i64: 1, 128, 128>}, {transform_indices = @transform_3, window_bounds = array<i64: 1, 128, 128>}]} {
    %c0_i32 = arith.constant 0 : i32
    %0 = arith.cmpi eq, %arg3, %c0_i32 : i32
    %1 = arith.extui %0 : i1 to i32
    %c0_i32_0 = arith.constant 0 : i32
    %2 = arith.cmpi ne, %1, %c0_i32_0 : i32
    scf.if %2 {
      %cst = arith.constant 0xFF800000 : f32
      %12 = vector.broadcast %cst : f32 to vector<128x1xf32>
      %c0 = arith.constant 0 : index
      %c0_5 = arith.constant 0 : index
      %13 = vector.load %arg8[%c0, %c0_5] : memref<128x1xf32, #tpu.memory_space<vmem>>, vector<128x1xf32>
      tpu.vector_store %arg8[%c0, %c0_5], %12 {strides = array<i32>} : memref<128x1xf32, #tpu.memory_space<vmem>>, vector<128x1xf32>,
      %cst_6 = arith.constant 0.000000e+00 : f32
      %14 = vector.broadcast %cst_6 : f32 to vector<128x1xf32>
      %c0_7 = arith.constant 0 : index
      %c0_8 = arith.constant 0 : index
      %15 = vector.load %arg9[%c0_7, %c0_8] : memref<128x1xf32, #tpu.memory_space<vmem>>, vector<128x1xf32>
      tpu.vector_store %arg9[%c0_7, %c0_8], %14 {strides = array<i32>} : memref<128x1xf32, #tpu.memory_space<vmem>>, vector<128x1xf32>,
      %cst_9 = arith.constant 0.000000e+00 : f32
      %16 = vector.broadcast %cst_9 : f32 to vector<128x128xf32>
      %c0_10 = arith.constant 0 : index
      %c0_11 = arith.constant 0 : index
      %17 = vector.load %arg10[%c0_10, %c0_11] : memref<128x128xf32, #tpu.memory_space<vmem>>, vector<128x128xf32>
      tpu.vector_store %arg10[%c0_10, %c0_11], %16 {strides = array<i32>} : memref<128x128xf32, #tpu.memory_space<vmem>>, vector<128x128xf32>,
    } else {
    }
    %c128_i32 = arith.constant 128 : i32
    %3 = arith.muli %arg3, %c128_i32 : i32
    %c1_i32 = arith.constant 1 : i32
    %4 = arith.addi %arg2, %c1_i32 : i32
    %c128_i32_1 = arith.constant 128 : i32
    %5 = arith.muli %4, %c128_i32_1 : i32
    %6 = arith.cmpi slt, %3, %5 : i32
    %7 = arith.extui %6 : i1 to i32
    %c0_i32_2 = arith.constant 0 : i32
    %8 = arith.cmpi ne, %7, %c0_i32_2 : i32
    scf.if %8 {
      %c0 = arith.constant 0 : index
      %c0_5 = arith.constant 0 : index
      %c0_6 = arith.constant 0 : index
      %12 = vector.load %arg4[%c0, %c0_5, %c0_6] : memref<1x128x128xbf16, #tpu.memory_space<vmem>>, vector<1x128x128xbf16>
      %13 = vector.shape_cast %12 : vector<1x128x128xbf16> to vector<128x128xbf16>
      %14 = arith.extf %13 : vector<128x128xbf16> to vector<128x128xf32>
      %cst = arith.constant 0.0883883461 : f32
      %15 = vector.broadcast %cst : f32 to vector<128x128xf32>
      %16 = arith.mulf %14, %15 : vector<128x128xf32>
      %17 = arith.truncf %16 : vector<128x128xf32> to vector<128x128xbf16>
      %c0_7 = arith.constant 0 : index
      %c0_8 = arith.constant 0 : index
      %c0_9 = arith.constant 0 : index
      %18 = vector.load %arg5[%c0_7, %c0_8, %c0_9] : memref<1x128x128xbf16, #tpu.memory_space<vmem>>, vector<1x128x128xbf16>
      %19 = vector.shape_cast %18 : vector<1x128x128xbf16> to vector<128x128xbf16>
      %c0_10 = arith.constant 0 : index
      %c0_11 = arith.constant 0 : index
      %c0_12 = arith.constant 0 : index
      %20 = vector.load %arg6[%c0_10, %c0_11, %c0_12] : memref<1x128x128xbf16, #tpu.memory_space<vmem>>, vector<1x128x128xbf16>
      %21 = vector.shape_cast %20 : vector<1x128x128xbf16> to vector<128x128xbf16>
      %22 = tpu.transpose %19, [1, 0] : vector<128x128xbf16> -> vector<128x128xbf16>
      %cst_13 = arith.constant dense<0.000000e+00> : vector<128x128xf32>
      %23 = tpu.matmul %17, %22, %cst_13 {dimension_numbers = #tpu.dot_dimension_numbers<[1], [0], [0], [1], [0, 0, 1, 1], [], []>} : vector<128x128xbf16>, vector<128x128xbf16>, vector<128x128xf32> -> vector<128x128xf32>
      %c128_i32_14 = arith.constant 128 : i32
      %24 = arith.muli %arg2, %c128_i32_14 : i32
      %25 = tpu.iota {dimensions = array<i32: 0>} : vector<128x128xi32>
      %26 = vector.broadcast %24 : i32 to vector<128x128xi32>
      %27 = arith.addi %26, %25 : vector<128x128xi32>
      %c128_i32_15 = arith.constant 128 : i32
      %28 = arith.muli %arg3, %c128_i32_15 : i32
      %29 = tpu.iota {dimensions = array<i32: 1>} : vector<128x128xi32>
      %30 = vector.broadcast %28 : i32 to vector<128x128xi32>
      %31 = arith.addi %30, %29 : vector<128x128xi32>
      %32 = arith.cmpi sle, %31, %27 : vector<128x128xi32>
      %cst_16 = arith.constant -1.000000e+30 : f32
      %33 = vector.broadcast %cst_16 : f32 to vector<128x128xf32>
      %34 = arith.select %32, %23, %33 : vector<128x128xi1>, vector<128x128xf32>
      %c0_17 = arith.constant 0 : index
      %c0_18 = arith.constant 0 : index
      %35 = vector.load %arg8[%c0_17, %c0_18] : memref<128x1xf32, #tpu.memory_space<vmem>>, vector<128x1xf32>
      %cst_19 = arith.constant dense<0xFF800000> : vector<128xf32>
      %36 = vector.multi_reduction <maximumf>, %34, %cst_19 [1] : vector<128x128xf32> to vector<128xf32>
      %37 = vector.shape_cast %36 : vector<128xf32> to vector<128x1xf32>
      %38 = arith.maximumf %35, %37 : vector<128x1xf32>
      %39 = arith.subf %35, %38 : vector<128x1xf32>
      %40 = math.exp %39 : vector<128x1xf32>
      %41 = vector.broadcast %38 : vector<128x1xf32> to vector<128x128xf32>
      %42 = arith.subf %34, %41 : vector<128x128xf32>
      %43 = math.exp %42 : vector<128x128xf32>
      %c0_20 = arith.constant 0 : index
      %c0_21 = arith.constant 0 : index
      %44 = vector.load %arg9[%c0_20, %c0_21] : memref<128x1xf32, #tpu.memory_space<vmem>>, vector<128x1xf32>
      %45 = arith.mulf %40, %44 : vector<128x1xf32>
      %cst_22 = arith.constant dense<0.000000e+00> : vector<128xf32>
      %46 = vector.multi_reduction <add>, %43, %cst_22 [1] : vector<128x128xf32> to vector<128xf32>
      %47 = vector.shape_cast %46 : vector<128xf32> to vector<128x1xf32>
      %48 = arith.addf %45, %47 : vector<128x1xf32>
      %c0_23 = arith.constant 0 : index
      %c0_24 = arith.constant 0 : index
      %49 = vector.load %arg9[%c0_23, %c0_24] : memref<128x1xf32, #tpu.memory_space<vmem>>, vector<128x1xf32>
      tpu.vector_store %arg9[%c0_23, %c0_24], %48 {strides = array<i32>} : memref<128x1xf32, #tpu.memory_space<vmem>>, vector<128x1xf32>,
      %c0_25 = arith.constant 0 : index
      %c0_26 = arith.constant 0 : index
      %50 = vector.load %arg10[%c0_25, %c0_26] : memref<128x128xf32, #tpu.memory_space<vmem>>, vector<128x128xf32>
      %51 = vector.broadcast %40 : vector<128x1xf32> to vector<128x128xf32>
      %52 = arith.mulf %51, %50 : vector<128x128xf32>
      %53 = arith.truncf %43 : vector<128x128xf32> to vector<128x128xbf16>
      %cst_27 = arith.constant dense<0.000000e+00> : vector<128x128xf32>
      %54 = tpu.matmul %53, %21, %cst_27 {dimension_numbers = #tpu.dot_dimension_numbers<[1], [0], [0], [1], [0, 0, 1, 1], [], []>} : vector<128x128xbf16>, vector<128x128xbf16>, vector<128x128xf32> -> vector<128x128xf32>
      %55 = arith.addf %52, %54 : vector<128x128xf32>
      %c0_28 = arith.constant 0 : index
      %c0_29 = arith.constant 0 : index
      %56 = vector.load %arg10[%c0_28, %c0_29] : memref<128x128xf32, #tpu.memory_space<vmem>>, vector<128x128xf32>
      tpu.vector_store %arg10[%c0_28, %c0_29], %55 {strides = array<i32>} : memref<128x128xf32, #tpu.memory_space<vmem>>, vector<128x128xf32>,
      %c0_30 = arith.constant 0 : index
      %c0_31 = arith.constant 0 : index
      %57 = vector.load %arg8[%c0_30, %c0_31] : memref<128x1xf32, #tpu.memory_space<vmem>>, vector<128x1xf32>
      tpu.vector_store %arg8[%c0_30, %c0_31], %38 {strides = array<i32>} : memref<128x1xf32, #tpu.memory_space<vmem>>, vector<128x1xf32>,
    } else {
    }
    %c1_i32_3 = arith.constant 1 : i32
    %9 = arith.cmpi eq, %arg3, %c1_i32_3 : i32
    %10 = arith.extui %9 : i1 to i32
    %c0_i32_4 = arith.constant 0 : i32
    %11 = arith.cmpi ne, %10, %c0_i32_4 : i32
    scf.if %11 {
      %c0 = arith.constant 0 : index
      %c0_5 = arith.constant 0 : index
      %12 = vector.load %arg9[%c0, %c0_5] : memref<128x1xf32, #tpu.memory_space<vmem>>, vector<128x1xf32>
      %13 = tpu.reciprocal %12 {approx = true} : vector<128x1xf32> -> vector<128x1xf32>
      %c0_6 = arith.constant 0 : index
      %c0_7 = arith.constant 0 : index
      %14 = vector.load %arg10[%c0_6, %c0_7] : memref<128x128xf32, #tpu.memory_space<vmem>>, vector<128x128xf32>
      %15 = vector.broadcast %13 : vector<128x1xf32> to vector<128x128xf32>
      %16 = arith.mulf %14, %15 : vector<128x128xf32>
      %17 = arith.truncf %16 : vector<128x128xf32> to vector<128x128xbf16>
      %c0_8 = arith.constant 0 : index
      %c0_9 = arith.constant 0 : index
      %c0_10 = arith.constant 0 : index
      %18 = vector.load %arg7[%c0_8, %c0_9, %c0_10] : memref<1x128x128xbf16, #tpu.memory_space<vmem>>, vector<1x128x128xbf16>
      %19 = vector.shape_cast %18 : vector<1x128x128xbf16> to vector<128x128xbf16>
      %20 = vector.shape_cast %17 : vector<128x128xbf16> to vector<1x128x128xbf16>
      tpu.vector_store %arg7[%c0_8, %c0_9, %c0_10], %20 {strides = array<i32>} : memref<1x128x128xbf16, #tpu.memory_space<vmem>>, vector<1x128x128xbf16>,
    } else {
    }
    return
  }
  func.func @transform_0(%arg0: i32, %arg1: i32, %arg2: i32, %arg3: i32) -> (i32, i32, i32) {
    %c0_i32 = arith.constant 0 : i32
    return %arg0, %arg2, %arg1 : i32, i32, i32
  }
  func.func @transform_1(%arg0: i32, %arg1: i32, %arg2: i32, %arg3: i32) -> (i32, i32, i32) {
    %c2_i32 = arith.constant 2 : i32
    %0 = arith.addi %c2_i32, %arg1 : i32
    %c0_i32 = arith.constant 0 : i32
    return %arg0, %arg3, %0 : i32, i32, i32
  }
  func.func @transform_2(%arg0: i32, %arg1: i32, %arg2: i32, %arg3: i32) -> (i32, i32, i32) {
    %c4_i32 = arith.constant 4 : i32
    %0 = arith.addi %c4_i32, %arg1 : i32
    %c0_i32 = arith.constant 0 : i32
    return %arg0, %arg3, %0 : i32, i32, i32
  }
  func.func @transform_3(%arg0: i32, %arg1: i32, %arg2: i32, %arg3: i32) -> (i32, i32, i32) {
    %c0_i32 = arith.constant 0 : i32
    return %arg0, %arg2, %arg1 : i32, i32, i32
  }
}

</mosaic_0001>

<bundles_post_ra>
// kernel: causal_self_attention.4
= control target key start
LH: loop header
LB: loop body
LE: loop exit
PB: predicated region body
PF: predicated region fallthrough
CT: control target
= control target key end

     0   :  { %s3338_s0 = inlined_call_operand.vmem [shape: bf16[2,256,768], index: 0, kind: input, shape index: {}, may-alias: {0,1,2}]   ;;  %s3339_s1 = inlined_call_operand.vmem [shape: bf16[2,256,768], index: 1, kind: input, shape index: {}, may-alias: {0,1,2}]   ;;  %s3340_s2 = inlined_call_operand.vmem [shape: bf16[2,256,768], index: 2, kind: input, shape index: {}, may-alias: {0,1,2}]   ;;  %s3341_s3 = inlined_call_operand.vmem [shape: bf16[2,256,256], index: 3, kind: output, shape index: {}]  }
   0x1   :  { %3349 = sst [smem:[#allocation18_spill]] %s3339_s1 }
   0x2   :  { %3350 = sst [smem:[#allocation19_spill]] %s3340_s2 }
   0x3   :  { %3351 = sst [smem:[#allocation20_spill]] %s3341_s3 }
   0x4   :  { %s2549_s12 = smov 0   ;;  %s2551_s13 = smov 0  }
   0x5   :  { %s2553_s14 = smov 0   ;;  %s2555_s15 = smov 0  }
   0x6   :  { %s2557_s16 = smov 0   ;;  %s2559_s17 = smov 0  }
   0x7   :  { %s2561_s18 = smov 0   ;;  %s2563_s19 = smov 0  }
   0x8   :  { %s2565_s20 = smov 0   ;;  %s2567_s21 = smov 0  }
   0x9   :  { %s2569_s22 = smov 0   ;;  %s2571_s23 = smov 0  }
   0xa   :  { %s2573_s24 = smov 0   ;;  %s2575_s25 = smov 0  }
   0xb   :  { %s2577_s26 = smov 0  }
   0xc LB: > { %3352 = sst [smem:[#allocation9_spill]] %s2475_s14  ;;  %s28_s28 = sadd.s32 1, %s2507_s22  ;;  %s2523_s26 = sphi %s2577_s26, %s13_s26   ;;  %s2519_s25 = sphi %s2575_s25, %s3399_s25   ;;  %s2515_s24 = sphi %s2573_s24, %s3398_s24   ;;  %s2511_s23 = sphi %s2571_s23, %s3397_s23   ;;  %s2507_s22 = sphi %s2569_s22, %s3396_s22   ;;  %s2503_s21 = sphi %s2567_s21, %s3395_s21   ;;  %s2499_s20 = sphi %s2565_s20, %s3394_s20   ;;  %s2495_s19 = sphi %s2563_s19, %s3393_s19   ;;  %s2491_s18 = sphi %s2561_s18, %s3392_s18   ;;  %s2487_s17 = sphi %s2559_s17, %s3391_s17   ;;  %s2483_s16 = sphi %s2557_s16, %s3390_s16   ;;  %s2479_s15 = sphi %s2555_s15, %s3389_s15   ;;  %s2475_s14 = sphi %s2553_s14, %s3388_s14   ;;  %s2471_s13 = sphi %s2551_s13, %s3387_s13   ;;  %s2467_s12 = sphi %s2549_s12, %s3386_s12  }
   0xd   : > { %3353 = sst [smem:[#allocation10_spill]] %s2491_s18  ;;  %p29_p0 = scmp.ge.s32.totalorder %s28_s28, 2 }
   0xe   : > { %3354 = sst [smem:[#allocation11_spill]] %s2495_s19  ;;  %s31_s29 = sadd.s32 1, %s2511_s23 }
   0xf   : > { %3355 = sst [smem:[#allocation12_spill]] %s2499_s20  ;;  %s35_s30 = sadd.s32 1, %s2515_s24 }
  0x10   : > { %3356 = sst [smem:[#allocation13_spill]] %s2503_s21  ;;  %s39_s4 = sadd.s32 1, %s2519_s25 }
  0x11   : > { %s3401_s28 = smov (%p29_p0, %s28_s28), 0  ;;  %s3403_s29 = smov (!%p29_p0, %s31_s29), %s2511_s23 }
  0x12   : > { %3357 = sst [smem:[#allocation14_spill]] %s3401_s28  ;;  %p57_p1 = scmp.ne.s32.totalorder %s2487_s17, %s2483_s16 }
  0x13   : > { %p33_p2 = scmp.ge.s32.totalorder %s3403_s29, 2  ;;  %p58_p3 = scmp.eq.s32.totalorder %s2523_s26, 0 }
  0x14   : > { %s73_s6 = sadd.s32 2, %s2515_s24  ;;  %s76_s7 = ssub.s32 %s2507_s22, %s3401_s28 }
  0x15   : > { %s3405_s29 = smov (%p33_p2, %s3403_s29), 0  ;;  %s3407_s30 = smov (!%p33_p2, %s35_s30), %s2515_s24 }
  0x16   : > { %3358 = sst [smem:[#allocation15_spill]] %s3405_s29  ;;  %s44_s8 = ssub.s32 %s2511_s23, %s3405_s29 }
  0x17   : > { %p2649_p4 = por %p58_p3, %p57_p1  ;;  %p37_p5 = scmp.ge.s32.totalorder %s3407_s30, 2 }
  0x18   : > { %s82_s10 = sadd.s32 1, %s2479_s15  ;;  %p89_p6 = scmp.ne.s32.totalorder %s2479_s15, %s2475_s14 }
  0x19   : > { %s105_s11 = sadd.s32 4, %s2515_s24  ;;  %s3409_s30 = smov (%p37_p5, %s3407_s30), 0 }
  0x1a   : > { %3360 = sst [smem:[#allocation16_spill]] %s3409_s30  ;;  %s3411_s4 = smov (!%p37_p5, %s39_s4), %s2519_s25 }
  0x1b   : > { %s46_s27 = ssub.s32 %s2515_s24, %s3409_s30  ;;  %s74_s5 = sadd.s32 2, %s3409_s30 }
  0x1c   : > { %p41_p7 = scmp.ge.s32.totalorder %s3411_s4, 2  ;;  %s78_s29 = ssub.s32 %s73_s6, %s74_s5 }
  0x1d   : > { %p2665_p8 = por %p89_p6, %p58_p3  ;;  %s106_s3 = sadd.s32 4, %s3409_s30 }
  0x1e   : > { %s3413_s4 = smov (%p41_p7, %s3411_s4), 0  ;;  %s110_s20 = ssub.s32 %s105_s11, %s106_s3 }
  0x1f   : > { %3362 = sst [smem:[#allocation17_spill]] %s3413_s4  ;;  %s114_s21 = sadd.s32 1, %s2471_s13 }
  0x20   : > { %s43_s19 = ssub.s32 %s2519_s25, %s3413_s4  ;;  %p121_p9 = scmp.ne.s32.totalorder %s2471_s13, %s2467_s12 }
  0x21   : > { %s45_s5 = sor.u32 %s44_s8, %s43_s19  ;;  %s77_s6 = sor.u32 %s76_s7, %s43_s19 }
  0x22   : > { %s47_s18 = sor.u32 %s46_s27, %s45_s5  ;;  %s79_s14 = sor.u32 %s78_s29, %s77_s6 }
  0x23   : > { %p48_p10 = scmp.eq.s32.totalorder %s47_s18, 0  ;;  %p80_p11 = scmp.eq.s32.totalorder %s79_s14, 0 }
  0x24   : > { %s111_s2 = sor.u32 %s110_s20, %s77_s6  ;;  %p2679_p12 = por %p121_p9, %p58_p3 }
  0x25   : > { %s3364_s1 = sadd.s32 1, %s2487_s17  ;;  %p112_p13 = scmp.eq.s32.totalorder %s111_s2, 0 }
  0x26   : > { %s2686_s3 = scalar_select %p48_p10, %s2487_s17, %s3364_s1  }
  0x27   : > { %s2689_s11 = scalar_select %p80_p11, %s2479_s15, %s82_s10  }
  0x28   : > { %s3365_s4 = sadd.s32 4294967295, %s2523_s26   ;;  %p1933_p3 = scmp.ge.s32.totalorder %s2523_s26, 16 }
  0x29   : > { %p155_p0 = scmp.eq.s32.totalorder %s3365_s4, 15 }
  0x2a   : > { %s2694_s8 = scalar_select %p112_p13, %s2471_s13, %s114_s21  }
  0x2b   : > { %p2699_p2 = por %p155_p0, %p57_p1  ;;  %177 = sbr.rel (%p1933_p3) target bundleno = 124 (0x7c), region = 16 }
  0x30   : > { %180 = sbr.rel (!%p2649_p4) target bundleno = 72 (0x48), region = 20  ;;  %s182_s1 = sand.u32 (%p2649_p4), 1, %s2487_s17  }
  0x31   : > { %s2177_s2 = smul.u32 (%p2649_p4), 96, %s2511_s23  ;;  %s1934_s14 = sshll.u32 (%p2649_p4), %s182_s1, 6 }
  0x32   : > { %s2178_s19 = smul.u32 (%p2649_p4), 192, %s2519_s25  ;;  %s184_s9 = scalar_lea.vmem (%p2649_p4), [#allocation5], %s1934_s14 }
  0x33   : > { %s187_s20 = sadd.s32 (%p2649_p4), %s2515_s24, %s2177_s2 }
  0x34   : > { %s189_s21 = sadd.s32 (%p2649_p4), %s2178_s19, %s187_s20 }
  0x35   : > { %s1937_s27 = sshll.u32 %s189_s21, 2 }
  0x36   : > { %s2713_s7 = scalar_lea.vmem %s3338_s0, %s1937_s27 }
  0x37   : > { %v208_v0 = vld [vmem:[%s2713_s7] sm:$0xf]  ;;  %v210_v1 = vld [vmem:[%s2713_s7 + $0x18] sm:$0xf]  ;;  %v212_v2 = vld [vmem:[%s2713_s7 + $0x30] sm:$0xf] }
  0x38   : > { %209 = vst [vmem:[%s184_s9] sm:$0xf] %v208_v0  ;;  %v214_v3 = vld [vmem:[%s2713_s7 + $0x48] sm:$0xf]  ;;  %v216_v4 = vld [vmem:[%s2713_s7 + $0x60] sm:$0xf] }
  0x39   : > { %211 = vst [vmem:[%s184_s9 + $0x4] sm:$0xf] %v210_v1  ;;  %v218_v5 = vld [vmem:[%s2713_s7 + $0x78] sm:$0xf]  ;;  %v220_v6 = vld [vmem:[%s2713_s7 + $0x90] sm:$0xf] }
  0x3a   : > { %213 = vst [vmem:[%s184_s9 + $0x8] sm:$0xf] %v212_v2  ;;  %v222_v7 = vld [vmem:[%s2713_s7 + $0xa8] sm:$0xf]  ;;  %v224_v8 = vld [vmem:[%s2713_s7 + $0xc0] sm:$0xf] }
  0x3b   : > { %215 = vst [vmem:[%s184_s9 + $0xc] sm:$0xf] %v214_v3  ;;  %v226_v9 = vld [vmem:[%s2713_s7 + $0xd8] sm:$0xf]  ;;  %v228_v10 = vld [vmem:[%s2713_s7 + $0xf0] sm:$0xf] }
  0x3c   : > { %217 = vst [vmem:[%s184_s9 + $0x10] sm:$0xf] %v216_v4  ;;  %v230_v11 = vld [vmem:[%s2713_s7 + $0x108] sm:$0xf]  ;;  %v232_v12 = vld [vmem:[%s2713_s7 + $0x120] sm:$0xf] }
  0x3d   : > { %219 = vst [vmem:[%s184_s9 + $0x14] sm:$0xf] %v218_v5  ;;  %v234_v13 = vld [vmem:[%s2713_s7 + $0x138] sm:$0xf]  ;;  %v236_v14 = vld [vmem:[%s2713_s7 + $0x150] sm:$0xf] }
  0x3e   : > { %221 = vst [vmem:[%s184_s9 + $0x18] sm:$0xf] %v220_v6  ;;  %v238_v15 = vld [vmem:[%s2713_s7 + $0x168] sm:$0xf] }
  0x3f   : > { %223 = vst [vmem:[%s184_s9 + $0x1c] sm:$0xf] %v222_v7 }
  0x40   : > { %225 = vst [vmem:[%s184_s9 + $0x20] sm:$0xf] %v224_v8 }
  0x41   : > { %227 = vst [vmem:[%s184_s9 + $0x24] sm:$0xf] %v226_v9 }
  0x42   : > { %229 = vst [vmem:[%s184_s9 + $0x28] sm:$0xf] %v228_v10 }
  0x43   : > { %231 = vst [vmem:[%s184_s9 + $0x2c] sm:$0xf] %v230_v11 }
  0x44   : > { %233 = vst [vmem:[%s184_s9 + $0x30] sm:$0xf] %v232_v12 }
  0x45   : > { %235 = vst [vmem:[%s184_s9 + $0x34] sm:$0xf] %v234_v13 }
  0x46   : > { %237 = vst [vmem:[%s184_s9 + $0x38] sm:$0xf] %v236_v14 }
  0x47   : > { %239 = vst [vmem:[%s184_s9 + $0x3c] sm:$0xf] %v238_v15 }
  0x48 PF: > { %295 = sbr.rel (!%p2665_p8) target bundleno = 98 (0x62), region = 61  ;;  %s297_s10 = sand.u32 (%p2665_p8), 1, %s2479_s15  }
  0x49   : > { %s1818_s5 = smul.u32 (%p2665_p8), 96, %s2507_s22  ;;  %s1938_s6 = sshll.u32 (%p2665_p8), %s297_s10, 6 }
  0x4a   : > { %s1820_s1 = smul.u32 (%p2665_p8), 192, %s2519_s25  ;;  %s3367_s27 = sld [smem:[#allocation18_spill]] (%p2665_p8) }
  0x4b   : > { %s1819_s2 = sadd.s32 (%p2665_p8), %s2515_s24, %s1818_s5  ;;  %s299_s28 = scalar_lea.vmem (%p2665_p8), [#allocation6], %s1938_s6 }
  0x4c   : > { %s1821_s14 = sadd.s32 (%p2665_p8), %s1820_s1, %s1819_s2 }
  0x4d   : > { %s1939_s19 = sshll.u32 %s1821_s14, 2 }
  0x50   : > { %s2740_s29 = scalar_lea.vmem %s3367_s27, %s1939_s19 }
  0x51   : > { %v1940_v16 = vld [vmem:[%s2740_s29 + $0x8] sm:$0xf]  ;;  %v1941_v17 = vld [vmem:[%s2740_s29 + $0x20] sm:$0xf]  ;;  %v1942_v18 = vld [vmem:[%s2740_s29 + $0x38] sm:$0xf] }
  0x52   : > { %325 = vst [vmem:[%s299_s28] sm:$0xf] %v1940_v16  ;;  %v1943_v19 = vld [vmem:[%s2740_s29 + $0x50] sm:$0xf]  ;;  %v1944_v20 = vld [vmem:[%s2740_s29 + $0x68] sm:$0xf] }
  0x53   : > { %327 = vst [vmem:[%s299_s28 + $0x4] sm:$0xf] %v1941_v17  ;;  %v1945_v21 = vld [vmem:[%s2740_s29 + $0x80] sm:$0xf]  ;;  %v1946_v22 = vld [vmem:[%s2740_s29 + $0x98] sm:$0xf] }
  0x54   : > { %329 = vst [vmem:[%s299_s28 + $0x8] sm:$0xf] %v1942_v18  ;;  %v1947_v23 = vld [vmem:[%s2740_s29 + $0xb0] sm:$0xf]  ;;  %v1948_v24 = vld [vmem:[%s2740_s29 + $0xc8] sm:$0xf] }
  0x55   : > { %331 = vst [vmem:[%s299_s28 + $0xc] sm:$0xf] %v1943_v19  ;;  %v1949_v25 = vld [vmem:[%s2740_s29 + $0xe0] sm:$0xf]  ;;  %v1950_v26 = vld [vmem:[%s2740_s29 + $0xf8] sm:$0xf] }
  0x56   : > { %333 = vst [vmem:[%s299_s28 + $0x10] sm:$0xf] %v1944_v20  ;;  %v1951_v27 = vld [vmem:[%s2740_s29 + $0x110] sm:$0xf]  ;;  %v1952_v28 = vld [vmem:[%s2740_s29 + $0x128] sm:$0xf] }
  0x57   : > { %335 = vst [vmem:[%s299_s28 + $0x14] sm:$0xf] %v1945_v21  ;;  %v1953_v29 = vld [vmem:[%s2740_s29 + $0x140] sm:$0xf]  ;;  %v1954_v30 = vld [vmem:[%s2740_s29 + $0x158] sm:$0xf] }
  0x58   : > { %337 = vst [vmem:[%s299_s28 + $0x18] sm:$0xf] %v1946_v22  ;;  %v1955_v31 = vld [vmem:[%s2740_s29 + $0x170] sm:$0xf] }
  0x59   : > { %339 = vst [vmem:[%s299_s28 + $0x1c] sm:$0xf] %v1947_v23 }
  0x5a   : > { %341 = vst [vmem:[%s299_s28 + $0x20] sm:$0xf] %v1948_v24 }
  0x5b   : > { %343 = vst [vmem:[%s299_s28 + $0x24] sm:$0xf] %v1949_v25 }
  0x5c   : > { %345 = vst [vmem:[%s299_s28 + $0x28] sm:$0xf] %v1950_v26 }
  0x5d   : > { %347 = vst [vmem:[%s299_s28 + $0x2c] sm:$0xf] %v1951_v27 }
  0x5e   : > { %349 = vst [vmem:[%s299_s28 + $0x30] sm:$0xf] %v1952_v28 }
  0x5f   : > { %351 = vst [vmem:[%s299_s28 + $0x34] sm:$0xf] %v1953_v29 }
  0x60   : > { %353 = vst [vmem:[%s299_s28 + $0x38] sm:$0xf] %v1954_v30 }
  0x61   : > { %355 = vst [vmem:[%s299_s28 + $0x3c] sm:$0xf] %v1955_v31 }
  0x62 PF: > { %411 = sbr.rel (!%p2679_p12) target bundleno = 124 (0x7c), region = 102  ;;  %s413_s4 = sand.u32 (%p2679_p12), 1, %s2471_s13  }
  0x63   : > { %s1827_s7 = smul.u32 (%p2679_p12), 96, %s2507_s22  ;;  %s1956_s9 = sshll.u32 (%p2679_p12), %s413_s4, 6 }
  0x64   : > { %s1829_s10 = smul.u32 (%p2679_p12), 192, %s2519_s25  ;;  %s3368_s19 = sld [smem:[#allocation19_spill]] (%p2679_p12) }
  0x65   : > { %s1828_s5 = sadd.s32 (%p2679_p12), %s2515_s24, %s1827_s7  ;;  %s415_s30 = scalar_lea.vmem (%p2679_p12), [#allocation7], %s1956_s9 }
  0x66   : > { %s1830_s6 = sadd.s32 (%p2679_p12), %s1829_s10, %s1828_s5 }
  0x67   : > { %s1957_s1 = sshll.u32 %s1830_s6, 2 }
  0x6a   : > { %s2767_s20 = scalar_lea.vmem %s3368_s19, %s1957_s1 }
  0x6b   : > { %v1958_v32 = vld [vmem:[%s2767_s20 + $0x10] sm:$0xf]  ;;  %v1959_v33 = vld [vmem:[%s2767_s20 + $0x28] sm:$0xf]  ;;  %v1960_v34 = vld [vmem:[%s2767_s20 + $0x40] sm:$0xf] }
  0x6c   : > { %441 = vst [vmem:[%s415_s30] sm:$0xf] %v1958_v32  ;;  %v1961_v35 = vld [vmem:[%s2767_s20 + $0x58] sm:$0xf]  ;;  %v1962_v36 = vld [vmem:[%s2767_s20 + $0x70] sm:$0xf] }
  0x6d   : > { %443 = vst [vmem:[%s415_s30 + $0x4] sm:$0xf] %v1959_v33  ;;  %v1963_v37 = vld [vmem:[%s2767_s20 + $0x88] sm:$0xf]  ;;  %v1964_v38 = vld [vmem:[%s2767_s20 + $0xa0] sm:$0xf] }
  0x6e   : > { %445 = vst [vmem:[%s415_s30 + $0x8] sm:$0xf] %v1960_v34  ;;  %v1965_v39 = vld [vmem:[%s2767_s20 + $0xb8] sm:$0xf]  ;;  %v1966_v40 = vld [vmem:[%s2767_s20 + $0xd0] sm:$0xf] }
  0x6f   : > { %447 = vst [vmem:[%s415_s30 + $0xc] sm:$0xf] %v1961_v35  ;;  %v1967_v41 = vld [vmem:[%s2767_s20 + $0xe8] sm:$0xf]  ;;  %v1968_v42 = vld [vmem:[%s2767_s20 + $0x100] sm:$0xf] }
  0x70   : > { %449 = vst [vmem:[%s415_s30 + $0x10] sm:$0xf] %v1962_v36  ;;  %v1969_v43 = vld [vmem:[%s2767_s20 + $0x118] sm:$0xf]  ;;  %v1970_v44 = vld [vmem:[%s2767_s20 + $0x130] sm:$0xf] }
  0x71   : > { %451 = vst [vmem:[%s415_s30 + $0x14] sm:$0xf] %v1963_v37  ;;  %v1971_v45 = vld [vmem:[%s2767_s20 + $0x148] sm:$0xf]  ;;  %v1972_v46 = vld [vmem:[%s2767_s20 + $0x160] sm:$0xf] }
  0x72   : > { %453 = vst [vmem:[%s415_s30 + $0x18] sm:$0xf] %v1964_v38  ;;  %v1973_v47 = vld [vmem:[%s2767_s20 + $0x178] sm:$0xf] }
  0x73   : > { %455 = vst [vmem:[%s415_s30 + $0x1c] sm:$0xf] %v1965_v39 }
  0x74   : > { %457 = vst [vmem:[%s415_s30 + $0x20] sm:$0xf] %v1966_v40 }
  0x75   : > { %459 = vst [vmem:[%s415_s30 + $0x24] sm:$0xf] %v1967_v41 }
  0x76   : > { %461 = vst [vmem:[%s415_s30 + $0x28] sm:$0xf] %v1968_v42 }
  0x77   : > { %463 = vst [vmem:[%s415_s30 + $0x2c] sm:$0xf] %v1969_v43 }
  0x78   : > { %465 = vst [vmem:[%s415_s30 + $0x30] sm:$0xf] %v1970_v44 }
  0x79   : > { %467 = vst [vmem:[%s415_s30 + $0x34] sm:$0xf] %v1971_v45 }
  0x7a   : > { %469 = vst [vmem:[%s415_s30 + $0x38] sm:$0xf] %v1972_v46 }
  0x7b   : > { %471 = vst [vmem:[%s415_s30 + $0x3c] sm:$0xf] %v1973_v47 }
  0x7c PF: > { %p1974_p1 = scmp.ge.s32.totalorder %s2523_s26, 1  ;;  %p526_p4 = scmp.lt.s32.totalorder %s2523_s26, 17 }
  0x7e   : > { %p527_p5 = pnand %p1974_p1, %p526_p4 }
  0x7f   : > { %s3369_s21 = sld [smem:[#allocation9_spill]] (!%p527_p5)  ;;  %s533_s27 = sand.u32 (!%p527_p5), 1, %s2483_s16  }
  0x80   : > { %530 = sbr.rel (%p527_p5) target bundleno = 1089 (0x441), region = 143  ;;  %s1975_s28 = sshll.u32 (!%p527_p5), %s533_s27, 6 }
  0x81   : > { %s547_s7 = sand.u32 (!%p527_p5), 1, %s2467_s12   ;;  %s2790_s10 = scalar_lea.vmem (!%p527_p5), [#allocation5], %s1975_s28 }
  0x82   : > { %s1977_s9 = sshll.u32 (!%p527_p5), %s547_s7, 6  ;;  %s2796_s1 = scalar_lea.vmem (!%p527_p5), [#allocation8], %s1975_s28 }
  0x83   : > { %s2794_s6 = scalar_lea.vmem (!%p527_p5), [#allocation7], %s1977_s9  ;;  %s3370_s2 = sld [smem:[#allocation10_spill]] (!%p527_p5) }
  0x85   : > { %s540_s29 = sand.u32 1, %s3369_s21  }
  0x86   : > { %s1976_s4 = sshll.u32 %s540_s29, 6 }
  0x87   : > { %s2792_s5 = scalar_lea.vmem [#allocation6], %s1976_s4 }
  0x89   : > { %p1979_p6 = scmp.ne.s32.totalorder %s3370_s2, 0 }
  0x8b   : > { %586 = sbr.rel (%p1979_p6) target bundleno = 193 (0xc1), region = 159 }
  0x90   : > { %vm587_vm0 = vcmask 7168   ;;  %v2525_v48 = vmov -inf   ;;  %v2526_v49 = vmov 0.0  }
  0x91   : > { %588 = vst.msk [vmem:[#allocation2] sm:$0xff] %vm587_vm0, %v2525_v48 }
  0x92   : > { %589 = vst.msk [vmem:[#allocation2 + $0x8] sm:$0xff] %vm587_vm0, %v2525_v48 }
  0x93   : > { %590 = vst.msk [vmem:[#allocation2 + $0x10] sm:$0xff] %vm587_vm0, %v2525_v48 }
  0x94   : > { %591 = vst.msk [vmem:[#allocation2 + $0x18] sm:$0xff] %vm587_vm0, %v2525_v48 }
  0x95   : > { %592 = vst.msk [vmem:[#allocation2 + $0x20] sm:$0xff] %vm587_vm0, %v2525_v48 }
  0x96   : > { %593 = vst.msk [vmem:[#allocation2 + $0x28] sm:$0xff] %vm587_vm0, %v2525_v48 }
  0x97   : > { %594 = vst.msk [vmem:[#allocation2 + $0x30] sm:$0xff] %vm587_vm0, %v2525_v48 }
  0x98   : > { %595 = vst.msk [vmem:[#allocation2 + $0x38] sm:$0xff] %vm587_vm0, %v2525_v48 }
  0x99   : > { %596 = vst.msk [vmem:[#allocation2 + $0x40] sm:$0xff] %vm587_vm0, %v2525_v48 }
  0x9a   : > { %597 = vst.msk [vmem:[#allocation2 + $0x48] sm:$0xff] %vm587_vm0, %v2525_v48 }
  0x9b   : > { %598 = vst.msk [vmem:[#allocation2 + $0x50] sm:$0xff] %vm587_vm0, %v2525_v48 }
  0x9c   : > { %599 = vst.msk [vmem:[#allocation2 + $0x58] sm:$0xff] %vm587_vm0, %v2525_v48 }
  0x9d   : > { %600 = vst.msk [vmem:[#allocation2 + $0x60] sm:$0xff] %vm587_vm0, %v2525_v48 }
  0x9e   : > { %601 = vst.msk [vmem:[#allocation2 + $0x68] sm:$0xff] %vm587_vm0, %v2525_v48 }
  0x9f   : > { %602 = vst.msk [vmem:[#allocation2 + $0x70] sm:$0xff] %vm587_vm0, %v2525_v48 }
  0xa0   : > { %603 = vst.msk [vmem:[#allocation2 + $0x78] sm:$0xff] %vm587_vm0, %v2525_v48 }
  0xa1   : > { %604 = vst.msk [vmem:[#allocation3] sm:$0xff] %vm587_vm0, %v2526_v49 }
  0xa2   : > { %605 = vst.msk [vmem:[#allocation3 + $0x8] sm:$0xff] %vm587_vm0, %v2526_v49 }
  0xa3   : > { %606 = vst.msk [vmem:[#allocation3 + $0x10] sm:$0xff] %vm587_vm0, %v2526_v49 }
  0xa4   : > { %607 = vst.msk [vmem:[#allocation3 + $0x18] sm:$0xff] %vm587_vm0, %v2526_v49 }
  0xa5   : > { %608 = vst.msk [vmem:[#allocation3 + $0x20] sm:$0xff] %vm587_vm0, %v2526_v49 }
  0xa6   : > { %609 = vst.msk [vmem:[#allocation3 + $0x28] sm:$0xff] %vm587_vm0, %v2526_v49 }
  0xa7   : > { %610 = vst.msk [vmem:[#allocation3 + $0x30] sm:$0xff] %vm587_vm0, %v2526_v49 }
  0xa8   : > { %611 = vst.msk [vmem:[#allocation3 + $0x38] sm:$0xff] %vm587_vm0, %v2526_v49 }
  0xa9   : > { %612 = vst.msk [vmem:[#allocation3 + $0x40] sm:$0xff] %vm587_vm0, %v2526_v49 }
  0xaa   : > { %613 = vst.msk [vmem:[#allocation3 + $0x48] sm:$0xff] %vm587_vm0, %v2526_v49 }
  0xab   : > { %614 = vst.msk [vmem:[#allocation3 + $0x50] sm:$0xff] %vm587_vm0, %v2526_v49 }
  0xac   : > { %615 = vst.msk [vmem:[#allocation3 + $0x58] sm:$0xff] %vm587_vm0, %v2526_v49 }
  0xad   : > { %616 = vst.msk [vmem:[#allocation3 + $0x60] sm:$0xff] %vm587_vm0, %v2526_v49 }
  0xae   : > { %617 = vst.msk [vmem:[#allocation3 + $0x68] sm:$0xff] %vm587_vm0, %v2526_v49 }
  0xaf   : > { %618 = vst.msk [vmem:[#allocation3 + $0x70] sm:$0xff] %vm587_vm0, %v2526_v49 }
  0xb0   : > { %619 = vst.msk [vmem:[#allocation3 + $0x78] sm:$0xff] %vm587_vm0, %v2526_v49 }
  0xb1   : > { %620 = vst [vmem:[#allocation4 + $0x30] sm:$0xff] %v2526_v49 }
  0xb2   : > { %621 = vst [vmem:[#allocation4] sm:$0xff] %v2526_v49 }
  0xb3   : > { %622 = vst [vmem:[#allocation4 + $0x58] sm:$0xff] %v2526_v49 }
  0xb4   : > { %623 = vst [vmem:[#allocation4 + $0x18] sm:$0xff] %v2526_v49 }
  0xb5   : > { %624 = vst [vmem:[#allocation4 + $0x50] sm:$0xff] %v2526_v49 }
  0xb6   : > { %625 = vst [vmem:[#allocation4 + $0x68] sm:$0xff] %v2526_v49 }
  0xb7   : > { %626 = vst [vmem:[#allocation4 + $0x8] sm:$0xff] %v2526_v49 }
  0xb8   : > { %627 = vst [vmem:[#allocation4 + $0x48] sm:$0xff] %v2526_v49 }
  0xb9   : > { %628 = vst [vmem:[#allocation4 + $0x40] sm:$0xff] %v2526_v49 }
  0xba   : > { %629 = vst [vmem:[#allocation4 + $0x20] sm:$0xff] %v2526_v49 }
  0xbb   : > { %630 = vst [vmem:[#allocation4 + $0x10] sm:$0xff] %v2526_v49 }
  0xbc   : > { %631 = vst [vmem:[#allocation4 + $0x38] sm:$0xff] %v2526_v49 }
  0xbd   : > { %632 = vst [vmem:[#allocation4 + $0x60] sm:$0xff] %v2526_v49 }
  0xbe   : > { %633 = vst [vmem:[#allocation4 + $0x70] sm:$0xff] %v2526_v49 }
  0xbf   : > { %634 = vst [vmem:[#allocation4 + $0x78] sm:$0xff] %v2526_v49 }
  0xc0   : > { %635 = vst [vmem:[#allocation4 + $0x28] sm:$0xff] %v2526_v49 }
  0xc1 PF: > { %s3371_s12 = sld [smem:[#allocation10_spill]] }
  0xc2   : > { %s3372_s16 = sld [smem:[#allocation11_spill]] }
  0xc7   : > { %s1980_s14 = sshll.u32 %s3371_s12, 7 }
  0xc8   : > { %s2056_s19 = sshll.u32 %s3372_s16, 7 }
  0xc9   : > { %s2057_s20 = sadd.s32 128, %s2056_s19 }
  0xca   : > { %p1982_p7 = scmp.ge.s32.totalorder %s1980_s14, %s2057_s20 }
  0xcc   : > { %642 = sbr.rel (%p1982_p7) target bundleno = 878 (0x36e), region = 163 }
  0xd1   : > { %v2065_v50 = vld [vmem:[%s2792_s5 + $0x38] sm:$0xff]  ;;  %v2064_v51 = vld [vmem:[%s2792_s5 + $0x30] sm:$0xff]  ;;  %v2063_v52 = vld [vmem:[%s2792_s5 + $0x28] sm:$0xff]  ;;  %v829_v42 = vlaneseq  ;;  %v2857_v45 = vstv %s2056_s19 }
  0xd2   : > { %779 = vmatpush.bf16.xpose.msra.mxu0 %v2065_v50  ;;  %2161 = vmatpush.bf16.xpose.msra.mxu2 %v2065_v50  ;;  %v2062_v53 = vld [vmem:[%s2792_s5 + $0x20] sm:$0xff]  ;;  %v2061_v54 = vld [vmem:[%s2792_s5 + $0x18] sm:$0xff]  ;;  %v2060_v55 = vld [vmem:[%s2792_s5 + $0x10] sm:$0xff]  ;;  %v865_v46 = vstv %s1980_s14 }
  0xd3   : > { %v2059_v56 = vld [vmem:[%s2792_s5 + $0x8] sm:$0xff]  ;;  %v2076_v57 = vld [vmem:[%s2790_s10] sm:$0xff]   ;;  %v2149_v58 = vld [vmem:[%s2790_s10 + $0x18] sm:$0xff]   ;;  %v2853_v43 = vshrl.u32 %v829_v42, 7  ;;  %v864_v44 = vand.u32 127, %v829_v42 }
  0xd4   : > { %v2077_v59 = vunpack.c.l.bf16 %v2076_v57  ;;  %v2078_v60 = vunpack.c.h.bf16 %v2076_v57  ;;  %v2089_v61 = vunpack.c.l.bf16 %v2149_v58  ;;  %v2090_v62 = vunpack.c.h.bf16 %v2149_v58  ;;  %v2058_v63 = vld [vmem:[%s2792_s5] sm:$0xff]  ;;  %v2147_v6 = vld [vmem:[%s2790_s10 + $0x8] sm:$0xff]   ;;  %v2148_v18 = vld [vmem:[%s2790_s10 + $0x10] sm:$0xff]  }
  0xd5   : > { %v2150_v7 = vld [vmem:[%s2790_s10 + $0x20] sm:$0xff]   ;;  %v2081_v8 = vunpack.c.l.bf16 %v2147_v6  ;;  %v2082_v9 = vunpack.c.h.bf16 %v2147_v6  ;;  %v2151_v19 = vld [vmem:[%s2790_s10 + $0x28] sm:$0xff]   ;;  %v2085_v20 = vunpack.c.l.bf16 %v2148_v18  ;;  %v2086_v21 = vunpack.c.h.bf16 %v2148_v18  ;;  %v2152_v30 = vld [vmem:[%s2790_s10 + $0x30] sm:$0xff]  }
  0xd6   : > { %v675_v0 = vmul.f32 0.088388346, %v2077_v59  ;;  %v676_v1 = vmul.f32 0.088388346, %v2078_v60  ;;  %v681_v2 = vmul.f32 0.088388346, %v2089_v61  ;;  %v2093_v10 = vunpack.c.l.bf16 %v2150_v7 }
  0xd7   : > { %v682_v3 = vmul.f32 0.088388346, %v2090_v62  ;;  %v2094_v11 = vunpack.c.h.bf16 %v2150_v7  ;;  %v677_v12 = vmul.f32 0.088388346, %v2081_v8  ;;  %v678_v13 = vmul.f32 0.088388346, %v2082_v9 }
  0xd8   : > { %v691_v4 = vpack.c.bf16 %v676_v1, %v675_v0  ;;  %v683_v14 = vmul.f32 0.088388346, %v2093_v10  ;;  %v2097_v22 = vunpack.c.l.bf16 %v2151_v19  ;;  %v2098_v23 = vunpack.c.h.bf16 %v2151_v19  ;;  %v2153_v36 = vld [vmem:[%s2790_s10 + $0x38] sm:$0xff]  }
  0xd9   : > { %v694_v5 = vpack.c.bf16 %v682_v3, %v681_v2  ;;  %v684_v15 = vmul.f32 0.088388346, %v2094_v11  ;;  %v692_v16 = vpack.c.bf16 %v678_v13, %v677_v12  ;;  %v679_v24 = vmul.f32 0.088388346, %v2085_v20 }
  0xda   : > { %780 = vmatpush.bf16.xpose.msra.mxu0 %v2064_v51  ;;  %2162 = vmatpush.bf16.xpose.msra.mxu2 %v2064_v51  ;;  %v680_v25 = vmul.f32 0.088388346, %v2086_v21  ;;  %v685_v26 = vmul.f32 0.088388346, %v2097_v22  ;;  %v686_v27 = vmul.f32 0.088388346, %v2098_v23  ;;  %v2101_v31 = vunpack.c.l.bf16 %v2152_v30 }
  0xdb   : > { %v695_v17 = vpack.c.bf16 %v684_v15, %v683_v14  ;;  %v2102_v32 = vunpack.c.h.bf16 %v2152_v30  ;;  %v2105_v37 = vunpack.c.l.bf16 %v2153_v36  ;;  %v2106_v38 = vunpack.c.h.bf16 %v2153_v36 }
  0xdc   : > { %v693_v28 = vpack.c.bf16 %v680_v25, %v679_v24  ;;  %v696_v29 = vpack.c.bf16 %v686_v27, %v685_v26  ;;  %v687_v33 = vmul.f32 0.088388346, %v2101_v31  ;;  %v847_v47 = vadd.s32 %v2857_v45, %v2853_v43 }
  0xdd   : > { %v688_v34 = vmul.f32 0.088388346, %v2102_v32  ;;  %v689_v39 = vmul.f32 0.088388346, %v2105_v37  ;;  %v690_v40 = vmul.f32 0.088388346, %v2106_v38  ;;  %v2863_v48 = vadd.s32 %v865_v46, %v864_v44 }
  0xde   : > { %v836_v49 = vadd.s32 48, %v2853_v43  ;;  %v832_v60 = vadd.s32 16, %v2853_v43  ;;  %v838_v61 = vadd.s32 64, %v2853_v43  ;;  %v834_v8 = vadd.s32 32, %v2853_v43 }
  0xdf   : > { %v697_v35 = vpack.c.bf16 %v688_v34, %v687_v33  ;;  %v698_v41 = vpack.c.bf16 %v690_v40, %v689_v39  ;;  %vm867_vm1 = vcmp.le.s32.totalorder %v2863_v48, %v847_v47  ;;  %v840_v14 = vadd.s32 80, %v2853_v43 }
  0xe0   : > { %v855_v2 = vadd.s32 %v2857_v45, %v838_v61  ;;  %v851_v13 = vadd.s32 %v2857_v45, %v834_v8  ;;  %v841_v24 = vadd.s32 88, %v2853_v43  ;;  %v843_v33 = vadd.s32 104, %v2853_v43 }
  0xe1   : > { %v857_v20 = vadd.s32 %v2857_v45, %v840_v14  ;;  %v844_v37 = vadd.s32 112, %v2853_v43 }
  0xe2   : > { %781 = vmatpush.bf16.xpose.msra.mxu0 %v2063_v52  ;;  %2163 = vmatpush.bf16.xpose.msra.mxu2 %v2063_v52  ;;  %v853_v52 = vadd.s32 %v2857_v45, %v836_v49  ;;  %vm875_vm6 = vcmp.le.s32.totalorder %v2863_v48, %v855_v2  ;;  %vm871_vm9 = vcmp.le.s32.totalorder %v2863_v48, %v851_v13  ;;  %v2995_v2 = vld [vmem:[#allocation2 + $0x10] sm:$0xff] }
  0xe3   : > { %vm877_vm10 = vcmp.le.s32.totalorder %v2863_v48, %v857_v20  ;;  %v860_v36 = vadd.s32 %v2857_v45, %v843_v33  ;;  %v861_v40 = vadd.s32 %v2857_v45, %v844_v37 }
  0xe4   : > { %vm873_vm2 = vcmp.le.s32.totalorder %v2863_v48, %v853_v52  ;;  %v2959_v52 = vld [vmem:[#allocation2] sm:$0xff] }
  0xe5   : > { %vm880_vm14 = vcmp.le.s32.totalorder %v2863_v48, %v860_v36  ;;  %vm881_vm15 = vcmp.le.s32.totalorder %v2863_v48, %v861_v40  ;;  %v3051_v36 = vld [vmem:[#allocation2 + $0x60] sm:$0xff] }
  0xea   : > { %782 = vmatpush.bf16.xpose.msra.mxu0 %v2062_v53  ;;  %2164 = vmatpush.bf16.xpose.msra.mxu2 %v2062_v53  ;;  %v837_v53 = vadd.s32 56, %v2853_v43 }
  0xec   : > { %v854_v57 = vadd.s32 %v2857_v45, %v837_v53 }
  0xee   : > { %vm874_vm3 = vcmp.le.s32.totalorder %v2863_v48, %v854_v57 }
  0xf2   : > { %783 = vmatpush.bf16.xpose.msra.mxu0 %v2061_v54  ;;  %2165 = vmatpush.bf16.xpose.msra.mxu2 %v2061_v54 }
  0xfa   : > { %784 = vmatpush.bf16.xpose.msra.mxu0 %v2060_v55  ;;  %2166 = vmatpush.bf16.xpose.msra.mxu2 %v2060_v55  ;;  %v831_v55 = vadd.s32 8, %v2853_v43 }
  0xfc   : > { %v848_v59 = vadd.s32 %v2857_v45, %v831_v55 }
  0xfe   : > { %vm868_vm4 = vcmp.le.s32.totalorder %v2863_v48, %v848_v59  ;;  %v2978_v59 = vld [vmem:[#allocation2 + $0x8] sm:$0xff] }
 0x102   : > { %785 = vmatpush.bf16.xpose.msra.mxu0 %v2059_v56  ;;  %2167 = vmatpush.bf16.xpose.msra.mxu2 %v2059_v56 }
 0x10a   : > { %786 = vmatpush.bf16.xpose.msra.mxu0 %v2058_v63  ;;  %2168 = vmatpush.bf16.xpose.msra.mxu2 %v2058_v63  ;;  %v849_v63 = vadd.s32 %v2857_v45, %v832_v60 }
 0x10c   : > { %vm869_vm5 = vcmp.le.s32.totalorder %v2863_v48, %v849_v63 }
 0x111   : > { %787 = vmatmul.bf16.vlgmr.msra.gmra.mxu0 %v691_v4  ;;  %802 = vmatmul.bf16.vlgmr.msra.gmra.mxu2 %v694_v5  ;;  %v839_v4 = vadd.s32 72, %v2853_v43  ;;  %v833_v5 = vadd.s32 24, %v2853_v43 }
 0x113   : > { %v856_v11 = vadd.s32 %v2857_v45, %v839_v4  ;;  %v850_v12 = vadd.s32 %v2857_v45, %v833_v5 }
 0x115   : > { %vm876_vm7 = vcmp.le.s32.totalorder %v2863_v48, %v856_v11  ;;  %vm870_vm8 = vcmp.le.s32.totalorder %v2863_v48, %v850_v12  ;;  %v3010_v11 = vld [vmem:[#allocation2 + $0x48] sm:$0xff]  ;;  %v902_v12 = vld [vmem:[#allocation2 + $0x18] sm:$0xff] }
 0x121   : > { %792 = vmatmul.bf16.gmra.mxu0 %v692_v16  ;;  %807 = vmatmul.bf16.gmra.mxu2 %v695_v17  ;;  %v835_v16 = vadd.s32 40, %v2853_v43 }
 0x123   : > { %v852_v22 = vadd.s32 %v2857_v45, %v835_v16 }
 0x125   : > { %vm872_vm11 = vcmp.le.s32.totalorder %v2863_v48, %v852_v22 }
 0x131   : > { %797 = vmatmul.bf16.gmra.mxu0 %v693_v28  ;;  %812 = vmatmul.bf16.gmra.mxu2 %v696_v29  ;;  %v858_v28 = vadd.s32 %v2857_v45, %v841_v24  ;;  %v842_v29 = vadd.s32 96, %v2853_v43 }
 0x133   : > { %vm878_vm12 = vcmp.le.s32.totalorder %v2863_v48, %v858_v28  ;;  %v859_v31 = vadd.s32 %v2857_v45, %v842_v29 }
 0x135   : > { %vm879_vm13 = vcmp.le.s32.totalorder %v2863_v48, %v859_v31  ;;  %v3042_v31 = vld [vmem:[#allocation2 + $0x58] sm:$0xff] }
 0x141   : > { %817 = vmatmul.bf16.gmra.mxu2 %v697_v35 }
 0x151   : > { %822 = vmatmul.bf16.gmra.mxu2 %v698_v41  ;;  %v845_v41 = vadd.s32 120, %v2853_v43 }
 0x153   : > { %v862_v46 = vadd.s32 %v2857_v45, %v845_v41  ;;  %v2967_v45 = vld [vmem:[#allocation2 + $0x30] sm:$0xff]  ;;  %v3062_v41 = vld [vmem:[#allocation2 + $0x68] sm:$0xff] }
 0x155   : > { %vm882_vm0 = vcmp.le.s32.totalorder %v2863_v48, %v862_v46 }
 0x18e   : > { %v788_v50 = vpop.f32.mrf.mxu0 }
 0x18f   : > { %v2867_v51 = vsel %vm867_vm1, %v788_v50, -1e+30  ;;  %v2527_v50 = vmov 0   ;;  %vm1219_vm1 = vcmask 7168  }
 0x190   : > { %915 = vmax.xlane.f32.xlu0 %v2867_v51  ;;  %2303 = vset.pattern.permute.xlu1 %v2527_v50 }
 0x191   : > { %2304 = vset.pattern.permute.xlu2 %v2527_v50  ;;  %2305 = vset.pattern.permute.xlu0 %v2527_v50 }
 0x194   : > { %v803_v54 = vpop.f32.mrf.mxu2 }
 0x195   : > { %v2875_v58 = vsel %vm873_vm2, %v803_v54, -1e+30 }
 0x196   : > { %v790_v56 = vpop.f32.mrf.mxu0 }
 0x197   : > { %v2888_v3 = vsel %vm868_vm4, %v790_v56, -1e+30  ;;  %v2976_v56 = vld [vmem:[#allocation2 + $0x38] sm:$0xff] }
 0x198   : > { %927 = vmax.xlane.f32.xlu0 %v2875_v58 }
 0x19c   : > { %v805_v62 = vpop.f32.mrf.mxu2 }
 0x19d   : > { %v2884_v0 = vsel %vm874_vm3, %v805_v62, -1e+30 }
 0x19e   : > { %929 = vmax.xlane.f32.xlu1 %v2884_v0  ;;  %v793_v1 = vpop.f32.mrf.mxu0 }
 0x19f   : > { %v2895_v6 = vsel %vm869_vm5, %v793_v1, -1e+30  ;;  %v2993_v1 = vld [vmem:[#allocation2 + $0x40] sm:$0xff] }
 0x1a0   : > { %917 = vmax.xlane.f32.xlu0 %v2888_v3 }
 0x1a4   : > { %v808_v7 = vpop.f32.mrf.mxu2 }
 0x1a5   : > { %v2898_v9 = vsel %vm875_vm6, %v808_v7, -1e+30 }
 0x1a6   : > { %931 = vmax.xlane.f32.xlu2 %v2898_v9  ;;  %919 = vmax.xlane.f32.xlu1 %v2895_v6  ;;  %v795_v10 = vpop.f32.mrf.mxu0 }
 0x1a7   : > { %v2912_v18 = vsel %vm870_vm8, %v795_v10, -1e+30 }
 0x1ac   : > { %v810_v15 = vpop.f32.mrf.mxu2 }
 0x1ad   : > { %v2910_v17 = vsel %vm876_vm7, %v810_v15, -1e+30  ;;  %v3012_v15 = vld [vmem:[#allocation2 + $0x20] sm:$0xff] }
 0x1ae   : > { %933 = vmax.xlane.f32.xlu0 %v2910_v17  ;;  %921 = vmax.xlane.f32.xlu1 %v2912_v18  ;;  %v798_v19 = vpop.f32.mrf.mxu0 }
 0x1af   : > { %v2917_v21 = vsel %vm871_vm9, %v798_v19, -1e+30 }
 0x1b0   : > { %923 = vmax.xlane.f32.xlu2 %v2917_v21 }
 0x1b4   : > { %v813_v23 = vpop.f32.mrf.mxu2 }
 0x1b5   : > { %v2924_v25 = vsel %vm877_vm10, %v813_v23, -1e+30  ;;  %v3026_v23 = vld [vmem:[#allocation2 + $0x50] sm:$0xff] }
 0x1b6   : > { %935 = vmax.xlane.f32.xlu1 %v2924_v25  ;;  %v800_v26 = vpop.f32.mrf.mxu0 }
 0x1b7   : > { %v2927_v27 = vsel %vm872_vm11, %v800_v26, -1e+30  ;;  %v3028_v26 = vld [vmem:[#allocation2 + $0x28] sm:$0xff] }
 0x1b8   : > { %925 = vmax.xlane.f32.xlu2 %v2927_v27 }
 0x1bc   : > { %v815_v30 = vpop.f32.mrf.mxu2 }
 0x1bd   : > { %v2934_v32 = vsel %vm878_vm12, %v815_v30, -1e+30 }
 0x1c0   : > { %937 = vmax.xlane.f32.xlu2 %v2934_v32 }
 0x1c4   : > { %v818_v34 = vpop.f32.mrf.mxu2 }
 0x1c5   : > { %v2939_v35 = vsel %vm879_vm13, %v818_v34, -1e+30 }
 0x1c6   : > { %939 = vmax.xlane.f32.xlu0 %v2939_v35 }
 0x1cc   : > { %v820_v38 = vpop.f32.mrf.mxu2 }
 0x1cd   : > { %v2945_v39 = vsel %vm880_vm14, %v820_v38, -1e+30 }
 0x1ce   : > { %941 = vmax.xlane.f32.xlu1 %v2945_v39 }
 0x1d4   : > { %v823_v42 = vpop.f32.mrf.mxu2 }
 0x1d5   : > { %v2951_v44 = vsel %vm881_vm15, %v823_v42, -1e+30 }
 0x1d6   : > { %943 = vmax.xlane.f32.xlu2 %v2951_v44 }
 0x1dc   : > { %v825_v47 = vpop.f32.mrf.mxu2 }
 0x1dd   : > { %v2956_v49 = vsel %vm882_vm0, %v825_v47, -1e+30 }
 0x1de   : > { %945 = vmax.xlane.f32.xlu0 %v2956_v49 }
 0x203   : > { %v916_v43 = vpop.xlane.xlu0 %915 }
 0x204   : > { %v2962_v53 = vmax.f32 %v2959_v52, %v916_v43  ;;  %v2073_v43 = vld [vmem:[%s2794_s6 + $0x38] sm:$0xff] }
 0x205   : > { %1404 = vmatpush.bf16.msra.mxu1 %v2073_v43  ;;  %2169 = vmatpush.bf16.msra.mxu3 %v2073_v43 }
 0x206   : > { %1485 = vst.msk [vmem:[#allocation2] sm:$0xff] %vm1219_vm1, %v2962_v53  ;;  %1013 = vperm.xlu1 %2303, %v2962_v53   ;;  %v963_v40 = vsub.f32 %v2959_v52, %v2962_v53  ;;  %v3074_v53 = vld [vmem:[#allocation2 + $0x70] sm:$0xff] }
 0x208   : > { %v979_v47 = vmul.f32 1.442695, %v963_v40 }
 0x20a   : > { %2306 = vpow2.f32 %v979_v47  ;;  %v2068_v47 = vld [vmem:[%s2794_s6 + $0x10] sm:$0xff] }
 0x20b   : > { %v928_v48 = vpop.xlane.xlu0 %927 }
 0x20c   : > { %v2970_v54 = vmax.f32 %v2967_v45, %v928_v48  ;;  %v2072_v48 = vld [vmem:[%s2794_s6 + $0x30] sm:$0xff] }
 0x20d   : > { %1405 = vmatpush.bf16.msra.mxu1 %v2072_v48  ;;  %2170 = vmatpush.bf16.msra.mxu3 %v2072_v48 }
 0x20e   : > { %v969_v55 = vsub.f32 %v2967_v45, %v2970_v54  ;;  %1491 = vst.msk [vmem:[#allocation2 + $0x30] sm:$0xff] %vm1219_vm1, %v2970_v54 }
 0x211   : > { %v930_v57 = vpop.xlane.xlu1 %929 }
 0x212   : > { %v2981_v60 = vmax.f32 %v2976_v56, %v930_v57 }
 0x213   : > { %v918_v61 = vpop.xlane.xlu0 %917 }
 0x214   : > { %v970_v62 = vsub.f32 %v2976_v56, %v2981_v60  ;;  %1492 = vst.msk [vmem:[#allocation2 + $0x38] sm:$0xff] %vm1219_vm1, %v2981_v60  ;;  %v2988_v63 = vmax.f32 %v2978_v59, %v918_v61 }
 0x216   : > { %1486 = vst.msk [vmem:[#allocation2 + $0x8] sm:$0xff] %vm1219_vm1, %v2988_v63  ;;  %1018 = vperm.xlu2 %2304, %v2988_v63  }
 0x219   : > { %v932_v4 = vpop.xlane.xlu2 %931  ;;  %v920_v5 = vpop.xlane.xlu1 %919 }
 0x21a   : > { %v2998_v7 = vmax.f32 %v2993_v1, %v932_v4  ;;  %v3001_v8 = vmax.f32 %v2995_v2, %v920_v5  ;;  %v964_v5 = vsub.f32 %v2978_v59, %v2988_v63  ;;  %v3093_v59 = vld [vmem:[#allocation2 + $0x78] sm:$0xff] }
 0x21c   : > { %v971_v10 = vsub.f32 %v2993_v1, %v2998_v7  ;;  %1493 = vst.msk [vmem:[#allocation2 + $0x40] sm:$0xff] %vm1219_vm1, %v2998_v7  ;;  %1023 = vperm.xlu0 %2305, %v3001_v8   ;;  %v981_v63 = vmul.f32 1.442695, %v964_v5 }
 0x21d   : > { %1487 = vst.msk [vmem:[#allocation2 + $0x10] sm:$0xff] %vm1219_vm1, %v3001_v8 }
 0x21e   : > { %v995_v48 = vmul.f32 1.442695, %v971_v10 }
 0x221   : > { %v934_v13 = vpop.xlane.xlu0 %933  ;;  %v922_v14 = vpop.xlane.xlu1 %921 }
 0x222   : > { %v3015_v16 = vmax.f32 %v3010_v11, %v934_v13  ;;  %v950_v19 = vmax.f32 %v902_v12, %v922_v14  ;;  %v965_v14 = vsub.f32 %v2995_v2, %v3001_v8  ;;  %v991_v2 = vmul.f32 1.442695, %v969_v55 }
 0x223   : > { %v924_v20 = vpop.xlane.xlu2 %923 }
 0x224   : > { %1494 = vst.msk [vmem:[#allocation2 + $0x48] sm:$0xff] %vm1219_vm1, %v3015_v16  ;;  %v3020_v22 = vmax.f32 %v3012_v15, %v924_v20  ;;  %1028 = vperm.xlu2 %2304, %v950_v19   ;;  %v966_v52 = vsub.f32 %v902_v12, %v950_v19  ;;  %v3087_v12 = vpop.eup %2306  ;;  %v983_v20 = vmul.f32 1.442695, %v965_v14  ;;  %v972_v55 = vsub.f32 %v3010_v11, %v3015_v16  ;;  %v2067_v11 = vld [vmem:[%s2794_s6 + $0x8] sm:$0xff] }
 0x225   : > { %1488 = vst.msk [vmem:[#allocation2 + $0x18] sm:$0xff] %vm1219_vm1, %v950_v19  ;;  %v2071_v19 = vld [vmem:[%s2794_s6 + $0x28] sm:$0xff] }
 0x226   : > { %1489 = vst.msk [vmem:[#allocation2 + $0x20] sm:$0xff] %vm1219_vm1, %v3020_v22  ;;  %1033 = vperm.xlu1 %2303, %v3020_v22   ;;  %v985_v4 = vmul.f32 1.442695, %v966_v52  ;;  %1406 = vmatpush.bf16.msra.mxu1 %v2071_v19  ;;  %v967_v8 = vsub.f32 %v3012_v15, %v3020_v22  ;;  %v993_v52 = vmul.f32 1.442695, %v970_v62 }
 0x227   : > { %2171 = vmatpush.bf16.msra.mxu3 %v2071_v19 }
 0x228   : > { %2308 = vpow2.f32 %v985_v4  ;;  %v987_v15 = vmul.f32 1.442695, %v967_v8  ;;  %v2066_v4 = vld [vmem:[%s2794_s6] sm:$0xff] }
 0x229   : > { %v936_v24 = vpop.xlane.xlu1 %935  ;;  %2310 = vpow2.f32 %v981_v63 }
 0x22a   : > { %v3031_v28 = vmax.f32 %v3026_v23, %v936_v24  ;;  %2312 = vpow2.f32 %v983_v20 }
 0x22b   : > { %v926_v29 = vpop.xlane.xlu2 %925  ;;  %2314 = vpow2.f32 %v991_v2 }
 0x22c   : > { %1495 = vst.msk [vmem:[#allocation2 + $0x50] sm:$0xff] %vm1219_vm1, %v3031_v28  ;;  %v3036_v30 = vmax.f32 %v3028_v26, %v926_v29  ;;  %2316 = vpow2.f32 %v987_v15 }
 0x22e   : > { %1490 = vst.msk [vmem:[#allocation2 + $0x28] sm:$0xff] %vm1219_vm1, %v3036_v30  ;;  %1063 = vperm.xlu1 %2303, %v3031_v28   ;;  %1038 = vperm.xlu2 %2304, %v3036_v30   ;;  %v3110_v40 = vpop.eup %2308  ;;  %v968_v45 = vsub.f32 %v3028_v26, %v3036_v30  ;;  %v997_v26 = vmul.f32 1.442695, %v972_v55 }
 0x230   : > { %v989_v22 = vmul.f32 1.442695, %v968_v45 }
 0x232   : > { %2318 = vpow2.f32 %v989_v22 }
 0x233   : > { %v938_v33 = vpop.xlane.xlu2 %937  ;;  %2320 = vpow2.f32 %v997_v26 }
 0x234   : > { %v3045_v34 = vmax.f32 %v3042_v31, %v938_v33  ;;  %v2070_v33 = vld [vmem:[%s2794_s6 + $0x20] sm:$0xff]  ;;  %2322 = vpow2.f32 %v993_v52 }
 0x235   : > { %1407 = vmatpush.bf16.msra.mxu1 %v2070_v33  ;;  %2172 = vmatpush.bf16.msra.mxu3 %v2070_v33  ;;  %2324 = vpow2.f32 %v995_v48 }
 0x236   : > { %1496 = vst.msk [vmem:[#allocation2 + $0x58] sm:$0xff] %vm1219_vm1, %v3045_v34  ;;  %1043 = vperm.xlu1 %2303, %v2970_v54   ;;  %1068 = vperm.xlu2 %2304, %v3045_v34   ;;  %v2069_v54 = vld [vmem:[%s2794_s6 + $0x18] sm:$0xff] }
 0x239   : > { %v940_v37 = vpop.xlane.xlu0 %939  ;;  %1408 = vmatpush.bf16.msra.mxu1 %v2069_v54  ;;  %2173 = vmatpush.bf16.msra.mxu3 %v2069_v54 }
 0x23a   : > { %v3054_v38 = vmax.f32 %v3051_v36, %v940_v37 }
 0x23c   : > { %1497 = vst.msk [vmem:[#allocation2 + $0x60] sm:$0xff] %vm1219_vm1, %v3054_v38  ;;  %1073 = vperm.xlu0 %2305, %v3054_v38  }
 0x23d   : > { %1409 = vmatpush.bf16.msra.mxu1 %v2068_v47  ;;  %2174 = vmatpush.bf16.msra.mxu3 %v2068_v47 }
 0x23e   : > { %1048 = vperm.xlu1 %2303, %v2981_v60   ;;  %v974_v60 = vsub.f32 %v3042_v31, %v3045_v34 }
 0x240   : > { %v1001_v1 = vmul.f32 1.442695, %v974_v60 }
 0x241   : > { %v942_v42 = vpop.xlane.xlu1 %941  ;;  %1410 = vmatpush.bf16.msra.mxu1 %v2067_v11  ;;  %2175 = vmatpush.bf16.msra.mxu3 %v2067_v11 }
 0x242   : > { %v3065_v46 = vmax.f32 %v3062_v41, %v942_v42  ;;  %v3118_v42 = vpop.eup %2310 }
 0x243   : > { %v3121_v43 = vpop.eup %2312 }
 0x244   : > { %v976_v50 = vsub.f32 %v3062_v41, %v3065_v46  ;;  %1498 = vst.msk [vmem:[#allocation2 + $0x68] sm:$0xff] %vm1219_vm1, %v3065_v46  ;;  %1078 = vperm.xlu2 %2304, %v3065_v46   ;;  %v3125_v30 = vpop.eup %2314 }
 0x245   : > { %1411 = vmatpush.bf16.msra.mxu1 %v2066_v4  ;;  %2176 = vmatpush.bf16.msra.mxu3 %v2066_v4 }
 0x246   : > { %1053 = vperm.xlu1 %2303, %v2998_v7  }
 0x249   : > { %v944_v57 = vpop.xlane.xlu2 %943 }
 0x24a   : > { %v3078_v61 = vmax.f32 %v3074_v53, %v944_v57  ;;  %v3137_v57 = vpop.eup %2316 }
 0x24b   : > { %v3140_v5 = vpop.eup %2318 }
 0x24c   : > { %v977_v13 = vsub.f32 %v3074_v53, %v3078_v61  ;;  %1499 = vst.msk [vmem:[#allocation2 + $0x70] sm:$0xff] %vm1219_vm1, %v3078_v61  ;;  %1083 = vperm.xlu0 %2305, %v3078_v61   ;;  %v3146_v56 = vpop.eup %2320 }
 0x24d   : > { %v3151_v7 = vpop.eup %2322 }
 0x24e   : > { %1254 = vperm.xlu1 %2303, %v3087_v12   ;;  %v3153_v10 = vpop.eup %2324 }
 0x251   : > { %v946_v24 = vpop.xlane.xlu0 %945 }
 0x252   : > { %v3096_v29 = vmax.f32 %v3093_v59, %v946_v24 }
 0x254   : > { %v978_v37 = vsub.f32 %v3093_v59, %v3096_v29  ;;  %1500 = vst.msk [vmem:[#allocation2 + $0x78] sm:$0xff] %vm1219_vm1, %v3096_v29  ;;  %1088 = vperm.xlu2 %2304, %v3096_v29   ;;  %1058 = vperm.xlu0 %2305, %v3015_v16   ;;  %v975_v16 = vsub.f32 %v3051_v36, %v3054_v38  ;;  %v1007_v59 = vmul.f32 1.442695, %v977_v13  ;;  %v1237_v13 = vld [vmem:[#allocation4] sm:$0xff] }
 0x255   : > { %v973_v36 = vsub.f32 %v3026_v23, %v3031_v28 }
 0x256   : > { %1269 = vperm.xlu1 %2303, %v3110_v40   ;;  %v1003_v14 = vmul.f32 1.442695, %v975_v16 }
 0x257   : > { %v999_v62 = vmul.f32 1.442695, %v973_v36 }
 0x258   : > { %2326 = vpow2.f32 %v1003_v14 }
 0x259   : > { %2328 = vpow2.f32 %v999_v62 }
 0x25a   : > { %2330 = vpow2.f32 %v1001_v1 }
 0x25c   : > { %1259 = vperm.xlu2 %2304, %v3118_v42   ;;  %1264 = vperm.xlu0 %2305, %v3121_v43  }
 0x25e   : > { %1284 = vperm.xlu1 %2303, %v3125_v30   ;;  %v3157_v23 = vpop.eup %2326 }
 0x25f   : > { %v3160_v31 = vpop.eup %2328 }
 0x260   : > { %v3162_v34 = vpop.eup %2330 }
 0x264   : > { %1279 = vperm.xlu2 %2304, %v3140_v5   ;;  %1274 = vperm.xlu0 %2305, %v3137_v57  }
 0x266   : > { %1299 = vperm.xlu1 %2303, %v3146_v56  }
 0x26c   : > { %1294 = vperm.xlu2 %2304, %v3153_v10   ;;  %1289 = vperm.xlu0 %2305, %v3151_v7  }
 0x26e   : > { %1314 = vperm.xlu1 %2303, %v3157_v23  }
 0x270   : > { %v1019_v28 = vpop.permute.xlu2 %1018 }
 0x271   : > { %v1092_v38 = vsub.f32 %v2888_v3, %v1019_v28 }
 0x273   : > { %v1109_v19 = vmul.f32 1.442695, %v1092_v38 }
 0x274   : > { %1309 = vperm.xlu2 %2304, %v3162_v34   ;;  %1304 = vperm.xlu0 %2305, %v3160_v31  }
 0x275   : > { %2332 = vpow2.f32 %v1109_v19 }
 0x278   : > { %v1014_v63 = vpop.permute.xlu1 %1013 }
 0x279   : > { %v1091_v20 = vsub.f32 %v2867_v51, %v1014_v63 }
 0x27b   : > { %v1107_v24 = vmul.f32 1.442695, %v1091_v20  ;;  %v2333_v33 = vpop.eup %2332 }
 0x27d   : > { %2334 = vpow2.f32 %v1107_v24 }
 0x27e   : > { %v1029_v45 = vpop.permute.xlu2 %1028 }
 0x27f   : > { %v1094_v54 = vsub.f32 %v2912_v18, %v1029_v45 }
 0x281   : > { %v1113_v55 = vmul.f32 1.442695, %v1094_v54 }
 0x283   : > { %v2335_v2 = vpop.eup %2334  ;;  %2336 = vpow2.f32 %v1113_v55 }
 0x284   : > { %v1348_v8 = vpack.c.bf16 %v2333_v33, %v2335_v2 }
 0x286   : > { %1412 = vmatmul.bf16.vlgmr.msra.gmra.mxu1 %v1348_v8 }
 0x288   : > { %v1039_v15 = vpop.permute.xlu2 %1038 }
 0x289   : > { %v3170_v26 = vpop.eup %2336  ;;  %v1096_v18 = vsub.f32 %v2927_v27, %v1039_v15 }
 0x28e   : > { %v1024_v3 = vpop.permute.xlu0 %1023 }
 0x28f   : > { %v1093_v22 = vsub.f32 %v2895_v6, %v1024_v3  ;;  %v1117_v6 = vmul.f32 1.442695, %v1096_v18 }
 0x290   : > { %v1069_v16 = vpop.permute.xlu2 %1068 }
 0x291   : > { %v1111_v47 = vmul.f32 1.442695, %v1093_v22  ;;  %v1102_v4 = vsub.f32 %v2934_v32, %v1069_v16 }
 0x293   : > { %2338 = vpow2.f32 %v1111_v47  ;;  %v1129_v36 = vmul.f32 1.442695, %v1102_v4 }
 0x298   : > { %v1034_v51 = vpop.permute.xlu1 %1033  ;;  %1173 = vadd.xlane.f32.xlu1 %v2333_v33 }
 0x299   : > { %v2339_v11 = vpop.eup %2338  ;;  %v1095_v52 = vsub.f32 %v2917_v21, %v1034_v51 }
 0x29a   : > { %v1349_v48 = vpack.c.bf16 %v3170_v26, %v2339_v11 }
 0x29b   : > { %v1115_v14 = vmul.f32 1.442695, %v1095_v52 }
 0x29c   : > { %1417 = vmatmul.bf16.gmra.mxu1 %v1349_v48 }
 0x29d   : > { %1171 = vadd.xlane.f32.xlu2 %v2335_v2  ;;  %2340 = vpow2.f32 %v1115_v14 }
 0x29e   : > { %2342 = vpow2.f32 %v1117_v6  ;;  %v1079_v19 = vpop.permute.xlu2 %1078 }
 0x29f   : > { %2344 = vpow2.f32 %v1129_v36  ;;  %v1104_v33 = vsub.f32 %v2945_v39, %v1079_v19 }
 0x2a0   : > { %v1064_v60 = vpop.permute.xlu1 %1063 }
 0x2a1   : > { %v1101_v62 = vsub.f32 %v2924_v25, %v1064_v60  ;;  %v1133_v45 = vmul.f32 1.442695, %v1104_v33 }
 0x2a3   : > { %v1127_v1 = vmul.f32 1.442695, %v1101_v62  ;;  %v2341_v21 = vpop.eup %2340 }
 0x2a4   : > { %v2343_v38 = vpop.eup %2342 }
 0x2a5   : > { %2346 = vpow2.f32 %v1127_v1  ;;  %v2345_v32 = vpop.eup %2344  ;;  %v1350_v63 = vpack.c.bf16 %v2343_v38, %v2341_v21 }
 0x2a8   : > { %v1044_v28 = vpop.permute.xlu1 %1043 }
 0x2a9   : > { %v1097_v27 = vsub.f32 %v2875_v58, %v1044_v28 }
 0x2ab   : > { %v2347_v20 = vpop.eup %2346  ;;  %v1119_v24 = vmul.f32 1.442695, %v1097_v27 }
 0x2ac   : > { %1422 = vmatmul.bf16.gmra.mxu1 %v1350_v63  ;;  %v1353_v2 = vpack.c.bf16 %v2345_v32, %v2347_v20  ;;  %v1005_v63 = vmul.f32 1.442695, %v976_v50  ;;  %v1236_v50 = vld [vmem:[#allocation4 + $0x30] sm:$0xff] }
 0x2ad   : > { %2348 = vpow2.f32 %v1119_v24 }
 0x2ae   : > { %v1074_v25 = vpop.permute.xlu0 %1073  ;;  %1437 = vmatmul.bf16.vlgmr.msra.gmra.mxu3 %v1353_v2  ;;  %v1089_v16 = vpop.permute.xlu2 %1088 }
 0x2af   : > { %v1103_v8 = vsub.f32 %v2939_v35, %v1074_v25  ;;  %v1140_v25 = vld [vmem:[#allocation3 + $0x8] sm:$0xff] }
 0x2b0   : > { %v1049_v54 = vpop.permute.xlu1 %1048 }
 0x2b1   : > { %v1131_v55 = vmul.f32 1.442695, %v1103_v8  ;;  %v1098_v3 = vsub.f32 %v2884_v0, %v1049_v54  ;;  %v1106_v0 = vsub.f32 %v2956_v49, %v1089_v16 }
 0x2b3   : > { %v2349_v15 = vpop.eup %2348  ;;  %2350 = vpow2.f32 %v1131_v55  ;;  %v1121_v58 = vmul.f32 1.442695, %v1098_v3  ;;  %v1137_v6 = vmul.f32 1.442695, %v1106_v0  ;;  %v1156_v55 = vmul.f32 %v3118_v42, %v1140_v25  ;;  %v1239_v0 = vld [vmem:[#allocation4 + $0x18] sm:$0xff] }
 0x2b4   : > { %2352 = vpow2.f32 %v1133_v45  ;;  %1183 = vadd.xlane.f32.xlu0 %v2349_v15 }
 0x2b5   : > { %2354 = vpow2.f32 %v1121_v58 }
 0x2b8   : > { %v1054_v22 = vpop.permute.xlu1 %1053 }
 0x2b9   : > { %v2351_v39 = vpop.eup %2350  ;;  %v1099_v47 = vsub.f32 %v2898_v9, %v1054_v22 }
 0x2ba   : > { %v2353_v51 = vpop.eup %2352 }
 0x2bb   : > { %v2355_v52 = vpop.eup %2354  ;;  %v1123_v48 = vmul.f32 1.442695, %v1099_v47  ;;  %v1354_v18 = vpack.c.bf16 %v2353_v51, %v2351_v39 }
 0x2bc   : > { %1175 = vadd.xlane.f32.xlu0 %v2339_v11  ;;  %1185 = vadd.xlane.f32.xlu1 %v2355_v52  ;;  %v1351_v35 = vpack.c.bf16 %v2355_v52, %v2349_v15  ;;  %v1238_v52 = vld [vmem:[#allocation4 + $0x58] sm:$0xff] }
 0x2bd   : > { %2356 = vpow2.f32 %v1123_v48 }
 0x2be   : > { %v1084_v4 = vpop.permute.xlu0 %1083  ;;  %1427 = vmatmul.bf16.gmra.mxu1 %v1351_v35  ;;  %1442 = vmatmul.bf16.gmra.mxu3 %v1354_v18 }
 0x2bf   : > { %v1105_v14 = vsub.f32 %v2951_v44, %v1084_v4 }
 0x2c1   : > { %v1135_v36 = vmul.f32 1.442695, %v1105_v14 }
 0x2c3   : > { %v2357_v60 = vpop.eup %2356  ;;  %2358 = vpow2.f32 %v1135_v36 }
 0x2c4   : > { %1187 = vadd.xlane.f32.xlu2 %v2357_v60  ;;  %1179 = vadd.xlane.f32.xlu1 %v2341_v21  ;;  %2360 = vpow2.f32 %v1137_v6  ;;  %v1255_v21 = vpop.permute.xlu1 %1254 }
 0x2c5   : > { %v1332_v33 = vmul.f32 %v1255_v21, %v1236_v50  ;;  %v1241_v21 = vld [vmem:[#allocation4 + $0x68] sm:$0xff] }
 0x2c6   : > { %v1059_v9 = vpop.permute.xlu0 %1058 }
 0x2c7   : > { %v1100_v11 = vsub.f32 %v2910_v17, %v1059_v9  ;;  %v1009_v17 = vmul.f32 1.442695, %v978_v37  ;;  %v1240_v9 = vld [vmem:[#allocation4 + $0x50] sm:$0xff] }
 0x2c9   : > { %v2359_v62 = vpop.eup %2358  ;;  %v1125_v1 = vmul.f32 1.442695, %v1100_v11 }
 0x2ca   : > { %v2361_v28 = vpop.eup %2360 }
 0x2cb   : > { %2362 = vpow2.f32 %v1125_v1  ;;  %v1355_v49 = vpack.c.bf16 %v2361_v28, %v2359_v62 }
 0x2cc   : > { %1191 = vadd.xlane.f32.xlu1 %v2347_v20  ;;  %1177 = vadd.xlane.f32.xlu2 %v3170_v26  ;;  %v1270_v27 = vpop.permute.xlu1 %1269  ;;  %2364 = vpow2.f32 %v1009_v17  ;;  %v1260_v26 = vpop.permute.xlu2 %1259  ;;  %v1246_v17 = vld [vmem:[#allocation4 + $0x10] sm:$0xff] }
 0x2cd   : > { %2366 = vpow2.f32 %v1005_v63  ;;  %v1333_v45 = vmul.f32 %v1260_v26, %v1237_v13  ;;  %v1335_v14 = vmul.f32 %v1270_v27, %v1239_v0  ;;  %v1243_v0 = vld [vmem:[#allocation4 + $0x48] sm:$0xff] }
 0x2ce   : > { %1447 = vmatmul.bf16.gmra.mxu3 %v1355_v49  ;;  %2368 = vpow2.f32 %v1007_v59  ;;  %v1265_v24 = vpop.permute.xlu0 %1264 }
 0x2cf   : > { %v1334_v35 = vmul.f32 %v1265_v24, %v1238_v52 }
 0x2d1   : > { %v2363_v44 = vpop.eup %2362 }
 0x2d2   : > { %1189 = vadd.xlane.f32.xlu0 %v2363_v44  ;;  %v1352_v19 = vpack.c.bf16 %v2363_v44, %v2357_v60  ;;  %v3192_v20 = vpop.eup %2364  ;;  %v1145_v60 = vld [vmem:[#allocation3 + $0x30] sm:$0xff] }
 0x2d3   : > { %v3200_v37 = vpop.eup %2366  ;;  %v1141_v44 = vld [vmem:[#allocation3 + $0x10] sm:$0xff] }
 0x2d4   : > { %1181 = vadd.xlane.f32.xlu2 %v2343_v38  ;;  %1432 = vmatmul.bf16.gmra.mxu1 %v1352_v19  ;;  %v3195_v38 = vpop.permute.xlu1 %1284  ;;  %v1280_v29 = vpop.permute.xlu2 %1279  ;;  %v1146_v19 = vld [vmem:[#allocation3 + $0x38] sm:$0xff]  ;;  %v1157_v27 = vmul.f32 %v3121_v43, %v1141_v44 }
 0x2d5   : > { %1197 = vadd.xlane.f32.xlu1 %v2353_v51  ;;  %v3205_v41 = vpop.eup %2368  ;;  %v1162_v26 = vmul.f32 %v3151_v7, %v1146_v19  ;;  %v1337_v50 = vmul.f32 %v1280_v29, %v1241_v21  ;;  %v1247_v43 = vld [vmem:[#allocation4 + $0x38] sm:$0xff] }
 0x2d6   : > { %v1275_v54 = vpop.permute.xlu0 %1274 }
 0x2da   : > { %1195 = vadd.xlane.f32.xlu0 %v2351_v39  ;;  %v1139_v39 = vld [vmem:[#allocation3] sm:$0xff] }
 0x2db   : > { %v1155_v47 = vmul.f32 %v3087_v12, %v1139_v39  ;;  %v1161_v12 = vmul.f32 %v3125_v30, %v1145_v60 }
 0x2dc   : > { %1193 = vadd.xlane.f32.xlu2 %v2345_v32  ;;  %v3203_v32 = vpop.permute.xlu1 %1299  ;;  %v3208_v46 = vpop.permute.xlu2 %1294 }
 0x2de   : > { %v3218_v48 = vpop.permute.xlu0 %1289 }
 0x2e2   : > { %1201 = vadd.xlane.f32.xlu0 %v2361_v28 }
 0x2e4   : > { %1199 = vadd.xlane.f32.xlu2 %v2359_v62  ;;  %v3210_v2 = vpop.permute.xlu1 %1314  ;;  %v3212_v8 = vpop.permute.xlu2 %1309  ;;  %v1336_v62 = vmul.f32 %v1275_v54, %v1240_v9  ;;  %v1147_v54 = vld [vmem:[#allocation3 + $0x40] sm:$0xff]  ;;  %v1148_v9 = vld [vmem:[#allocation3 + $0x48] sm:$0xff] }
 0x2e5   : > { %v1163_v29 = vmul.f32 %v3153_v10, %v1147_v54  ;;  %v1245_v54 = vld [vmem:[#allocation4 + $0x20] sm:$0xff] }
 0x2e6   : > { %v1305_v4 = vpop.permute.xlu0 %1304 }
 0x2e7   : > { %v1342_v30 = vmul.f32 %v1305_v4, %v1246_v17 }
 0x2ee   : > { %1329 = vperm.xlu1 %2303, %v3192_v20  }
 0x2f6   : > { %1319 = vperm.xlu0 %2305, %v3200_v37  }
 0x2fc   : > { %1324 = vperm.xlu2 %2304, %v3205_v41  }
 0x303   : > { %v1413_v53 = vpop.f32.mrf.mxu1 }
 0x304   : > { %v1453_v61 = vadd.f32 %v1413_v53, %v1332_v33 }
 0x306   : > { %1469 = vst [vmem:[#allocation4 + $0x30] sm:$0xff] %v1453_v61 }
 0x30b   : > { %v1174_v3 = vpop.xlane.xlu1 %1173  ;;  %v1415_v15 = vpop.f32.mrf.mxu1 }
 0x30c   : > { %v1204_v58 = vadd.f32 %v1174_v3, %v1156_v55  ;;  %v1454_v22 = vadd.f32 %v1415_v15, %v1333_v45  ;;  %v1143_v45 = vld [vmem:[#allocation3 + $0x20] sm:$0xff]  ;;  %v1242_v55 = vld [vmem:[#allocation4 + $0x8] sm:$0xff] }
 0x30d   : > { %v1159_v7 = vmul.f32 %v3137_v57, %v1143_v45  ;;  %v1142_v57 = vld [vmem:[#allocation3 + $0x18] sm:$0xff]  ;;  %v1153_v45 = vld [vmem:[#allocation3 + $0x70] sm:$0xff] }
 0x30e   : > { %1221 = vst.msk [vmem:[#allocation3 + $0x8] sm:$0xff] %vm1219_vm1, %v1204_v58  ;;  %v1343_v58 = vmul.f32 %v3212_v8, %v1247_v43  ;;  %v1158_v8 = vmul.f32 %v3110_v40, %v1142_v57 }
 0x30f   : > { %1470 = vst [vmem:[#allocation4] sm:$0xff] %v1454_v22 }
 0x310   : > { %v1172_v51 = vpop.xlane.xlu2 %1171 }
 0x311   : > { %v1203_v16 = vadd.f32 %v1172_v51, %v1155_v47  ;;  %v1338_v51 = vmul.f32 %v3195_v38, %v1242_v55 }
 0x313   : > { %1220 = vst.msk [vmem:[#allocation3] sm:$0xff] %vm1219_vm1, %v1203_v16 }
 0x319   : > { %v1418_v18 = vpop.f32.mrf.mxu1 }
 0x31a   : > { %v1455_v42 = vadd.f32 %v1418_v18, %v1334_v35  ;;  %v1149_v35 = vld [vmem:[#allocation3 + $0x50] sm:$0xff]  ;;  %v1248_v18 = vld [vmem:[#allocation4 + $0x60] sm:$0xff] }
 0x31b   : > { %v1344_v38 = vmul.f32 %v3210_v2, %v1248_v18 }
 0x31c   : > { %1471 = vst [vmem:[#allocation4 + $0x58] sm:$0xff] %v1455_v42  ;;  %v1165_v42 = vmul.f32 %v3160_v31, %v1149_v35  ;;  %v1144_v31 = vld [vmem:[#allocation3 + $0x28] sm:$0xff] }
 0x31d   : > { %v1160_v44 = vmul.f32 %v3140_v5, %v1144_v31 }
 0x321   : > { %v1420_v6 = vpop.f32.mrf.mxu1 }
 0x322   : > { %v1456_v36 = vadd.f32 %v1420_v6, %v1335_v14 }
 0x324   : > { %1472 = vst [vmem:[#allocation4 + $0x18] sm:$0xff] %v1456_v36 }
 0x327   : > { %v1184_v11 = vpop.xlane.xlu0 %1183 }
 0x328   : > { %v1209_v1 = vadd.f32 %v1184_v11, %v1161_v12  ;;  %v1339_v12 = vmul.f32 %v3218_v48, %v1243_v0 }
 0x329   : > { %v1423_v28 = vpop.f32.mrf.mxu1 }
 0x32a   : > { %1226 = vst.msk [vmem:[#allocation3 + $0x30] sm:$0xff] %vm1219_vm1, %v1209_v1  ;;  %v1457_v49 = vadd.f32 %v1423_v28, %v1336_v62  ;;  %v1164_v1 = vmul.f32 %v3146_v56, %v1148_v9  ;;  %v1152_v28 = vld [vmem:[#allocation3 + $0x68] sm:$0xff]  ;;  %v1150_v56 = vld [vmem:[#allocation3 + $0x58] sm:$0xff] }
 0x32b   : > { %v1168_v19 = vmul.f32 %v3200_v37, %v1152_v28  ;;  %v1166_v37 = vmul.f32 %v3162_v34, %v1150_v56  ;;  %v1169_v34 = vmul.f32 %v3205_v41, %v1153_v45 }
 0x32c   : > { %1473 = vst [vmem:[#allocation4 + $0x50] sm:$0xff] %v1457_v49 }
 0x32f   : > { %v1176_v63 = vpop.xlane.xlu0 %1175  ;;  %v1186_v59 = vpop.xlane.xlu1 %1185 }
 0x330   : > { %v1205_v24 = vadd.f32 %v1176_v63, %v1157_v27  ;;  %v1210_v33 = vadd.f32 %v1186_v59, %v1162_v26  ;;  %v1151_v26 = vld [vmem:[#allocation3 + $0x60] sm:$0xff] }
 0x331   : > { %v1425_v53 = vpop.f32.mrf.mxu1  ;;  %v1438_v61 = vpop.f32.mrf.mxu3  ;;  %v1167_v63 = vmul.f32 %v3157_v23, %v1151_v26  ;;  %v1244_v59 = vld [vmem:[#allocation4 + $0x40] sm:$0xff] }
 0x332   : > { %1222 = vst.msk [vmem:[#allocation3 + $0x10] sm:$0xff] %vm1219_vm1, %v1205_v24  ;;  %v1458_v13 = vadd.f32 %v1425_v53, %v1337_v50  ;;  %v1463_v25 = vadd.f32 %v1438_v61, %v1342_v30 }
 0x333   : > { %1227 = vst.msk [vmem:[#allocation3 + $0x38] sm:$0xff] %vm1219_vm1, %v1210_v33  ;;  %v1340_v33 = vmul.f32 %v3208_v46, %v1244_v59  ;;  %v1341_v46 = vmul.f32 %v3203_v32, %v1245_v54  ;;  %v1249_v32 = vld [vmem:[#allocation4 + $0x70] sm:$0xff] }
 0x334   : > { %1474 = vst [vmem:[#allocation4 + $0x68] sm:$0xff] %v1458_v13  ;;  %v1154_v13 = vld [vmem:[#allocation3 + $0x78] sm:$0xff] }
 0x335   : > { %1479 = vst [vmem:[#allocation4 + $0x10] sm:$0xff] %v1463_v25  ;;  %v1170_v23 = vmul.f32 %v3192_v20, %v1154_v13 }
 0x337   : > { %v1180_v3 = vpop.xlane.xlu1 %1179  ;;  %v1188_v15 = vpop.xlane.xlu2 %1187 }
 0x338   : > { %v1207_v22 = vadd.f32 %v1180_v3, %v1159_v7  ;;  %v1211_v39 = vadd.f32 %v1188_v15, %v1163_v29 }
 0x339   : > { %v1440_v47 = vpop.f32.mrf.mxu3 }
 0x33a   : > { %1224 = vst.msk [vmem:[#allocation3 + $0x20] sm:$0xff] %vm1219_vm1, %v1207_v22  ;;  %v1464_v16 = vadd.f32 %v1440_v47, %v1343_v58  ;;  %v1250_v22 = vld [vmem:[#allocation4 + $0x78] sm:$0xff] }
 0x33b   : > { %1228 = vst.msk [vmem:[#allocation3 + $0x40] sm:$0xff] %vm1219_vm1, %v1211_v39  ;;  %v1428_v52 = vpop.f32.mrf.mxu1  ;;  %v1251_v39 = vld [vmem:[#allocation4 + $0x28] sm:$0xff] }
 0x33c   : > { %1480 = vst [vmem:[#allocation4 + $0x38] sm:$0xff] %v1464_v16  ;;  %v1459_v10 = vadd.f32 %v1428_v52, %v1338_v51 }
 0x33e   : > { %1475 = vst [vmem:[#allocation4 + $0x8] sm:$0xff] %v1459_v10 }
 0x33f   : > { %v1192_v4 = vpop.xlane.xlu1 %1191  ;;  %v1178_v14 = vpop.xlane.xlu2 %1177 }
 0x340   : > { %v1213_v6 = vadd.f32 %v1192_v4, %v1165_v42  ;;  %v1206_v36 = vadd.f32 %v1178_v14, %v1158_v8 }
 0x341   : > { %v1443_v60 = vpop.f32.mrf.mxu3 }
 0x342   : > { %1230 = vst.msk [vmem:[#allocation3 + $0x50] sm:$0xff] %vm1219_vm1, %v1213_v6  ;;  %v1465_v11 = vadd.f32 %v1443_v60, %v1344_v38 }
 0x343   : > { %1223 = vst.msk [vmem:[#allocation3 + $0x18] sm:$0xff] %vm1219_vm1, %v1206_v36  ;;  %v1430_v62 = vpop.f32.mrf.mxu1 }
 0x344   : > { %1481 = vst [vmem:[#allocation4 + $0x60] sm:$0xff] %v1465_v11  ;;  %v1460_v40 = vadd.f32 %v1430_v62, %v1339_v12 }
 0x345   : > { %v1190_v49 = vpop.xlane.xlu0 %1189 }
 0x346   : > { %1476 = vst [vmem:[#allocation4 + $0x48] sm:$0xff] %v1460_v40  ;;  %v1212_v2 = vadd.f32 %v1190_v49, %v1164_v1 }
 0x347   : > { %v1182_v48 = vpop.xlane.xlu2 %1181 }
 0x348   : > { %1229 = vst.msk [vmem:[#allocation3 + $0x48] sm:$0xff] %vm1219_vm1, %v1212_v2  ;;  %v1198_v21 = vpop.xlane.xlu1 %1197  ;;  %v1208_v17 = vadd.f32 %v1182_v48, %v1160_v44 }
 0x349   : > { %v1216_v27 = vadd.f32 %v1198_v21, %v1168_v19  ;;  %v1445_v30 = vpop.f32.mrf.mxu3 }
 0x34a   : > { %1225 = vst.msk [vmem:[#allocation3 + $0x28] sm:$0xff] %vm1219_vm1, %v1208_v17 }
 0x34b   : > { %1233 = vst.msk [vmem:[#allocation3 + $0x68] sm:$0xff] %vm1219_vm1, %v1216_v27 }
 0x34d   : > { %v1196_v50 = vpop.xlane.xlu0 %1195 }
 0x34e   : > { %v1215_v5 = vadd.f32 %v1196_v50, %v1167_v63 }
 0x34f   : > { %v1194_v24 = vpop.xlane.xlu2 %1193 }
 0x350   : > { %1232 = vst.msk [vmem:[#allocation3 + $0x60] sm:$0xff] %vm1219_vm1, %v1215_v5  ;;  %v1214_v53 = vadd.f32 %v1194_v24, %v1166_v37 }
 0x351   : > { %v1433_v61 = vpop.f32.mrf.mxu1  ;;  %v1448_v55 = vpop.f32.mrf.mxu3 }
 0x352   : > { %1231 = vst.msk [vmem:[#allocation3 + $0x58] sm:$0xff] %vm1219_vm1, %v1214_v53  ;;  %v1461_v25 = vadd.f32 %v1433_v61, %v1340_v33 }
 0x354   : > { %1477 = vst [vmem:[#allocation4 + $0x40] sm:$0xff] %v1461_v25 }
 0x355   : > { %v1202_v43 = vpop.xlane.xlu0 %1201 }
 0x356   : > { %v1218_v7 = vadd.f32 %v1202_v43, %v1170_v23 }
 0x357   : > { %v1200_v29 = vpop.xlane.xlu2 %1199 }
 0x358   : > { %1235 = vst.msk [vmem:[#allocation3 + $0x78] sm:$0xff] %vm1219_vm1, %v1218_v7  ;;  %v1217_v3 = vadd.f32 %v1200_v29, %v1169_v34 }
 0x359   : > { %v1435_v15 = vpop.f32.mrf.mxu1  ;;  %v1450_v52 = vpop.f32.mrf.mxu3 }
 0x35a   : > { %1234 = vst.msk [vmem:[#allocation3 + $0x70] sm:$0xff] %vm1219_vm1, %v1217_v3  ;;  %v1462_v58 = vadd.f32 %v1435_v15, %v1341_v46 }
 0x35c   : > { %1478 = vst [vmem:[#allocation4 + $0x20] sm:$0xff] %v1462_v58 }
 0x35f   : > { %v1325_v20 = vpop.permute.xlu2 %1324 }
 0x360   : > { %v1330_v47 = vpop.permute.xlu1 %1329  ;;  %v1346_v51 = vmul.f32 %v1325_v20, %v1250_v22 }
 0x361   : > { %v1347_v16 = vmul.f32 %v1330_v47, %v1251_v39 }
 0x362   : > { %v1467_v41 = vadd.f32 %v1448_v55, %v1346_v51 }
 0x363   : > { %v1468_v35 = vadd.f32 %v1450_v52, %v1347_v16 }
 0x364   : > { %1483 = vst [vmem:[#allocation4 + $0x78] sm:$0xff] %v1467_v41 }
 0x365   : > { %1484 = vst [vmem:[#allocation4 + $0x28] sm:$0xff] %v1468_v35 }
 0x368   : > { %v1320_v57 = vpop.permute.xlu0 %1319 }
 0x369   : > { %v1345_v10 = vmul.f32 %v1320_v57, %v1249_v32 }
 0x36b   : > { %v1466_v18 = vadd.f32 %v1445_v30, %v1345_v10 }
 0x36d   : > { %1482 = vst [vmem:[#allocation4 + $0x70] sm:$0xff] %v1466_v18 }
 0x36e PF: > { %s3375_s27 = sld [smem:[#allocation10_spill]] }
 0x374   : > { %p2048_p8 = scmp.ne.s32.totalorder %s3375_s27, 1 }
 0x376   : > { %1504 = sbr.rel (%p2048_p8) target bundleno = 1061 (0x425), region = 167 }
 0x37b   : > { %v1509_v42 = vld [vmem:[#allocation3 + $0x20] sm:$0xff]  ;;  %v1507_v8 = vld [vmem:[#allocation3 + $0x10] sm:$0xff]  ;;  %v2528_v4 = vmov 0   ;;  %v1510_v14 = vld [vmem:[#allocation3 + $0x28] sm:$0xff] }
 0x37c   : > { %v1505_v0 = vld [vmem:[#allocation3] sm:$0xff]  ;;  %2372 = vset.pattern.permute.xlu2 %v2528_v4  ;;  %2371 = vset.pattern.permute.xlu1 %v2528_v4  ;;  %2373 = vrcp.f32 %v1509_v42  ;;  %v1508_v38 = vld [vmem:[#allocation3 + $0x18] sm:$0xff]  ;;  %v1506_v6 = vld [vmem:[#allocation3 + $0x8] sm:$0xff] }
 0x37d   : > { %2370 = vset.pattern.permute.xlu0 %v2528_v4  ;;  %2375 = vrcp.f32 %v1507_v8  ;;  %v1513_v12 = vld [vmem:[#allocation3 + $0x40] sm:$0xff]  ;;  %v1512_v62 = vld [vmem:[#allocation3 + $0x38] sm:$0xff]  ;;  %v1511_v40 = vld [vmem:[#allocation3 + $0x30] sm:$0xff] }
 0x37e   : > { %2377 = vrcp.f32 %v1505_v0  ;;  %v1516_v28 = vld [vmem:[#allocation3 + $0x58] sm:$0xff]  ;;  %v1515_v2 = vld [vmem:[#allocation3 + $0x50] sm:$0xff]  ;;  %v1514_v19 = vld [vmem:[#allocation3 + $0x48] sm:$0xff] }
 0x37f   : > { %2379 = vrcp.f32 %v1510_v14  ;;  %v1519_v21 = vld [vmem:[#allocation3 + $0x70] sm:$0xff]  ;;  %v1518_v27 = vld [vmem:[#allocation3 + $0x68] sm:$0xff]  ;;  %v1517_v56 = vld [vmem:[#allocation3 + $0x60] sm:$0xff] }
 0x380   : > { %2381 = vrcp.f32 %v1508_v38  ;;  %v1520_v30 = vld [vmem:[#allocation3 + $0x78] sm:$0xff]  ;;  %v1541_v33 = vld [vmem:[#allocation4 + $0x50] sm:$0xff]  ;;  %v1542_v53 = vld [vmem:[#allocation4 + $0x68] sm:$0xff] }
 0x381   : > { %2383 = vrcp.f32 %v1506_v6  ;;  %v1539_v43 = vld [vmem:[#allocation4 + $0x58] sm:$0xff]  ;;  %v1537_v29 = vld [vmem:[#allocation4 + $0x30] sm:$0xff]  ;;  %v1538_v46 = vld [vmem:[#allocation4] sm:$0xff] }
 0x382   : > { %v2374_v36 = vpop.eup %2373  ;;  %2385 = vrcp.f32 %v1513_v12  ;;  %v1540_v7 = vld [vmem:[#allocation4 + $0x18] sm:$0xff]  ;;  %v1544_v51 = vld [vmem:[#allocation4 + $0x48] sm:$0xff]  ;;  %v1547_v18 = vld [vmem:[#allocation4 + $0x10] sm:$0xff] }
 0x383   : > { %v2376_v60 = vpop.eup %2375  ;;  %1575 = vperm.xlu2 %2372, %v2374_v36   ;;  %2387 = vrcp.f32 %v1512_v62  ;;  %v1543_v16 = vld [vmem:[#allocation4 + $0x8] sm:$0xff]  ;;  %v1548_v10 = vld [vmem:[#allocation4 + $0x38] sm:$0xff]  ;;  %v1545_v42 = vld [vmem:[#allocation4 + $0x40] sm:$0xff] }
 0x384   : > { %v2378_v9 = vpop.eup %2377  ;;  %1565 = vperm.xlu1 %2371, %v2376_v60   ;;  %2389 = vrcp.f32 %v1511_v40  ;;  %v1546_v8 = vld [vmem:[#allocation4 + $0x20] sm:$0xff] }
 0x385   : > { %1555 = vperm.xlu0 %2370, %v2378_v9   ;;  %v2380_v11 = vpop.eup %2379  ;;  %2391 = vrcp.f32 %v1516_v28  ;;  %v1549_v62 = vld [vmem:[#allocation4 + $0x60] sm:$0xff] }
 0x386   : > { %v2382_v31 = vpop.eup %2381  ;;  %2393 = vrcp.f32 %v1515_v2  ;;  %v1551_v2 = vld [vmem:[#allocation4 + $0x78] sm:$0xff] }
 0x387   : > { %v2384_v1 = vpop.eup %2383  ;;  %2395 = vrcp.f32 %v1514_v19  ;;  %v1552_v19 = vld [vmem:[#allocation4 + $0x28] sm:$0xff] }
 0x388   : > { %v2386_v49 = vpop.eup %2385  ;;  %2397 = vrcp.f32 %v1519_v21 }
 0x389   : > { %v2388_v44 = vpop.eup %2387  ;;  %2399 = vrcp.f32 %v1518_v27 }
 0x38a   : > { %v2390_v48 = vpop.eup %2389  ;;  %2401 = vrcp.f32 %v1517_v56 }
 0x38b   : > { %1580 = vperm.xlu2 %2372, %v2380_v11   ;;  %v2392_v17 = vpop.eup %2391  ;;  %2403 = vrcp.f32 %v1520_v30  ;;  %v1550_v11 = vld [vmem:[#allocation4 + $0x70] sm:$0xff] }
 0x38c   : > { %1570 = vperm.xlu1 %2371, %v2382_v31   ;;  %v2394_v26 = vpop.eup %2393 }
 0x38d   : > { %1560 = vperm.xlu0 %2370, %v2384_v1   ;;  %v2396_v63 = vpop.eup %2395 }
 0x38e   : > { %v2398_v59 = vpop.eup %2397 }
 0x38f   : > { %v2400_v50 = vpop.eup %2399 }
 0x390   : > { %v2402_v5 = vpop.eup %2401 }
 0x391   : > { %v2404_v37 = vpop.eup %2403 }
 0x393   : > { %1595 = vperm.xlu2 %2372, %v2386_v49  }
 0x394   : > { %1590 = vperm.xlu1 %2371, %v2388_v44  }
 0x395   : > { %1585 = vperm.xlu0 %2370, %v2390_v48  }
 0x39b   : > { %1610 = vperm.xlu2 %2372, %v2392_v17  }
 0x39c   : > { %1605 = vperm.xlu1 %2371, %v2394_v26  }
 0x39d   : > { %1600 = vperm.xlu0 %2370, %v2396_v63  }
 0x3a3   : > { %1625 = vperm.xlu2 %2372, %v2398_v59  }
 0x3a4   : > { %1620 = vperm.xlu1 %2371, %v2400_v50  }
 0x3a5   : > { %1615 = vperm.xlu0 %2370, %v2402_v5  }
 0x3ad   : > { %1630 = vperm.xlu0 %2370, %v2404_v37  }
 0x3dd   : > { %v1576_v24 = vpop.permute.xlu2 %1575 }
 0x3de   : > { %v1637_v61 = vmul.f32 %v1576_v24, %v1541_v33 }
 0x3e5   : > { %v1581_v13 = vpop.permute.xlu2 %1580 }
 0x3e6   : > { %v1638_v25 = vmul.f32 %v1581_v13, %v1542_v53 }
 0x3e8   : > { %v2120_v45 = vpack.c.bf16 %v1638_v25, %v1637_v61 }
 0x3ea   : > { %2155 = vst [vmem:[%s2796_s1 + $0x10] sm:$0xff] %v2120_v45  }
 0x3ed   : > { %v1596_v47 = vpop.permute.xlu2 %1595 }
 0x3ee   : > { %v1641_v36 = vmul.f32 %v1596_v47, %v1545_v42 }
 0x3f5   : > { %v1611_v0 = vpop.permute.xlu2 %1610 }
 0x3f6   : > { %v1566_v23 = vpop.permute.xlu1 %1565  ;;  %v1644_v14 = vmul.f32 %v1611_v0, %v1548_v10 }
 0x3f7   : > { %v1556_v54 = vpop.permute.xlu0 %1555  ;;  %v1635_v34 = vmul.f32 %v1566_v23, %v1539_v43 }
 0x3f8   : > { %v1633_v58 = vmul.f32 %v1556_v54, %v1537_v29 }
 0x3fd   : > { %v1626_v44 = vpop.permute.xlu2 %1625 }
 0x3fe   : > { %v1571_v55 = vpop.permute.xlu1 %1570  ;;  %v1647_v21 = vmul.f32 %v1626_v44, %v1551_v2 }
 0x3ff   : > { %v1636_v3 = vmul.f32 %v1571_v55, %v1540_v7  ;;  %v1561_v15 = vpop.permute.xlu0 %1560 }
 0x400   : > { %v1634_v22 = vmul.f32 %v1561_v15, %v1538_v46 }
 0x401   : > { %v2115_v39 = vpack.c.bf16 %v1636_v3, %v1635_v34 }
 0x402   : > { %v2110_v20 = vpack.c.bf16 %v1634_v22, %v1633_v58 }
 0x403   : > { %2154 = vst [vmem:[%s2796_s1 + $0x8] sm:$0xff] %v2115_v39  }
 0x404   : > { %2111 = vst [vmem:[%s2796_s1] sm:$0xff] %v2110_v20  }
 0x406   : > { %v1591_v52 = vpop.permute.xlu1 %1590 }
 0x407   : > { %v1640_v41 = vmul.f32 %v1591_v52, %v1544_v51  ;;  %v1586_v35 = vpop.permute.xlu0 %1585 }
 0x408   : > { %v1639_v32 = vmul.f32 %v1586_v35, %v1543_v16 }
 0x40a   : > { %v2125_v57 = vpack.c.bf16 %v1640_v41, %v1639_v32 }
 0x40c   : > { %2156 = vst [vmem:[%s2796_s1 + $0x18] sm:$0xff] %v2125_v57  }
 0x40e   : > { %v1606_v4 = vpop.permute.xlu1 %1605 }
 0x40f   : > { %v1643_v38 = vmul.f32 %v1606_v4, %v1547_v18  ;;  %v1601_v6 = vpop.permute.xlu0 %1600 }
 0x410   : > { %v1642_v60 = vmul.f32 %v1601_v6, %v1546_v8 }
 0x411   : > { %v2135_v9 = vpack.c.bf16 %v1644_v14, %v1643_v38 }
 0x412   : > { %v2130_v12 = vpack.c.bf16 %v1642_v60, %v1641_v36 }
 0x413   : > { %2158 = vst [vmem:[%s2796_s1 + $0x28] sm:$0xff] %v2135_v9  }
 0x414   : > { %2157 = vst [vmem:[%s2796_s1 + $0x20] sm:$0xff] %v2130_v12  }
 0x416   : > { %v1621_v31 = vpop.permute.xlu1 %1620 }
 0x417   : > { %v1646_v40 = vmul.f32 %v1621_v31, %v1550_v11  ;;  %v1616_v1 = vpop.permute.xlu0 %1615 }
 0x418   : > { %v1645_v28 = vmul.f32 %v1616_v1, %v1549_v62 }
 0x41a   : > { %v2140_v49 = vpack.c.bf16 %v1646_v40, %v1645_v28 }
 0x41c   : > { %2159 = vst [vmem:[%s2796_s1 + $0x30] sm:$0xff] %v2140_v49  }
 0x41f   : > { %v1631_v48 = vpop.permute.xlu0 %1630 }
 0x420   : > { %v1648_v17 = vmul.f32 %v1631_v48, %v1552_v19 }
 0x422   : > { %v2145_v27 = vpack.c.bf16 %v1648_v17, %v1647_v21 }
 0x424   : > { %2160 = vst [vmem:[%s2796_s1 + $0x38] sm:$0xff] %v2145_v27  }
 0x425 PF: > { %1687 = sbr.rel (!%p2699_p2) target bundleno = 1089 (0x441), region = 171  ;;  %s3376_s29 = sld [smem:[#allocation11_spill]] (%p2699_p2)  ;;  %v1711_v26 = vld [vmem:[%s2796_s1] sm:$0xf] (%p2699_p2)  ;;  %v1713_v56 = vld [vmem:[%s2796_s1 + $0x4] sm:$0xf] (%p2699_p2) }
 0x426   : > { %s3377_s28 = sld [smem:[#allocation13_spill]] (%p2699_p2)  ;;  %v1715_v63 = vld [vmem:[%s2796_s1 + $0x8] sm:$0xf] (%p2699_p2)  ;;  %v1717_v59 = vld [vmem:[%s2796_s1 + $0xc] sm:$0xf] (%p2699_p2) }
 0x427   : > { %s3378_s4 = sld [smem:[#allocation12_spill]] (%p2699_p2)  ;;  %v1719_v50 = vld [vmem:[%s2796_s1 + $0x10] sm:$0xf] (%p2699_p2)  ;;  %v1721_v30 = vld [vmem:[%s2796_s1 + $0x14] sm:$0xf] (%p2699_p2) }
 0x428   : > { %s3379_s12 = sld [smem:[#allocation20_spill]] (%p2699_p2)  ;;  %v1723_v5 = vld [vmem:[%s2796_s1 + $0x18] sm:$0xf] (%p2699_p2)  ;;  %v1725_v37 = vld [vmem:[%s2796_s1 + $0x1c] sm:$0xf] (%p2699_p2) }
 0x429   : > { %v1727_v24 = vld [vmem:[%s2796_s1 + $0x20] sm:$0xf] (%p2699_p2)  ;;  %v1729_v33 = vld [vmem:[%s2796_s1 + $0x24] sm:$0xf] (%p2699_p2)  ;;  %v1731_v53 = vld [vmem:[%s2796_s1 + $0x28] sm:$0xf] (%p2699_p2) }
 0x42a   : > { %v1733_v61 = vld [vmem:[%s2796_s1 + $0x2c] sm:$0xf]  ;;  %v1735_v13 = vld [vmem:[%s2796_s1 + $0x30] sm:$0xf]  ;;  %v1737_v25 = vld [vmem:[%s2796_s1 + $0x34] sm:$0xf] }
 0x42b   : > { %s2074_s7 = sshll.u32 %s3376_s29, 5  ;;  %v1739_v45 = vld [vmem:[%s2796_s1 + $0x38] sm:$0xf]  ;;  %v1741_v23 = vld [vmem:[%s2796_s1 + $0x3c] sm:$0xf] }
 0x42c   : > { %s2052_s9 = sshll.u32 %s3377_s28, 6 }
 0x42d   : > { %s1690_s10 = sadd.s32 %s3378_s4, %s2074_s7 }
 0x42e   : > { %s1692_s5 = sadd.s32 %s2052_s9, %s1690_s10 }
 0x42f   : > { %s2053_s6 = sshll.u32 %s1692_s5, 2 }
 0x430   : > { %s1694_s16 = scalar_lea.vmem %s3379_s12, %s2053_s6 }
 0x431   : > { %1712 = vst [vmem:[%s1694_s16] sm:$0xf] %v1711_v26 }
 0x432   : > { %1714 = vst [vmem:[%s1694_s16 + $0x8] sm:$0xf] %v1713_v56 }
 0x433   : > { %1716 = vst [vmem:[%s1694_s16 + $0x10] sm:$0xf] %v1715_v63 }
 0x434   : > { %1718 = vst [vmem:[%s1694_s16 + $0x18] sm:$0xf] %v1717_v59 }
 0x435   : > { %1720 = vst [vmem:[%s1694_s16 + $0x20] sm:$0xf] %v1719_v50 }
 0x436   : > { %1722 = vst [vmem:[%s1694_s16 + $0x28] sm:$0xf] %v1721_v30 }
 0x437   : > { %1724 = vst [vmem:[%s1694_s16 + $0x30] sm:$0xf] %v1723_v5 }
 0x438   : > { %1726 = vst [vmem:[%s1694_s16 + $0x38] sm:$0xf] %v1725_v37 }
 0x439   : > { %1728 = vst [vmem:[%s1694_s16 + $0x40] sm:$0xf] %v1727_v24 }
 0x43a   : > { %1730 = vst [vmem:[%s1694_s16 + $0x48] sm:$0xf] %v1729_v33 }
 0x43b   : > { %1732 = vst [vmem:[%s1694_s16 + $0x50] sm:$0xf] %v1731_v53 }
 0x43c   : > { %1734 = vst [vmem:[%s1694_s16 + $0x58] sm:$0xf] %v1733_v61 }
 0x43d   : > { %1736 = vst [vmem:[%s1694_s16 + $0x60] sm:$0xf] %v1735_v13 }
 0x43e   : > { %1738 = vst [vmem:[%s1694_s16 + $0x68] sm:$0xf] %v1737_v25 }
 0x43f   : > { %1740 = vst [vmem:[%s1694_s16 + $0x70] sm:$0xf] %v1739_v45 }
 0x440   : > { %1742 = vst [vmem:[%s1694_s16 + $0x78] sm:$0xf] %v1741_v23 }
 0x441 PF: > { %s13_s26 = sadd.s32 1, %s2523_s26   ;;  %s3381_s1 = sld [smem:[#allocation14_spill]] }
 0x442   : > { %p3288_p9 = scmp.ge.s32.totalorder %s13_s26, 18   ;;  %s3382_s30 = sld [smem:[#allocation15_spill]] }
 0x443   : > { %s3383_s27 = sld [smem:[#allocation16_spill]]  ;;  %s3386_s12 = smov %s2471_s13 }
 0x444   : > { %s3384_s29 = sld [smem:[#allocation17_spill]]  ;;  %s3387_s13 = smov %s2694_s8 }
 0x445   : > { %s3388_s14 = smov %s2479_s15  ;;  %s3389_s15 = smov %s2689_s11 }
 0x446   : > { %s3390_s16 = smov %s2487_s17  ;;  %s3391_s17 = smov %s2686_s3 }
 0x447   : > { %s3392_s18 = smov %s2507_s22  ;;  %s3393_s19 = smov %s2511_s23 }
 0x448   : > { %s3394_s20 = smov %s2515_s24  ;;  %s3395_s21 = smov %s2519_s25 }
 0x449   : > { %s3396_s22 = smov %s3381_s1  ;;  %s3397_s23 = smov %s3382_s30 }
 0x44a   : > { %s3398_s24 = smov %s3383_s27  ;;  %s3399_s25 = smov %s3384_s29 }
 0x44b   :  { %12 = sbr.rel (!%p3288_p9) target bundleno = 12 (0xc), region = 259 }

// kernel: causal_self_attention.3
= control target key start
LH: loop header
LB: loop body
LE: loop exit
PB: predicated region body
PF: predicated region fallthrough
CT: control target
= control target key end

     0   :  { %s2458_s0 = inlined_call_operand.hbm [shape: f32[512,256], index: 0, kind: input, shape index: {}]   ;;  %s2459_s1 = inlined_call_operand.hbm [shape: f32[256,768], index: 1, kind: input, shape index: {}]   ;;  %s2460_s2 = inlined_call_operand.vmem [shape: f32[1,768], index: 2, kind: input, shape index: {}]   ;;  %s2461_s3 = inlined_call_operand.vmem [shape: bf16[512,768], index: 3, kind: output, shape index: {}]  }
   0x1   :  { %2467 = sst [smem:[#allocation15_spill]] %s2458_s0 }
   0x2   :  { %2468 = sst [smem:[#allocation16_spill]] %s2461_s3 }
   0x3   :  { %8 = vsyncpa [#allocation4], 0 }
   0x4   :  { %10 = vsyncpa [#allocation4 + $0x1], 0 }
   0x5   :  { %11 = vsyncpa [#allocation6], 0 }
   0x6   :  { %13 = vsyncpa [#allocation6 + $0x1], 0  ;;  %s1922_s12 = smov 0   ;;  %s1924_s13 = smov 0  }
   0x7   :  { %s1926_s14 = smov 0   ;;  %s1928_s15 = smov 0  }
   0x8   :  { %s1930_s16 = smov 0   ;;  %s1932_s17 = smov 0  }
   0x9   :  { %s1934_s18 = smov 0   ;;  %s1936_s19 = smov 0  }
   0xa   :  { %s1938_s20 = smov 0   ;;  %s1940_s21 = smov 0  }
   0xb   :  { %s1942_s22 = smov 0   ;;  %s1944_s23 = smov 0  }
   0xc   :  { %s1946_s24 = smov 0  }
   0xd LB: > { %2469 = sst [smem:[#allocation10_spill]] %s1885_s21  ;;  %s1581_s25 = sadd.s32 4294967295, %s1897_s24   ;;  %s1897_s24 = sphi %s1946_s24, %s19_s24   ;;  %s1893_s23 = sphi %s1944_s23, %s2490_s23   ;;  %s1889_s22 = sphi %s1942_s22, %s2500_s22   ;;  %s1885_s21 = sphi %s1940_s21, %s2488_s21   ;;  %s1881_s20 = sphi %s1938_s20, %s2499_s20   ;;  %s1877_s19 = sphi %s1936_s19, %s2498_s19   ;;  %s1873_s18 = sphi %s1934_s18, %s2497_s18   ;;  %s1869_s17 = sphi %s1932_s17, %s2496_s17   ;;  %s1865_s16 = sphi %s1930_s16, %s2495_s16   ;;  %s1861_s15 = sphi %s1928_s15, %s2494_s15   ;;  %s1857_s14 = sphi %s1926_s14, %s2493_s14   ;;  %s1853_s13 = sphi %s1924_s13, %s2492_s13   ;;  %s1849_s12 = sphi %s1922_s12, %s2491_s12  }
   0xe   : > { %2470 = sst [smem:[#allocation11_spill]] %s1893_s23  ;;  %s38_s26 = sadd.s32 1, %s1893_s23 }
   0xf   : > { %s47_s27 = sadd.s32 1, %s1877_s19  ;;  %p54_p0 = scmp.ne.s32.totalorder %s1877_s19, %s1873_s18 }
  0x10   : > { %p55_p1 = scmp.eq.s32.totalorder %s1897_s24, 0  ;;  %p60_p2 = scmp.ne.s32.totalorder %s1873_s18, %s1869_s17 }
  0x11   : > { %p1992_p3 = scmp.eq.s32.totalorder %s1581_s25, 0  ;;  %p1996_p4 = scmp.eq.s32.totalorder %s1581_s25, 5 }
  0x12   : > { %p56_p5 = por %p55_p1, %p54_p0  ;;  %p1619_p7 = scmp.lt.s32.totalorder %s1897_s24, 6 }
  0x13   : > { %p2004_p6 = por %p1992_p3, %p60_p2  ;;  %s166_s4 = sand.u32 1, %s1877_s19  }
  0x14   : > { %s1605_s5 = sshll.u32 %s1893_s23, 9  ;;  %s1585_s6 = sshll.u32 %s166_s4, 9 }
  0x15   : > { %s2474_s0 = sld [smem:[#allocation15_spill]]  ;;  %s170_s11 = scalar_lea.vmem [#allocation3], %s1585_s6 }
  0x16   : > { %s181_s17 = sshll.u32 %s170_s11, 4  ;;  %p1613_p8 = pnand %p1619_p7, %p56_p5  ;;  %s182_s17 = int_to_ptr.vmem [resolvable:$true] %s181_s17 }
  0x17   : > { %p1592_p9 = scmp.ge.s32.totalorder %s1897_s24, 1  ;;  %p222_p10 = scmp.lt.s32.totalorder %s1897_s24, 7 }
  0x18   : > { %s167_s25 = scalar_lea.sflag [#allocation4], %s166_s4  ;;  %s2463_s7 = smov 16  }
  0x19   : > { %p2021_p11 = pnand %p1592_p9, %p222_p10  ;;  %s34_s8 = sadd.s32 1, %s1889_s22 }
  0x1a   : > { %p36_p12 = scmp.ge.s32.totalorder %s34_s8, 3  ;;  %p82_p13 = scmp.ne.s32.totalorder %s1865_s16, %s1861_s15 }
  0x1b   : > { %s178_s9 = scalar_lea.hbm %s2474_s0, %s1605_s5  ;;  %s2462_s5 = smov 256  }
  0x1c   : > { %s179_s10 = sshll.u32 %s178_s9, 4  ;;  %s75_s9 = sadd.s32 1, %s1865_s16  ;;  %s180_s10 = int_to_ptr.hbm [resolvable:$true] %s179_s10 }
  0x1d   : > { %1615 = dma.hbm_to_vmem [thread:$0]  (!%p1613_p8), %s180_s10, 8192, %s182_s17, %s167_s25, %s2462_s5, %s2462_s5, %s2463_s7  }
  0x1e   : > { %p88_p0 = scmp.ne.s32.totalorder %s1861_s15, %s1857_s14  ;;  %s2502_s8 = smov (%p36_p12, %s34_s8), 0 }
  0x1f   : > { %2476 = sst [smem:[#allocation12_spill]] %s2502_s8  ;;  %s2504_s26 = smov (!%p36_p12, %s38_s26), %s1893_s23 }
  0x20   : > { %s71_s4 = ssub.s32 %s1889_s22, %s2502_s8  ;;  %p2040_p2 = por %p82_p13, %p55_p1 }
  0x21   : > { %p40_p5 = scmp.ge.s32.totalorder %s2504_s26, 2  ;;  %p73_p8 = scmp.eq.s32.totalorder %s71_s4, 0 }
  0x22   : > { %p2046_p9 = por %p88_p0, %p1992_p3  ;;  %s129_s11 = sadd.s32 1, %s1853_s13 }
  0x23   : > { %s2506_s26 = smov (%p40_p5, %s2504_s26), 0  ;;  %p139_p10 = scmp.ne.s32.totalorder %s1853_s13, %s1849_s12 }
  0x24   : > { %2479 = sst [smem:[#allocation13_spill]] %s2506_s26  ;;  %s42_s25 = ssub.s32 %s1893_s23, %s2506_s26 }
  0x25   : > { %s2054_s17 = scalar_select %p73_p8, %s1865_s16, %s75_s9  }
  0x26   : > { %p45_p1 = scmp.eq.s32.totalorder %s42_s25, 0  ;;  %s126_s5 = sor.u32 %s71_s4, %s42_s25 }
  0x27   : > { %2480 = sst [smem:[#allocation14_spill]] %s2054_s17  ;;  %p127_p12 = scmp.eq.s32.totalorder %s126_s5, 0 }
  0x28   : > { %p2062_p13 = por %p1996_p4, %p139_p10  ;;  %s191_s8 = sand.u32 1, %s1865_s16  }
  0x29   : > { %s2069_s7 = scalar_select %p45_p1, %s1877_s19, %s47_s27  }
  0x2a   : > { %s2072_s0 = scalar_select %p127_p12, %s1853_s13, %s129_s11  }
  0x2b   : > { %s1606_s9 = sshll.u32 %s1889_s22, 4  ;;  %s1589_s17 = sshll.u32 %s191_s8, 9 }
  0x2c   : > { %s203_s3 = scalar_lea.hbm %s2459_s1, %s1606_s9  ;;  %s195_s4 = scalar_lea.vmem [#allocation5], %s1589_s17 }
  0x2d   : > { %s204_s21 = sshll.u32 %s203_s3, 4  ;;  %s206_s5 = sshll.u32 %s195_s4, 4  ;;  %s205_s21 = int_to_ptr.hbm [resolvable:$true] %s204_s21  ;;  %s207_s5 = int_to_ptr.vmem [resolvable:$true] %s206_s5 }
  0x2e   : > { %p1616_p3 = pnand %p1619_p7, %p2040_p2  ;;  %s192_s29 = scalar_lea.sflag [#allocation6], %s191_s8 }
  0x2f   : > { %s1901_s27 = smov 768   ;;  %s2482_s25 = smov 16  }
  0x30   : > { %s2483_s11 = smov 256   ;;  %226 = sbr.rel (%p2021_p11) target bundleno = 490 (0x1ea), region = 32 }
  0x31   : > { %1618 = dma.hbm_to_vmem [thread:$0]  (!%p1616_p3), %s205_s21, 8192, %s207_s5, %s192_s29, %s1901_s27, %s2483_s11, %s2482_s25  }
  0x32   : > { %s228_s23 = sand.u32 (!%p2021_p11), 1, %s1873_s18  }
  0x33   : > { %s1593_s26 = sshll.u32 (!%p2021_p11), %s228_s23, 9  ;;  %s229_s3 = scalar_lea.sflag (!%p2021_p11), [#allocation4], %s228_s23 }
  0x34   : > { %s2088_s17 = scalar_lea.vmem (!%p2021_p11), [#allocation3], %s1593_s26 }
  0x35   : > { %1840 = dma.done.wait (%p2004_p6), %s229_s3, 8192  }
  0x36   : > { %1842 = vsyncadd (%p2004_p6), %s229_s3, 4294959104  ;;  %s238_s8 = sand.u32 1, %s1861_s15  }
  0x37   : > { %s1594_s10 = sshll.u32 %s238_s8, 9  ;;  %s239_s21 = scalar_lea.sflag [#allocation6], %s238_s8 }
  0x38   : > { %s2095_s9 = scalar_lea.vmem [#allocation5], %s1594_s10 }
  0x39   : > { %1844 = dma.done.wait (%p2046_p9), %s239_s21, 8192  }
  0x3a   : > { %1846 = vsyncadd (%p2046_p9), %s239_s21, 4294959104  ;;  %v541_v0 = vld [vmem:[%s2095_s9 + $0xe0] sm:$0xff]  ;;  %v543_v1 = vld [vmem:[%s2095_s9 + $0xf0] sm:$0xff]  ;;  %s2198_s30 = sshll.u32 %s1881_s20, 1  ;;  %s271_s20 = sand.u32 1, %s1849_s12  }
  0x3b   : > { %v573_v2 = vld [vmem:[%s2095_s9 + $0x1e0] sm:$0xff]  ;;  %v591_v3 = vpack.c.bf16 %v543_v1, %v541_v0  ;;  %v575_v4 = vld [vmem:[%s2095_s9 + $0x1f0] sm:$0xff]  ;;  %v542_v5 = vld [vmem:[%s2095_s9 + $0xe8] sm:$0xff]  ;;  %p279_p4 = scmp.lt.s32.totalorder %s2198_s30, 5  ;;  %s1595_s29 = sshll.u32 %s271_s20, 8 }
  0x3c   : > { %v544_v6 = vld [vmem:[%s2095_s9 + $0xf8] sm:$0xff]  ;;  %v607_v7 = vpack.c.bf16 %v575_v4, %v573_v2  ;;  %v574_v9 = vld [vmem:[%s2095_s9 + $0x1e8] sm:$0xff]  ;;  %v537_v11 = vld [vmem:[%s2095_s9 + $0xc0] sm:$0xff]  ;;  %s2220_s27 = scalar_lea.vmem [#allocation7], %s1595_s29  ;;  %s2484_s12 = sld [smem:[#allocation10_spill]] (%p2062_p13) }
  0x3d   : > { %v592_v8 = vpack.c.bf16 %v544_v6, %v542_v5  ;;  %v576_v10 = vld [vmem:[%s2095_s9 + $0x1f8] sm:$0xff]  ;;  %609 = vmatpush.bf16.msra.mxu0 %v591_v3  ;;  %v539_v13 = vld [vmem:[%s2095_s9 + $0xd0] sm:$0xff]  ;;  %v569_v14 = vld [vmem:[%s2095_s9 + $0x1c0] sm:$0xff]  ;;  %s280_s6 = scalar_select %p279_p4, %s2198_s30, 5 }
  0x3e   : > { %v608_v12 = vpack.c.bf16 %v576_v10, %v574_v9  ;;  %v571_v15 = vld [vmem:[%s2095_s9 + $0x1d0] sm:$0xff]  ;;  %698 = vmatpush.bf16.msra.mxu1 %v607_v7  ;;  %v589_v16 = vpack.c.bf16 %v539_v13, %v537_v11  ;;  %v538_v18 = vld [vmem:[%s2095_s9 + $0xc8] sm:$0xff]  ;;  %v540_v19 = vld [vmem:[%s2095_s9 + $0xd8] sm:$0xff]  ;;  %s2485_s28 = sld [smem:[#allocation16_spill]] (%p2062_p13) }
  0x3f   : > { %787 = vmatpush.bf16.msra.mxu2 %v592_v8  ;;  %v605_v17 = vpack.c.bf16 %v571_v15, %v569_v14  ;;  %v570_v20 = vld [vmem:[%s2095_s9 + $0x1c8] sm:$0xff]  ;;  %v590_v21 = vpack.c.bf16 %v540_v19, %v538_v18  ;;  %v572_v22 = vld [vmem:[%s2095_s9 + $0x1d8] sm:$0xff]  ;;  %v533_v23 = vld [vmem:[%s2095_s9 + $0xa0] sm:$0xff]  ;;  %s281_s5 = scalar_lea.vmem %s2460_s2, %s280_s6 }
  0x40   : > { %876 = vmatpush.bf16.msra.mxu3 %v608_v12  ;;  %v535_v24 = vld [vmem:[%s2095_s9 + $0xb0] sm:$0xff]  ;;  %v606_v25 = vpack.c.bf16 %v572_v22, %v570_v20  ;;  %v565_v26 = vld [vmem:[%s2095_s9 + $0x1a0] sm:$0xff]  ;;  %v534_v28 = vld [vmem:[%s2095_s9 + $0xa8] sm:$0xff] }
  0x41   : > { %v567_v27 = vld [vmem:[%s2095_s9 + $0x1b0] sm:$0xff]  ;;  %610 = vmatpush.bf16.msra.mxu0 %v589_v16  ;;  %v587_v29 = vpack.c.bf16 %v535_v24, %v533_v23  ;;  %v536_v30 = vld [vmem:[%s2095_s9 + $0xb8] sm:$0xff]  ;;  %v566_v31 = vld [vmem:[%s2095_s9 + $0x1a8] sm:$0xff] }
  0x42   : > { %v568_v32 = vld [vmem:[%s2095_s9 + $0x1b8] sm:$0xff]  ;;  %699 = vmatpush.bf16.msra.mxu1 %v605_v17  ;;  %v603_v33 = vpack.c.bf16 %v567_v27, %v565_v26  ;;  %v588_v34 = vpack.c.bf16 %v536_v30, %v534_v28  ;;  %v529_v35 = vld [vmem:[%s2095_s9 + $0x80] sm:$0xff]  ;;  %v531_v36 = vld [vmem:[%s2095_s9 + $0x90] sm:$0xff]  ;;  %s1607_s25 = smul.u32 (%p2062_p13), 192, %s2484_s12 }
  0x43   : > { %788 = vmatpush.bf16.msra.mxu2 %v590_v21  ;;  %v561_v37 = vld [vmem:[%s2095_s9 + $0x180] sm:$0xff]  ;;  %v604_v38 = vpack.c.bf16 %v568_v32, %v566_v31  ;;  %v563_v39 = vld [vmem:[%s2095_s9 + $0x190] sm:$0xff]  ;;  %v530_v40 = vld [vmem:[%s2095_s9 + $0x88] sm:$0xff]  ;;  %v585_v44 = vpack.c.bf16 %v531_v36, %v529_v35 }
  0x44   : > { %877 = vmatpush.bf16.msra.mxu3 %v606_v25  ;;  %v532_v41 = vld [vmem:[%s2095_s9 + $0x98] sm:$0xff]  ;;  %v562_v42 = vld [vmem:[%s2095_s9 + $0x188] sm:$0xff]  ;;  %v601_v45 = vpack.c.bf16 %v563_v39, %v561_v37  ;;  %v525_v47 = vld [vmem:[%s2095_s9 + $0x60] sm:$0xff]  ;;  %s1304_s11 = sadd.s32 (%p2062_p13), %s1607_s25, %s2198_s30 }
  0x45   : > { %v564_v43 = vld [vmem:[%s2095_s9 + $0x198] sm:$0xff]  ;;  %611 = vmatpush.bf16.msra.mxu0 %v587_v29  ;;  %v586_v46 = vpack.c.bf16 %v532_v41, %v530_v40  ;;  %v527_v48 = vld [vmem:[%s2095_s9 + $0x70] sm:$0xff]  ;;  %v557_v49 = vld [vmem:[%s2095_s9 + $0x160] sm:$0xff]  ;;  %s1601_s23 = sshll.u32 (%p2062_p13), %s1304_s11, 2 }
  0x46   : > { %700 = vmatpush.bf16.msra.mxu1 %v603_v33  ;;  %v602_v50 = vpack.c.bf16 %v564_v43, %v562_v42  ;;  %v559_v51 = vld [vmem:[%s2095_s9 + $0x170] sm:$0xff]  ;;  %v526_v52 = vld [vmem:[%s2095_s9 + $0x68] sm:$0xff]  ;;  %v528_v53 = vld [vmem:[%s2095_s9 + $0x78] sm:$0xff]  ;;  %v583_v56 = vpack.c.bf16 %v527_v48, %v525_v47 }
  0x47   : > { %789 = vmatpush.bf16.msra.mxu2 %v588_v34  ;;  %v558_v54 = vld [vmem:[%s2095_s9 + $0x168] sm:$0xff]  ;;  %v560_v55 = vld [vmem:[%s2095_s9 + $0x178] sm:$0xff]  ;;  %v599_v57 = vpack.c.bf16 %v559_v51, %v557_v49  ;;  %v584_v58 = vpack.c.bf16 %v528_v53, %v526_v52  ;;  %v521_v59 = vld [vmem:[%s2095_s9 + $0x40] sm:$0xff] }
  0x48   : > { %878 = vmatpush.bf16.msra.mxu3 %v604_v38  ;;  %v523_v60 = vld [vmem:[%s2095_s9 + $0x50] sm:$0xff]  ;;  %v553_v61 = vld [vmem:[%s2095_s9 + $0x140] sm:$0xff]  ;;  %v600_v62 = vpack.c.bf16 %v560_v55, %v558_v54  ;;  %v522_v0 = vld [vmem:[%s2095_s9 + $0x48] sm:$0xff] }
  0x49   : > { %612 = vmatpush.bf16.msra.mxu0 %v585_v44  ;;  %v555_v63 = vld [vmem:[%s2095_s9 + $0x150] sm:$0xff]  ;;  %v524_v1 = vld [vmem:[%s2095_s9 + $0x58] sm:$0xff]  ;;  %v554_v2 = vld [vmem:[%s2095_s9 + $0x148] sm:$0xff]  ;;  %v581_v4 = vpack.c.bf16 %v523_v60, %v521_v59 }
  0x4a   : > { %701 = vmatpush.bf16.msra.mxu1 %v601_v45  ;;  %v556_v3 = vld [vmem:[%s2095_s9 + $0x158] sm:$0xff]  ;;  %v597_v5 = vpack.c.bf16 %v555_v63, %v553_v61  ;;  %v582_v6 = vpack.c.bf16 %v524_v1, %v522_v0  ;;  %v517_v7 = vld [vmem:[%s2095_s9 + $0x20] sm:$0xff]  ;;  %v519_v8 = vld [vmem:[%s2095_s9 + $0x30] sm:$0xff] }
  0x4b   : > { %790 = vmatpush.bf16.msra.mxu2 %v586_v46  ;;  %v549_v9 = vld [vmem:[%s2095_s9 + $0x120] sm:$0xff]  ;;  %v598_v10 = vpack.c.bf16 %v556_v3, %v554_v2  ;;  %v551_v11 = vld [vmem:[%s2095_s9 + $0x130] sm:$0xff]  ;;  %v518_v12 = vld [vmem:[%s2095_s9 + $0x28] sm:$0xff]  ;;  %v579_v16 = vpack.c.bf16 %v519_v8, %v517_v7 }
  0x4c   : > { %879 = vmatpush.bf16.msra.mxu3 %v602_v50  ;;  %v520_v13 = vld [vmem:[%s2095_s9 + $0x38] sm:$0xff]  ;;  %v550_v14 = vld [vmem:[%s2095_s9 + $0x128] sm:$0xff]  ;;  %v595_v17 = vpack.c.bf16 %v551_v11, %v549_v9  ;;  %v513_v19 = vld [vmem:[%s2095_s9] sm:$0xff] }
  0x4d   : > { %613 = vmatpush.bf16.msra.mxu0 %v583_v56  ;;  %v552_v15 = vld [vmem:[%s2095_s9 + $0x138] sm:$0xff]  ;;  %v580_v18 = vpack.c.bf16 %v520_v13, %v518_v12  ;;  %v515_v20 = vld [vmem:[%s2095_s9 + $0x10] sm:$0xff]  ;;  %v545_v21 = vld [vmem:[%s2095_s9 + $0x100] sm:$0xff] }
  0x4e   : > { %702 = vmatpush.bf16.msra.mxu1 %v599_v57  ;;  %v596_v22 = vpack.c.bf16 %v552_v15, %v550_v14  ;;  %v547_v23 = vld [vmem:[%s2095_s9 + $0x110] sm:$0xff]  ;;  %v514_v24 = vld [vmem:[%s2095_s9 + $0x8] sm:$0xff]  ;;  %v516_v25 = vld [vmem:[%s2095_s9 + $0x18] sm:$0xff]  ;;  %v577_v28 = vpack.c.bf16 %v515_v20, %v513_v19 }
  0x4f   : > { %791 = vmatpush.bf16.msra.mxu2 %v584_v58  ;;  %v546_v26 = vld [vmem:[%s2095_s9 + $0x108] sm:$0xff]  ;;  %v548_v27 = vld [vmem:[%s2095_s9 + $0x118] sm:$0xff]  ;;  %v417_v29 = vld [vmem:[%s2088_s17] sm:$0xff]  ;;  %v593_v31 = vpack.c.bf16 %v547_v23, %v545_v21  ;;  %v578_v32 = vpack.c.bf16 %v516_v25, %v514_v24 }
  0x50   : > { %880 = vmatpush.bf16.msra.mxu3 %v600_v62  ;;  %v419_v30 = vld [vmem:[%s2088_s17 + $0x10] sm:$0xff]  ;;  %v418_v33 = vld [vmem:[%s2088_s17 + $0x8] sm:$0xff]  ;;  %v420_v34 = vld [vmem:[%s2088_s17 + $0x18] sm:$0xff]  ;;  %v594_v35 = vpack.c.bf16 %v548_v27, %v546_v26 }
  0x51   : > { %614 = vmatpush.bf16.msra.mxu0 %v581_v4  ;;  %v481_v36 = vpack.c.bf16 %v419_v30, %v417_v29  ;;  %v482_v37 = vpack.c.bf16 %v420_v34, %v418_v33  ;;  %v421_v38 = vld [vmem:[%s2088_s17 + $0x20] sm:$0xff]  ;;  %v423_v39 = vld [vmem:[%s2088_s17 + $0x30] sm:$0xff]  ;;  %v422_v40 = vld [vmem:[%s2088_s17 + $0x28] sm:$0xff] }
  0x52   : > { %703 = vmatpush.bf16.msra.mxu1 %v597_v5  ;;  %v424_v41 = vld [vmem:[%s2088_s17 + $0x38] sm:$0xff]  ;;  %v483_v42 = vpack.c.bf16 %v423_v39, %v421_v38  ;;  %v425_v44 = vld [vmem:[%s2088_s17 + $0x40] sm:$0xff]  ;;  %v427_v45 = vld [vmem:[%s2088_s17 + $0x50] sm:$0xff] }
  0x53   : > { %792 = vmatpush.bf16.msra.mxu2 %v582_v6  ;;  %v484_v43 = vpack.c.bf16 %v424_v41, %v422_v40  ;;  %v426_v46 = vld [vmem:[%s2088_s17 + $0x48] sm:$0xff]  ;;  %v428_v47 = vld [vmem:[%s2088_s17 + $0x58] sm:$0xff]  ;;  %v485_v48 = vpack.c.bf16 %v427_v45, %v425_v44  ;;  %v429_v50 = vld [vmem:[%s2088_s17 + $0x60] sm:$0xff] }
  0x54   : > { %881 = vmatpush.bf16.msra.mxu3 %v598_v10  ;;  %v486_v49 = vpack.c.bf16 %v428_v47, %v426_v46  ;;  %v431_v51 = vld [vmem:[%s2088_s17 + $0x70] sm:$0xff]  ;;  %v430_v52 = vld [vmem:[%s2088_s17 + $0x68] sm:$0xff]  ;;  %v432_v53 = vld [vmem:[%s2088_s17 + $0x78] sm:$0xff] }
  0x55   : > { %615 = vmatpush.bf16.msra.mxu0 %v579_v16  ;;  %v487_v54 = vpack.c.bf16 %v431_v51, %v429_v50  ;;  %v488_v55 = vpack.c.bf16 %v432_v53, %v430_v52  ;;  %v433_v56 = vld [vmem:[%s2088_s17 + $0x80] sm:$0xff]  ;;  %v435_v57 = vld [vmem:[%s2088_s17 + $0x90] sm:$0xff]  ;;  %v434_v58 = vld [vmem:[%s2088_s17 + $0x88] sm:$0xff] }
  0x56   : > { %704 = vmatpush.bf16.msra.mxu1 %v595_v17  ;;  %v436_v59 = vld [vmem:[%s2088_s17 + $0x98] sm:$0xff]  ;;  %v489_v60 = vpack.c.bf16 %v435_v57, %v433_v56  ;;  %v437_v62 = vld [vmem:[%s2088_s17 + $0xa0] sm:$0xff]  ;;  %v439_v63 = vld [vmem:[%s2088_s17 + $0xb0] sm:$0xff] }
  0x57   : > { %793 = vmatpush.bf16.msra.mxu2 %v580_v18  ;;  %v490_v61 = vpack.c.bf16 %v436_v59, %v434_v58  ;;  %v438_v0 = vld [vmem:[%s2088_s17 + $0xa8] sm:$0xff]  ;;  %v440_v1 = vld [vmem:[%s2088_s17 + $0xb8] sm:$0xff]  ;;  %v491_v2 = vpack.c.bf16 %v439_v63, %v437_v62  ;;  %v441_v4 = vld [vmem:[%s2088_s17 + $0xc0] sm:$0xff] }
  0x58   : > { %882 = vmatpush.bf16.msra.mxu3 %v596_v22  ;;  %v492_v3 = vpack.c.bf16 %v440_v1, %v438_v0  ;;  %v443_v5 = vld [vmem:[%s2088_s17 + $0xd0] sm:$0xff]  ;;  %v442_v6 = vld [vmem:[%s2088_s17 + $0xc8] sm:$0xff]  ;;  %v444_v7 = vld [vmem:[%s2088_s17 + $0xd8] sm:$0xff] }
  0x59   : > { %616 = vmatpush.bf16.msra.mxu0 %v577_v28  ;;  %v493_v8 = vpack.c.bf16 %v443_v5, %v441_v4  ;;  %v494_v9 = vpack.c.bf16 %v444_v7, %v442_v6  ;;  %v445_v10 = vld [vmem:[%s2088_s17 + $0xe0] sm:$0xff]  ;;  %v447_v11 = vld [vmem:[%s2088_s17 + $0xf0] sm:$0xff]  ;;  %v446_v12 = vld [vmem:[%s2088_s17 + $0xe8] sm:$0xff] }
  0x5a   : > { %705 = vmatpush.bf16.msra.mxu1 %v593_v31  ;;  %v448_v13 = vld [vmem:[%s2088_s17 + $0xf8] sm:$0xff]  ;;  %v495_v14 = vpack.c.bf16 %v447_v11, %v445_v10  ;;  %v449_v16 = vld [vmem:[%s2088_s17 + $0x100] sm:$0xff]  ;;  %v451_v17 = vld [vmem:[%s2088_s17 + $0x110] sm:$0xff] }
  0x5b   : > { %794 = vmatpush.bf16.msra.mxu2 %v578_v32  ;;  %v496_v15 = vpack.c.bf16 %v448_v13, %v446_v12  ;;  %v450_v18 = vld [vmem:[%s2088_s17 + $0x108] sm:$0xff]  ;;  %v452_v19 = vld [vmem:[%s2088_s17 + $0x118] sm:$0xff]  ;;  %v497_v20 = vpack.c.bf16 %v451_v17, %v449_v16  ;;  %v1160_v24 = vld [vmem:[%s281_s5] sm:$0x3] }
  0x5c   : > { %883 = vmatpush.bf16.msra.mxu3 %v594_v35  ;;  %617 = vmatmul.bf16.vlgmr.msra.gmra.mxu0 %v481_v36  ;;  %v498_v22 = vpack.c.bf16 %v452_v19, %v450_v18  ;;  %v2209_v26 = vperm.slane %v1160_v24, 0  ;;  %v2212_v28 = vperm.slane %v1160_v24, 1  ;;  %v453_v35 = vld [vmem:[%s2088_s17 + $0x120] sm:$0xff]  ;;  %v454_v38 = vld [vmem:[%s2088_s17 + $0x128] sm:$0xff]  ;;  %v456_v39 = vld [vmem:[%s2088_s17 + $0x138] sm:$0xff] }
  0x5d   : > { %706 = vmatmul.bf16.vlgmr.msra.gmra.mxu1 %v482_v37  ;;  %v500_v45 = vpack.c.bf16 %v456_v39, %v454_v38  ;;  %v457_v59 = vld [vmem:[%s2088_s17 + $0x140] sm:$0xff]  ;;  %v458_v62 = vld [vmem:[%s2088_s17 + $0x148] sm:$0xff]  ;;  %v460_v63 = vld [vmem:[%s2088_s17 + $0x158] sm:$0xff] }
  0x5e   : > { %795 = vmatmul.bf16.vlgmr.msra.gmra.mxu2 %v481_v36  ;;  %v455_v36 = vld [vmem:[%s2088_s17 + $0x130] sm:$0xff]  ;;  %v502_v5 = vpack.c.bf16 %v460_v63, %v458_v62  ;;  %v461_v19 = vld [vmem:[%s2088_s17 + $0x160] sm:$0xff] }
  0x5f   : > { %884 = vmatmul.bf16.vlgmr.msra.gmra.mxu3 %v482_v37 }
  0x6c   : > { %622 = vmatmul.bf16.gmra.mxu0 %v483_v42 }
  0x6d   : > { %711 = vmatmul.bf16.gmra.mxu1 %v484_v43 }
  0x6e   : > { %800 = vmatmul.bf16.gmra.mxu2 %v483_v42  ;;  %v499_v42 = vpack.c.bf16 %v455_v36, %v453_v35 }
  0x6f   : > { %889 = vmatmul.bf16.gmra.mxu3 %v484_v43 }
  0x7c   : > { %627 = vmatmul.bf16.gmra.mxu0 %v485_v48 }
  0x7d   : > { %716 = vmatmul.bf16.gmra.mxu1 %v486_v49 }
  0x7e   : > { %805 = vmatmul.bf16.gmra.mxu2 %v485_v48 }
  0x7f   : > { %894 = vmatmul.bf16.gmra.mxu3 %v486_v49 }
  0x8c   : > { %632 = vmatmul.bf16.gmra.mxu0 %v487_v54 }
  0x8d   : > { %721 = vmatmul.bf16.gmra.mxu1 %v488_v55 }
  0x8e   : > { %810 = vmatmul.bf16.gmra.mxu2 %v487_v54 }
  0x8f   : > { %899 = vmatmul.bf16.gmra.mxu3 %v488_v55 }
  0x9c   : > { %637 = vmatmul.bf16.gmra.mxu0 %v489_v60 }
  0x9d   : > { %726 = vmatmul.bf16.gmra.mxu1 %v490_v61 }
  0x9e   : > { %815 = vmatmul.bf16.gmra.mxu2 %v489_v60  ;;  %v459_v60 = vld [vmem:[%s2088_s17 + $0x150] sm:$0xff] }
  0x9f   : > { %904 = vmatmul.bf16.gmra.mxu3 %v490_v61 }
  0xac   : > { %642 = vmatmul.bf16.gmra.mxu0 %v491_v2 }
  0xad   : > { %731 = vmatmul.bf16.gmra.mxu1 %v492_v3 }
  0xae   : > { %820 = vmatmul.bf16.gmra.mxu2 %v491_v2  ;;  %v501_v2 = vpack.c.bf16 %v459_v60, %v457_v59 }
  0xaf   : > { %909 = vmatmul.bf16.gmra.mxu3 %v492_v3 }
  0xbc   : > { %647 = vmatmul.bf16.gmra.mxu0 %v493_v8 }
  0xbd   : > { %736 = vmatmul.bf16.gmra.mxu1 %v494_v9 }
  0xbe   : > { %825 = vmatmul.bf16.gmra.mxu2 %v493_v8 }
  0xbf   : > { %914 = vmatmul.bf16.gmra.mxu3 %v494_v9 }
  0xcc   : > { %652 = vmatmul.bf16.gmra.mxu0 %v495_v14 }
  0xcd   : > { %741 = vmatmul.bf16.gmra.mxu1 %v496_v15 }
  0xce   : > { %830 = vmatmul.bf16.gmra.mxu2 %v495_v14 }
  0xcf   : > { %919 = vmatmul.bf16.gmra.mxu3 %v496_v15 }
  0xd9   : > { %v618_v21 = vpop.f32.mrf.mxu0 }
  0xda   : > { %v707_v23 = vpop.f32.mrf.mxu1 }
  0xdb   : > { %v708_v25 = vadd.f32 %v707_v23, %v618_v21  ;;  %v464_v23 = vld [vmem:[%s2088_s17 + $0x178] sm:$0xff] }
  0xdc   : > { %657 = vmatmul.bf16.gmra.mxu0 %v497_v20 }
  0xdd   : > { %746 = vmatmul.bf16.gmra.mxu1 %v498_v22  ;;  %v1166_v31 = vadd.f32 %v2209_v26, %v708_v25 }
  0xde   : > { %835 = vmatmul.bf16.gmra.mxu2 %v497_v20  ;;  %v463_v20 = vld [vmem:[%s2088_s17 + $0x170] sm:$0xff] }
  0xdf   : > { %924 = vmatmul.bf16.gmra.mxu3 %v498_v22  ;;  %v462_v22 = vld [vmem:[%s2088_s17 + $0x168] sm:$0xff] }
  0xe1   : > { %v796_v27 = vpop.f32.mrf.mxu2  ;;  %v620_v30 = vpop.f32.mrf.mxu0 }
  0xe2   : > { %v885_v29 = vpop.f32.mrf.mxu3  ;;  %v709_v33 = vpop.f32.mrf.mxu1 }
  0xe3   : > { %v886_v32 = vadd.f32 %v885_v29, %v796_v27  ;;  %v710_v40 = vadd.f32 %v709_v33, %v620_v30  ;;  %v503_v27 = vpack.c.bf16 %v463_v20, %v461_v19 }
  0xe5   : > { %v1167_v34 = vadd.f32 %v2212_v28, %v886_v32  ;;  %v1168_v48 = vadd.f32 %v2209_v26, %v710_v40 }
  0xe7   : > { %v1230_v37 = vpack.c.bf16 %v1167_v34, %v1166_v31  ;;  %v504_v31 = vpack.c.bf16 %v464_v23, %v462_v22 }
  0xe9   : > { %1262 = vst [vmem:[%s2220_s27] sm:$0xff] %v1230_v37  ;;  %v798_v41 = vpop.f32.mrf.mxu2  ;;  %v623_v44 = vpop.f32.mrf.mxu0 }
  0xea   : > { %v887_v43 = vpop.f32.mrf.mxu3  ;;  %v712_v47 = vpop.f32.mrf.mxu1 }
  0xeb   : > { %v888_v46 = vadd.f32 %v887_v43, %v798_v41  ;;  %v713_v51 = vadd.f32 %v712_v47, %v623_v44 }
  0xec   : > { %662 = vmatmul.bf16.gmra.mxu0 %v499_v42 }
  0xed   : > { %v1169_v49 = vadd.f32 %v2212_v28, %v888_v46  ;;  %751 = vmatmul.bf16.gmra.mxu1 %v500_v45  ;;  %v1170_v55 = vadd.f32 %v2209_v26, %v713_v51  ;;  %v467_v46 = vld [vmem:[%s2088_s17 + $0x190] sm:$0xff] }
  0xee   : > { %840 = vmatmul.bf16.gmra.mxu2 %v499_v42 }
  0xef   : > { %v1231_v50 = vpack.c.bf16 %v1169_v49, %v1168_v48  ;;  %929 = vmatmul.bf16.gmra.mxu3 %v500_v45  ;;  %v465_v45 = vld [vmem:[%s2088_s17 + $0x180] sm:$0xff]  ;;  %v466_v48 = vld [vmem:[%s2088_s17 + $0x188] sm:$0xff]  ;;  %v468_v49 = vld [vmem:[%s2088_s17 + $0x198] sm:$0xff] }
  0xf1   : > { %1263 = vst [vmem:[%s2220_s27 + $0x8] sm:$0xff] %v1231_v50  ;;  %v801_v52 = vpop.f32.mrf.mxu2  ;;  %v625_v54 = vpop.f32.mrf.mxu0 }
  0xf2   : > { %v890_v53 = vpop.f32.mrf.mxu3  ;;  %v714_v57 = vpop.f32.mrf.mxu1 }
  0xf3   : > { %v891_v56 = vadd.f32 %v890_v53, %v801_v52  ;;  %v715_v0 = vadd.f32 %v714_v57, %v625_v54  ;;  %v505_v52 = vpack.c.bf16 %v467_v46, %v465_v45 }
  0xf5   : > { %v1171_v58 = vadd.f32 %v2212_v28, %v891_v56  ;;  %v1172_v8 = vadd.f32 %v2209_v26, %v715_v0 }
  0xf7   : > { %v1232_v61 = vpack.c.bf16 %v1171_v58, %v1170_v55  ;;  %v506_v55 = vpack.c.bf16 %v468_v49, %v466_v48 }
  0xf9   : > { %1264 = vst [vmem:[%s2220_s27 + $0x10] sm:$0xff] %v1232_v61  ;;  %v803_v1 = vpop.f32.mrf.mxu2  ;;  %v628_v4 = vpop.f32.mrf.mxu0 }
  0xfa   : > { %v892_v3 = vpop.f32.mrf.mxu3  ;;  %v717_v7 = vpop.f32.mrf.mxu1 }
  0xfb   : > { %v893_v6 = vadd.f32 %v892_v3, %v803_v1  ;;  %v718_v11 = vadd.f32 %v717_v7, %v628_v4 }
  0xfc   : > { %667 = vmatmul.bf16.gmra.mxu0 %v501_v2 }
  0xfd   : > { %v1173_v9 = vadd.f32 %v2212_v28, %v893_v6  ;;  %756 = vmatmul.bf16.gmra.mxu1 %v502_v5  ;;  %v1174_v15 = vadd.f32 %v2209_v26, %v718_v11  ;;  %v471_v6 = vld [vmem:[%s2088_s17 + $0x1b0] sm:$0xff] }
  0xfe   : > { %845 = vmatmul.bf16.gmra.mxu2 %v501_v2 }
  0xff   : > { %v1233_v10 = vpack.c.bf16 %v1173_v9, %v1172_v8  ;;  %934 = vmatmul.bf16.gmra.mxu3 %v502_v5  ;;  %v469_v5 = vld [vmem:[%s2088_s17 + $0x1a0] sm:$0xff]  ;;  %v470_v8 = vld [vmem:[%s2088_s17 + $0x1a8] sm:$0xff]  ;;  %v472_v9 = vld [vmem:[%s2088_s17 + $0x1b8] sm:$0xff] }
 0x101   : > { %1265 = vst [vmem:[%s2220_s27 + $0x18] sm:$0xff] %v1233_v10  ;;  %v806_v12 = vpop.f32.mrf.mxu2  ;;  %v630_v14 = vpop.f32.mrf.mxu0 }
 0x102   : > { %v895_v13 = vpop.f32.mrf.mxu3  ;;  %v719_v17 = vpop.f32.mrf.mxu1 }
 0x103   : > { %v896_v16 = vadd.f32 %v895_v13, %v806_v12  ;;  %v720_v24 = vadd.f32 %v719_v17, %v630_v14  ;;  %v507_v12 = vpack.c.bf16 %v471_v6, %v469_v5 }
 0x105   : > { %v1175_v18 = vadd.f32 %v2212_v28, %v896_v16  ;;  %v1176_v34 = vadd.f32 %v2209_v26, %v720_v24 }
 0x107   : > { %v1234_v21 = vpack.c.bf16 %v1175_v18, %v1174_v15  ;;  %v508_v15 = vpack.c.bf16 %v472_v9, %v470_v8 }
 0x109   : > { %1266 = vst [vmem:[%s2220_s27 + $0x20] sm:$0xff] %v1234_v21  ;;  %v808_v25 = vpop.f32.mrf.mxu2  ;;  %v633_v30 = vpop.f32.mrf.mxu0 }
 0x10a   : > { %v897_v29 = vpop.f32.mrf.mxu3  ;;  %v722_v33 = vpop.f32.mrf.mxu1 }
 0x10b   : > { %v898_v32 = vadd.f32 %v897_v29, %v808_v25  ;;  %v723_v37 = vadd.f32 %v722_v33, %v633_v30 }
 0x10c   : > { %672 = vmatmul.bf16.gmra.mxu0 %v503_v27 }
 0x10d   : > { %v1177_v35 = vadd.f32 %v2212_v28, %v898_v32  ;;  %761 = vmatmul.bf16.gmra.mxu1 %v504_v31  ;;  %v1178_v41 = vadd.f32 %v2209_v26, %v723_v37  ;;  %v475_v32 = vld [vmem:[%s2088_s17 + $0x1d0] sm:$0xff] }
 0x10e   : > { %850 = vmatmul.bf16.gmra.mxu2 %v503_v27 }
 0x10f   : > { %v1235_v36 = vpack.c.bf16 %v1177_v35, %v1176_v34  ;;  %939 = vmatmul.bf16.gmra.mxu3 %v504_v31  ;;  %v473_v31 = vld [vmem:[%s2088_s17 + $0x1c0] sm:$0xff]  ;;  %v474_v34 = vld [vmem:[%s2088_s17 + $0x1c8] sm:$0xff]  ;;  %v476_v35 = vld [vmem:[%s2088_s17 + $0x1d8] sm:$0xff] }
 0x111   : > { %1267 = vst [vmem:[%s2220_s27 + $0x28] sm:$0xff] %v1235_v36  ;;  %v811_v38 = vpop.f32.mrf.mxu2  ;;  %v635_v40 = vpop.f32.mrf.mxu0 }
 0x112   : > { %v900_v39 = vpop.f32.mrf.mxu3  ;;  %v724_v43 = vpop.f32.mrf.mxu1 }
 0x113   : > { %v901_v42 = vadd.f32 %v900_v39, %v811_v38  ;;  %v725_v50 = vadd.f32 %v724_v43, %v635_v40  ;;  %v509_v38 = vpack.c.bf16 %v475_v32, %v473_v31 }
 0x115   : > { %v1179_v44 = vadd.f32 %v2212_v28, %v901_v42  ;;  %v1180_v58 = vadd.f32 %v2209_v26, %v725_v50 }
 0x117   : > { %v1236_v47 = vpack.c.bf16 %v1179_v44, %v1178_v41  ;;  %v510_v41 = vpack.c.bf16 %v476_v35, %v474_v34 }
 0x119   : > { %1268 = vst [vmem:[%s2220_s27 + $0x30] sm:$0xff] %v1236_v47  ;;  %v813_v51 = vpop.f32.mrf.mxu2  ;;  %v638_v54 = vpop.f32.mrf.mxu0 }
 0x11a   : > { %v902_v53 = vpop.f32.mrf.mxu3  ;;  %v727_v57 = vpop.f32.mrf.mxu1 }
 0x11b   : > { %v903_v56 = vadd.f32 %v902_v53, %v813_v51  ;;  %v728_v61 = vadd.f32 %v727_v57, %v638_v54 }
 0x11c   : > { %677 = vmatmul.bf16.gmra.mxu0 %v505_v52 }
 0x11d   : > { %v1181_v59 = vadd.f32 %v2212_v28, %v903_v56  ;;  %766 = vmatmul.bf16.gmra.mxu1 %v506_v55  ;;  %v1182_v1 = vadd.f32 %v2209_v26, %v728_v61  ;;  %v479_v56 = vld [vmem:[%s2088_s17 + $0x1f0] sm:$0xff] }
 0x11e   : > { %855 = vmatmul.bf16.gmra.mxu2 %v505_v52 }
 0x11f   : > { %v1237_v60 = vpack.c.bf16 %v1181_v59, %v1180_v58  ;;  %944 = vmatmul.bf16.gmra.mxu3 %v506_v55  ;;  %v477_v55 = vld [vmem:[%s2088_s17 + $0x1e0] sm:$0xff]  ;;  %v478_v58 = vld [vmem:[%s2088_s17 + $0x1e8] sm:$0xff]  ;;  %v480_v59 = vld [vmem:[%s2088_s17 + $0x1f8] sm:$0xff]  ;;  %s2349_s17 = scalar_lea.vmem (%p2062_p13), %s2485_s28, %s1601_s23 }
 0x121   : > { %1269 = vst [vmem:[%s2220_s27 + $0x38] sm:$0xff] %v1237_v60  ;;  %v816_v62 = vpop.f32.mrf.mxu2  ;;  %v640_v0 = vpop.f32.mrf.mxu0 }
 0x122   : > { %v905_v63 = vpop.f32.mrf.mxu3  ;;  %v729_v3 = vpop.f32.mrf.mxu1 }
 0x123   : > { %v906_v2 = vadd.f32 %v905_v63, %v816_v62  ;;  %v730_v10 = vadd.f32 %v729_v3, %v640_v0  ;;  %v511_v62 = vpack.c.bf16 %v479_v56, %v477_v55 }
 0x125   : > { %v1183_v4 = vadd.f32 %v2212_v28, %v906_v2  ;;  %v1184_v18 = vadd.f32 %v2209_v26, %v730_v10 }
 0x127   : > { %v1238_v7 = vpack.c.bf16 %v1183_v4, %v1182_v1  ;;  %v512_v1 = vpack.c.bf16 %v480_v59, %v478_v58 }
 0x129   : > { %1270 = vst [vmem:[%s2220_s27 + $0x40] sm:$0xff] %v1238_v7  ;;  %v818_v11 = vpop.f32.mrf.mxu2  ;;  %v643_v14 = vpop.f32.mrf.mxu0 }
 0x12a   : > { %v907_v13 = vpop.f32.mrf.mxu3  ;;  %v732_v17 = vpop.f32.mrf.mxu1 }
 0x12b   : > { %v908_v16 = vadd.f32 %v907_v13, %v818_v11  ;;  %v733_v21 = vadd.f32 %v732_v17, %v643_v14 }
 0x12c   : > { %682 = vmatmul.bf16.gmra.mxu0 %v507_v12 }
 0x12d   : > { %v1185_v19 = vadd.f32 %v2212_v28, %v908_v16  ;;  %771 = vmatmul.bf16.gmra.mxu1 %v508_v15  ;;  %v1186_v25 = vadd.f32 %v2209_v26, %v733_v21 }
 0x12e   : > { %860 = vmatmul.bf16.gmra.mxu2 %v507_v12 }
 0x12f   : > { %v1239_v20 = vpack.c.bf16 %v1185_v19, %v1184_v18  ;;  %949 = vmatmul.bf16.gmra.mxu3 %v508_v15 }
 0x131   : > { %1271 = vst [vmem:[%s2220_s27 + $0x48] sm:$0xff] %v1239_v20  ;;  %v821_v22 = vpop.f32.mrf.mxu2  ;;  %v645_v24 = vpop.f32.mrf.mxu0 }
 0x132   : > { %v910_v23 = vpop.f32.mrf.mxu3  ;;  %v734_v29 = vpop.f32.mrf.mxu1 }
 0x133   : > { %v911_v27 = vadd.f32 %v910_v23, %v821_v22  ;;  %v735_v36 = vadd.f32 %v734_v29, %v645_v24 }
 0x135   : > { %v1187_v30 = vadd.f32 %v2212_v28, %v911_v27  ;;  %v1188_v44 = vadd.f32 %v2209_v26, %v735_v36 }
 0x137   : > { %v1240_v33 = vpack.c.bf16 %v1187_v30, %v1186_v25 }
 0x139   : > { %1272 = vst [vmem:[%s2220_s27 + $0x50] sm:$0xff] %v1240_v33  ;;  %v823_v37 = vpop.f32.mrf.mxu2  ;;  %v648_v40 = vpop.f32.mrf.mxu0 }
 0x13a   : > { %v912_v39 = vpop.f32.mrf.mxu3  ;;  %v737_v43 = vpop.f32.mrf.mxu1 }
 0x13b   : > { %v913_v42 = vadd.f32 %v912_v39, %v823_v37  ;;  %v738_v47 = vadd.f32 %v737_v43, %v648_v40 }
 0x13c   : > { %687 = vmatmul.bf16.gmra.mxu0 %v509_v38 }
 0x13d   : > { %v1189_v45 = vadd.f32 %v2212_v28, %v913_v42  ;;  %776 = vmatmul.bf16.gmra.mxu1 %v510_v41  ;;  %v1190_v51 = vadd.f32 %v2209_v26, %v738_v47 }
 0x13e   : > { %865 = vmatmul.bf16.gmra.mxu2 %v509_v38 }
 0x13f   : > { %v1241_v46 = vpack.c.bf16 %v1189_v45, %v1188_v44  ;;  %954 = vmatmul.bf16.gmra.mxu3 %v510_v41 }
 0x141   : > { %1273 = vst [vmem:[%s2220_s27 + $0x58] sm:$0xff] %v1241_v46  ;;  %v826_v48 = vpop.f32.mrf.mxu2  ;;  %v650_v50 = vpop.f32.mrf.mxu0 }
 0x142   : > { %v915_v49 = vpop.f32.mrf.mxu3  ;;  %v739_v53 = vpop.f32.mrf.mxu1 }
 0x143   : > { %v916_v52 = vadd.f32 %v915_v49, %v826_v48  ;;  %v740_v60 = vadd.f32 %v739_v53, %v650_v50 }
 0x145   : > { %v1191_v54 = vadd.f32 %v2212_v28, %v916_v52  ;;  %v1192_v4 = vadd.f32 %v2209_v26, %v740_v60 }
 0x147   : > { %v1242_v57 = vpack.c.bf16 %v1191_v54, %v1190_v51 }
 0x149   : > { %1274 = vst [vmem:[%s2220_s27 + $0x60] sm:$0xff] %v1242_v57  ;;  %v828_v61 = vpop.f32.mrf.mxu2  ;;  %v653_v0 = vpop.f32.mrf.mxu0 }
 0x14a   : > { %v917_v63 = vpop.f32.mrf.mxu3  ;;  %v742_v3 = vpop.f32.mrf.mxu1 }
 0x14b   : > { %v918_v2 = vadd.f32 %v917_v63, %v828_v61  ;;  %v743_v7 = vadd.f32 %v742_v3, %v653_v0 }
 0x14c   : > { %692 = vmatmul.bf16.gmra.mxu0 %v511_v62 }
 0x14d   : > { %v1193_v5 = vadd.f32 %v2212_v28, %v918_v2  ;;  %781 = vmatmul.bf16.gmra.mxu1 %v512_v1  ;;  %v1194_v11 = vadd.f32 %v2209_v26, %v743_v7 }
 0x14e   : > { %870 = vmatmul.bf16.gmra.mxu2 %v511_v62 }
 0x14f   : > { %v1243_v6 = vpack.c.bf16 %v1193_v5, %v1192_v4  ;;  %959 = vmatmul.bf16.gmra.mxu3 %v512_v1 }
 0x151   : > { %1275 = vst [vmem:[%s2220_s27 + $0x68] sm:$0xff] %v1243_v6  ;;  %v831_v8 = vpop.f32.mrf.mxu2  ;;  %v655_v10 = vpop.f32.mrf.mxu0 }
 0x152   : > { %v920_v9 = vpop.f32.mrf.mxu3  ;;  %v744_v13 = vpop.f32.mrf.mxu1 }
 0x153   : > { %v921_v12 = vadd.f32 %v920_v9, %v831_v8  ;;  %v745_v16 = vadd.f32 %v744_v13, %v655_v10 }
 0x155   : > { %v1195_v14 = vadd.f32 %v2212_v28, %v921_v12  ;;  %v1196_v22 = vadd.f32 %v2209_v26, %v745_v16 }
 0x157   : > { %v1244_v15 = vpack.c.bf16 %v1195_v14, %v1194_v11 }
 0x159   : > { %1276 = vst [vmem:[%s2220_s27 + $0x70] sm:$0xff] %v1244_v15  ;;  %v833_v17 = vpop.f32.mrf.mxu2  ;;  %v658_v19 = vpop.f32.mrf.mxu0 }
 0x15a   : > { %v922_v18 = vpop.f32.mrf.mxu3  ;;  %v747_v21 = vpop.f32.mrf.mxu1 }
 0x15b   : > { %v923_v20 = vadd.f32 %v922_v18, %v833_v17  ;;  %v748_v25 = vadd.f32 %v747_v21, %v658_v19 }
 0x15d   : > { %v1197_v23 = vadd.f32 %v2212_v28, %v923_v20  ;;  %v1198_v31 = vadd.f32 %v2209_v26, %v748_v25 }
 0x15f   : > { %v1245_v24 = vpack.c.bf16 %v1197_v23, %v1196_v22 }
 0x161   : > { %1277 = vst [vmem:[%s2220_s27 + $0x78] sm:$0xff] %v1245_v24  ;;  %v836_v27 = vpop.f32.mrf.mxu2  ;;  %v660_v30 = vpop.f32.mrf.mxu0 }
 0x162   : > { %v925_v29 = vpop.f32.mrf.mxu3  ;;  %v749_v33 = vpop.f32.mrf.mxu1 }
 0x163   : > { %v926_v32 = vadd.f32 %v925_v29, %v836_v27  ;;  %v750_v36 = vadd.f32 %v749_v33, %v660_v30 }
 0x165   : > { %v1199_v34 = vadd.f32 %v2212_v28, %v926_v32  ;;  %v1200_v42 = vadd.f32 %v2209_v26, %v750_v36 }
 0x167   : > { %v1246_v35 = vpack.c.bf16 %v1199_v34, %v1198_v31 }
 0x169   : > { %1278 = vst [vmem:[%s2220_s27 + $0x80] sm:$0xff] %v1246_v35  ;;  %v838_v37 = vpop.f32.mrf.mxu2  ;;  %v663_v39 = vpop.f32.mrf.mxu0 }
 0x16a   : > { %v927_v38 = vpop.f32.mrf.mxu3  ;;  %v752_v41 = vpop.f32.mrf.mxu1 }
 0x16b   : > { %v928_v40 = vadd.f32 %v927_v38, %v838_v37  ;;  %v753_v45 = vadd.f32 %v752_v41, %v663_v39 }
 0x16d   : > { %v1201_v43 = vadd.f32 %v2212_v28, %v928_v40  ;;  %v1202_v49 = vadd.f32 %v2209_v26, %v753_v45 }
 0x16f   : > { %v1247_v44 = vpack.c.bf16 %v1201_v43, %v1200_v42 }
 0x171   : > { %1279 = vst [vmem:[%s2220_s27 + $0x88] sm:$0xff] %v1247_v44  ;;  %v841_v46 = vpop.f32.mrf.mxu2  ;;  %v665_v48 = vpop.f32.mrf.mxu0 }
 0x172   : > { %v930_v47 = vpop.f32.mrf.mxu3  ;;  %v754_v51 = vpop.f32.mrf.mxu1 }
 0x173   : > { %v931_v50 = vadd.f32 %v930_v47, %v841_v46  ;;  %v755_v54 = vadd.f32 %v754_v51, %v665_v48 }
 0x175   : > { %v1203_v52 = vadd.f32 %v2212_v28, %v931_v50  ;;  %v1204_v60 = vadd.f32 %v2209_v26, %v755_v54 }
 0x177   : > { %v1248_v53 = vpack.c.bf16 %v1203_v52, %v1202_v49 }
 0x179   : > { %1280 = vst [vmem:[%s2220_s27 + $0x90] sm:$0xff] %v1248_v53  ;;  %v843_v55 = vpop.f32.mrf.mxu2  ;;  %v668_v57 = vpop.f32.mrf.mxu0 }
 0x17a   : > { %v932_v56 = vpop.f32.mrf.mxu3  ;;  %v757_v59 = vpop.f32.mrf.mxu1 }
 0x17b   : > { %v933_v58 = vadd.f32 %v932_v56, %v843_v55  ;;  %v758_v63 = vadd.f32 %v757_v59, %v668_v57 }
 0x17d   : > { %v1205_v61 = vadd.f32 %v2212_v28, %v933_v58  ;;  %v1206_v3 = vadd.f32 %v2209_v26, %v758_v63 }
 0x17f   : > { %v1249_v62 = vpack.c.bf16 %v1205_v61, %v1204_v60 }
 0x181   : > { %1281 = vst [vmem:[%s2220_s27 + $0x98] sm:$0xff] %v1249_v62  ;;  %v846_v0 = vpop.f32.mrf.mxu2  ;;  %v670_v2 = vpop.f32.mrf.mxu0 }
 0x182   : > { %v935_v1 = vpop.f32.mrf.mxu3  ;;  %v759_v5 = vpop.f32.mrf.mxu1 }
 0x183   : > { %v936_v4 = vadd.f32 %v935_v1, %v846_v0  ;;  %v760_v8 = vadd.f32 %v759_v5, %v670_v2 }
 0x185   : > { %v1207_v6 = vadd.f32 %v2212_v28, %v936_v4  ;;  %v1208_v14 = vadd.f32 %v2209_v26, %v760_v8 }
 0x187   : > { %v1250_v7 = vpack.c.bf16 %v1207_v6, %v1206_v3 }
 0x189   : > { %1282 = vst [vmem:[%s2220_s27 + $0xa0] sm:$0xff] %v1250_v7  ;;  %v848_v9 = vpop.f32.mrf.mxu2  ;;  %v673_v11 = vpop.f32.mrf.mxu0 }
 0x18a   : > { %v937_v10 = vpop.f32.mrf.mxu3  ;;  %v762_v13 = vpop.f32.mrf.mxu1 }
 0x18b   : > { %v938_v12 = vadd.f32 %v937_v10, %v848_v9  ;;  %v763_v17 = vadd.f32 %v762_v13, %v673_v11 }
 0x18d   : > { %v1209_v15 = vadd.f32 %v2212_v28, %v938_v12  ;;  %v1210_v21 = vadd.f32 %v2209_v26, %v763_v17 }
 0x18f   : > { %v1251_v16 = vpack.c.bf16 %v1209_v15, %v1208_v14 }
 0x191   : > { %1283 = vst [vmem:[%s2220_s27 + $0xa8] sm:$0xff] %v1251_v16  ;;  %v851_v18 = vpop.f32.mrf.mxu2  ;;  %v675_v20 = vpop.f32.mrf.mxu0 }
 0x192   : > { %v940_v19 = vpop.f32.mrf.mxu3  ;;  %v764_v23 = vpop.f32.mrf.mxu1 }
 0x193   : > { %v941_v22 = vadd.f32 %v940_v19, %v851_v18  ;;  %v765_v27 = vadd.f32 %v764_v23, %v675_v20 }
 0x195   : > { %v1211_v24 = vadd.f32 %v2212_v28, %v941_v22  ;;  %v1212_v34 = vadd.f32 %v2209_v26, %v765_v27 }
 0x197   : > { %v1252_v25 = vpack.c.bf16 %v1211_v24, %v1210_v21 }
 0x199   : > { %1284 = vst [vmem:[%s2220_s27 + $0xb0] sm:$0xff] %v1252_v25  ;;  %v853_v29 = vpop.f32.mrf.mxu2  ;;  %v678_v31 = vpop.f32.mrf.mxu0 }
 0x19a   : > { %v942_v30 = vpop.f32.mrf.mxu3  ;;  %v767_v33 = vpop.f32.mrf.mxu1 }
 0x19b   : > { %v943_v32 = vadd.f32 %v942_v30, %v853_v29  ;;  %v768_v37 = vadd.f32 %v767_v33, %v678_v31 }
 0x19d   : > { %v1213_v35 = vadd.f32 %v2212_v28, %v943_v32  ;;  %v1214_v41 = vadd.f32 %v2209_v26, %v768_v37 }
 0x19f   : > { %v1253_v36 = vpack.c.bf16 %v1213_v35, %v1212_v34 }
 0x1a1   : > { %1285 = vst [vmem:[%s2220_s27 + $0xb8] sm:$0xff] %v1253_v36  ;;  %v856_v38 = vpop.f32.mrf.mxu2  ;;  %v680_v40 = vpop.f32.mrf.mxu0 }
 0x1a2   : > { %v945_v39 = vpop.f32.mrf.mxu3  ;;  %v769_v43 = vpop.f32.mrf.mxu1 }
 0x1a3   : > { %v946_v42 = vadd.f32 %v945_v39, %v856_v38  ;;  %v770_v46 = vadd.f32 %v769_v43, %v680_v40 }
 0x1a5   : > { %v1215_v44 = vadd.f32 %v2212_v28, %v946_v42  ;;  %v1216_v52 = vadd.f32 %v2209_v26, %v770_v46  ;;  %v1403_v46 = vld [vmem:[%s2220_s27 + $0x18] sm:$0xff] (%p2062_p13) }
 0x1a6   : > { %1404 = vst [vmem:[%s2349_s17 + $0x48] sm:$0xff] (%p2062_p13), %v1403_v46 }
 0x1a7   : > { %v1254_v45 = vpack.c.bf16 %v1215_v44, %v1214_v41 }
 0x1a9   : > { %1286 = vst [vmem:[%s2220_s27 + $0xc0] sm:$0xff] %v1254_v45  ;;  %v858_v47 = vpop.f32.mrf.mxu2  ;;  %v683_v49 = vpop.f32.mrf.mxu0  ;;  %v1401_v45 = vld [vmem:[%s2220_s27 + $0x10] sm:$0xff] (%p2062_p13) }
 0x1aa   : > { %v947_v48 = vpop.f32.mrf.mxu3  ;;  %v772_v51 = vpop.f32.mrf.mxu1  ;;  %1402 = vst [vmem:[%s2349_s17 + $0x30] sm:$0xff] (%p2062_p13), %v1401_v45 }
 0x1ab   : > { %v948_v50 = vadd.f32 %v947_v48, %v858_v47  ;;  %v773_v55 = vadd.f32 %v772_v51, %v683_v49  ;;  %v1405_v47 = vld [vmem:[%s2220_s27 + $0x20] sm:$0xff] (%p2062_p13)  ;;  %v1407_v48 = vld [vmem:[%s2220_s27 + $0x28] sm:$0xff] (%p2062_p13)  ;;  %v1409_v49 = vld [vmem:[%s2220_s27 + $0x30] sm:$0xff] (%p2062_p13) }
 0x1ac   : > { %1406 = vst [vmem:[%s2349_s17 + $0x60] sm:$0xff] (%p2062_p13), %v1405_v47  ;;  %v1413_v51 = vld [vmem:[%s2220_s27 + $0x40] sm:$0xff] (%p2062_p13) }
 0x1ad   : > { %v1217_v53 = vadd.f32 %v2212_v28, %v948_v50  ;;  %v1218_v59 = vadd.f32 %v2209_v26, %v773_v55  ;;  %v1411_v50 = vld [vmem:[%s2220_s27 + $0x38] sm:$0xff] (%p2062_p13)  ;;  %1408 = vst [vmem:[%s2349_s17 + $0x78] sm:$0xff] (%p2062_p13), %v1407_v48  ;;  %v1421_v55 = vld [vmem:[%s2220_s27 + $0x60] sm:$0xff] (%p2062_p13) }
 0x1ae   : > { %1410 = vst [vmem:[%s2349_s17 + $0x90] sm:$0xff] (%p2062_p13), %v1409_v49 }
 0x1af   : > { %v1255_v54 = vpack.c.bf16 %v1217_v53, %v1216_v52  ;;  %v1415_v52 = vld [vmem:[%s2220_s27 + $0x48] sm:$0xff] (%p2062_p13)  ;;  %1412 = vst [vmem:[%s2349_s17 + $0xa8] sm:$0xff] (%p2062_p13), %v1411_v50  ;;  %v1417_v53 = vld [vmem:[%s2220_s27 + $0x50] sm:$0xff] (%p2062_p13) }
 0x1b0   : > { %1414 = vst [vmem:[%s2349_s17 + $0xc0] sm:$0xff] (%p2062_p13), %v1413_v51 }
 0x1b1   : > { %1287 = vst [vmem:[%s2220_s27 + $0xc8] sm:$0xff] %v1255_v54  ;;  %v861_v56 = vpop.f32.mrf.mxu2  ;;  %v685_v58 = vpop.f32.mrf.mxu0  ;;  %v1419_v54 = vld [vmem:[%s2220_s27 + $0x58] sm:$0xff] (%p2062_p13) }
 0x1b2   : > { %v950_v57 = vpop.f32.mrf.mxu3  ;;  %v774_v61 = vpop.f32.mrf.mxu1  ;;  %1416 = vst [vmem:[%s2349_s17 + $0xd8] sm:$0xff] (%p2062_p13), %v1415_v52 }
 0x1b3   : > { %v951_v60 = vadd.f32 %v950_v57, %v861_v56  ;;  %v775_v0 = vadd.f32 %v774_v61, %v685_v58  ;;  %1418 = vst [vmem:[%s2349_s17 + $0xf0] sm:$0xff] (%p2062_p13), %v1417_v53  ;;  %v1423_v56 = vld [vmem:[%s2220_s27 + $0x68] sm:$0xff] (%p2062_p13)  ;;  %v1425_v57 = vld [vmem:[%s2220_s27 + $0x70] sm:$0xff] (%p2062_p13)  ;;  %v1427_v58 = vld [vmem:[%s2220_s27 + $0x78] sm:$0xff] (%p2062_p13) }
 0x1b4   : > { %1420 = vst [vmem:[%s2349_s17 + $0x108] sm:$0xff] (%p2062_p13), %v1419_v54  ;;  %v1433_v61 = vld [vmem:[%s2220_s27 + $0x90] sm:$0xff] (%p2062_p13) }
 0x1b5   : > { %v1219_v62 = vadd.f32 %v2212_v28, %v951_v60  ;;  %v1220_v6 = vadd.f32 %v2209_v26, %v775_v0  ;;  %1422 = vst [vmem:[%s2349_s17 + $0x120] sm:$0xff] (%p2062_p13), %v1421_v55  ;;  %v1431_v60 = vld [vmem:[%s2220_s27 + $0x88] sm:$0xff] (%p2062_p13) }
 0x1b6   : > { %1424 = vst [vmem:[%s2349_s17 + $0x138] sm:$0xff] (%p2062_p13), %v1423_v56  ;;  %v1439_v0 = vld [vmem:[%s2220_s27 + $0xa8] sm:$0xff] (%p2062_p13) }
 0x1b7   : > { %v1256_v63 = vpack.c.bf16 %v1219_v62, %v1218_v59  ;;  %v1429_v59 = vld [vmem:[%s2220_s27 + $0x80] sm:$0xff] (%p2062_p13)  ;;  %1426 = vst [vmem:[%s2349_s17 + $0x150] sm:$0xff] (%p2062_p13), %v1425_v57  ;;  %v1435_v62 = vld [vmem:[%s2220_s27 + $0x98] sm:$0xff] (%p2062_p13) }
 0x1b8   : > { %1428 = vst [vmem:[%s2349_s17 + $0x168] sm:$0xff] (%p2062_p13), %v1427_v58 }
 0x1b9   : > { %1288 = vst [vmem:[%s2220_s27 + $0xd0] sm:$0xff] %v1256_v63  ;;  %v863_v1 = vpop.f32.mrf.mxu2  ;;  %v688_v3 = vpop.f32.mrf.mxu0  ;;  %v1437_v63 = vld [vmem:[%s2220_s27 + $0xa0] sm:$0xff] (%p2062_p13) }
 0x1ba   : > { %v952_v2 = vpop.f32.mrf.mxu3  ;;  %v777_v5 = vpop.f32.mrf.mxu1  ;;  %1430 = vst [vmem:[%s2349_s17 + $0x180] sm:$0xff] (%p2062_p13), %v1429_v59 }
 0x1bb   : > { %v953_v4 = vadd.f32 %v952_v2, %v863_v1  ;;  %v778_v9 = vadd.f32 %v777_v5, %v688_v3  ;;  %1432 = vst [vmem:[%s2349_s17 + $0x198] sm:$0xff] (%p2062_p13), %v1431_v60  ;;  %v1441_v1 = vld [vmem:[%s2220_s27 + $0xb0] sm:$0xff] (%p2062_p13)  ;;  %v1443_v2 = vld [vmem:[%s2220_s27 + $0xb8] sm:$0xff] (%p2062_p13)  ;;  %v1445_v3 = vld [vmem:[%s2220_s27 + $0xc0] sm:$0xff] (%p2062_p13) }
 0x1bc   : > { %1434 = vst [vmem:[%s2349_s17 + $0x1b0] sm:$0xff] (%p2062_p13), %v1433_v61 }
 0x1bd   : > { %v1221_v7 = vadd.f32 %v2212_v28, %v953_v4  ;;  %v1222_v13 = vadd.f32 %v2209_v26, %v778_v9  ;;  %1436 = vst [vmem:[%s2349_s17 + $0x1c8] sm:$0xff] (%p2062_p13), %v1435_v62  ;;  %v1447_v4 = vld [vmem:[%s2220_s27 + $0xc8] sm:$0xff] (%p2062_p13) }
 0x1be   : > { %1438 = vst [vmem:[%s2349_s17 + $0x1e0] sm:$0xff] (%p2062_p13), %v1437_v63 }
 0x1bf   : > { %v1257_v8 = vpack.c.bf16 %v1221_v7, %v1220_v6  ;;  %1440 = vst [vmem:[%s2349_s17 + $0x1f8] sm:$0xff] (%p2062_p13), %v1439_v0 }
 0x1c0   : > { %1442 = vst [vmem:[%s2349_s17 + $0x210] sm:$0xff] (%p2062_p13), %v1441_v1  ;;  %v1449_v5 = vld [vmem:[%s2220_s27 + $0xd0] sm:$0xff] (%p2062_p13) }
 0x1c1   : > { %1289 = vst [vmem:[%s2220_s27 + $0xd8] sm:$0xff] %v1257_v8  ;;  %v866_v10 = vpop.f32.mrf.mxu2  ;;  %v690_v12 = vpop.f32.mrf.mxu0 }
 0x1c2   : > { %v955_v11 = vpop.f32.mrf.mxu3  ;;  %v779_v15 = vpop.f32.mrf.mxu1  ;;  %1444 = vst [vmem:[%s2349_s17 + $0x228] sm:$0xff] (%p2062_p13), %v1443_v2 }
 0x1c3   : > { %v956_v14 = vadd.f32 %v955_v11, %v866_v10  ;;  %v780_v18 = vadd.f32 %v779_v15, %v690_v12  ;;  %1446 = vst [vmem:[%s2349_s17 + $0x240] sm:$0xff] (%p2062_p13), %v1445_v3 }
 0x1c4   : > { %1448 = vst [vmem:[%s2349_s17 + $0x258] sm:$0xff] (%p2062_p13), %v1447_v4 }
 0x1c5   : > { %v1223_v16 = vadd.f32 %v2212_v28, %v956_v14  ;;  %v1224_v24 = vadd.f32 %v2209_v26, %v780_v18  ;;  %1450 = vst [vmem:[%s2349_s17 + $0x270] sm:$0xff] (%p2062_p13), %v1449_v5 }
 0x1c7   : > { %v1258_v17 = vpack.c.bf16 %v1223_v16, %v1222_v13 }
 0x1c8   : > { %v1451_v6 = vld [vmem:[%s2220_s27 + $0xd8] sm:$0xff] (%p2062_p13) }
 0x1c9   : > { %1290 = vst [vmem:[%s2220_s27 + $0xe0] sm:$0xff] %v1258_v17  ;;  %v868_v19 = vpop.f32.mrf.mxu2  ;;  %v693_v22 = vpop.f32.mrf.mxu0 }
 0x1ca   : > { %v957_v20 = vpop.f32.mrf.mxu3  ;;  %v782_v23 = vpop.f32.mrf.mxu1  ;;  %1452 = vst [vmem:[%s2349_s17 + $0x288] sm:$0xff] (%p2062_p13), %v1451_v6 }
 0x1cb   : > { %v958_v21 = vadd.f32 %v957_v20, %v868_v19  ;;  %v783_v29 = vadd.f32 %v782_v23, %v693_v22 }
 0x1cd   : > { %v1225_v25 = vadd.f32 %v2212_v28, %v958_v21  ;;  %v1226_v32 = vadd.f32 %v2209_v26, %v783_v29 }
 0x1cf   : > { %v1259_v27 = vpack.c.bf16 %v1225_v25, %v1224_v24 }
 0x1d0   : > { %v1453_v7 = vld [vmem:[%s2220_s27 + $0xe0] sm:$0xff] (%p2062_p13) }
 0x1d1   : > { %1291 = vst [vmem:[%s2220_s27 + $0xe8] sm:$0xff] %v1259_v27  ;;  %v871_v30 = vpop.f32.mrf.mxu2  ;;  %v695_v35 = vpop.f32.mrf.mxu0 }
 0x1d2   : > { %v960_v31 = vpop.f32.mrf.mxu3  ;;  %v784_v36 = vpop.f32.mrf.mxu1  ;;  %1454 = vst [vmem:[%s2349_s17 + $0x2a0] sm:$0xff] (%p2062_p13), %v1453_v7 }
 0x1d3   : > { %v961_v33 = vadd.f32 %v960_v31, %v871_v30  ;;  %v785_v38 = vadd.f32 %v784_v36, %v695_v35 }
 0x1d5   : > { %v1227_v34 = vadd.f32 %v2212_v28, %v961_v33  ;;  %v1228_v42 = vadd.f32 %v2209_v26, %v785_v38  ;;  %v1397_v26 = vld [vmem:[%s2220_s27] sm:$0xff] (%p2062_p13) }
 0x1d6   : > { %1398 = vst [vmem:[%s2349_s17] sm:$0xff] (%p2062_p13), %v1397_v26 }
 0x1d7   : > { %v1260_v37 = vpack.c.bf16 %v1227_v34, %v1226_v32 }
 0x1d8   : > { %v1455_v8 = vld [vmem:[%s2220_s27 + $0xe8] sm:$0xff] (%p2062_p13) }
 0x1d9   : > { %1292 = vst [vmem:[%s2220_s27 + $0xf0] sm:$0xff] %v1260_v37  ;;  %v873_v39 = vpop.f32.mrf.mxu2 }
 0x1da   : > { %v962_v40 = vpop.f32.mrf.mxu3  ;;  %1456 = vst [vmem:[%s2349_s17 + $0x2b8] sm:$0xff] (%p2062_p13), %v1455_v8 }
 0x1db   : > { %v963_v41 = vadd.f32 %v962_v40, %v873_v39 }
 0x1dd   : > { %v1229_v43 = vadd.f32 %v2212_v28, %v963_v41  ;;  %1300 = sbr.rel (!%p2062_p13) target bundleno = 490 (0x1ea), region = 52  ;;  %v1399_v28 = vld [vmem:[%s2220_s27 + $0x8] sm:$0xff] (%p2062_p13) }
 0x1de   : > { %1400 = vst [vmem:[%s2349_s17 + $0x18] sm:$0xff] (%p2062_p13), %v1399_v28 }
 0x1df   : > { %v1261_v44 = vpack.c.bf16 %v1229_v43, %v1228_v42 }
 0x1e0   : > { %v1457_v9 = vld [vmem:[%s2220_s27 + $0xf0] sm:$0xff] (%p2062_p13) }
 0x1e1   : > { %1293 = vst [vmem:[%s2220_s27 + $0xf8] sm:$0xff] %v1261_v44 }
 0x1e2   : > { %1458 = vst [vmem:[%s2349_s17 + $0x2d0] sm:$0xff] %v1457_v9 }
 0x1e8   : > { %v1459_v10 = vld [vmem:[%s2220_s27 + $0xf8] sm:$0xff] }
 0x1e9   : > { %1460 = vst [vmem:[%s2349_s17 + $0x2e8] sm:$0xff] %v1459_v10 }
 0x1ea PF: > { %s19_s24 = sadd.s32 1, %s1897_s24   ;;  %s2487_s10 = sld [smem:[#allocation14_spill]] }
 0x1eb   : > { %p2414_p6 = scmp.ge.s32.totalorder %s19_s24, 8   ;;  %s2488_s21 = sld [smem:[#allocation11_spill]] }
 0x1ec   : > { %s2489_s9 = sld [smem:[#allocation12_spill]]  ;;  %s2491_s12 = smov %s1853_s13 }
 0x1ed   : > { %s2490_s23 = sld [smem:[#allocation13_spill]]  ;;  %s2492_s13 = smov %s2072_s0 }
 0x1ee   : > { %s2493_s14 = smov %s1861_s15  ;;  %s2494_s15 = smov %s1865_s16 }
 0x1ef   : > { %s2496_s17 = smov %s1873_s18  ;;  %s2497_s18 = smov %s1877_s19 }
 0x1f0   : > { %s2495_s16 = smov %s2487_s10  ;;  %s2498_s19 = smov %s2069_s7 }
 0x1f1   : > { %s2499_s20 = smov %s1889_s22  ;;  %18 = sbr.rel (!%p2414_p6) target bundleno = 13 (0xd), region = 134 }
 0x1f2   : > { %s2500_s22 = smov %s2489_s9 }
 0x1f6   :  { %1476 = vsyncpa [#allocation4], 1 }
 0x1f7   :  { %1478 = vsyncpa [#allocation4 + $0x1], 1 }
 0x1f8   :  { %1479 = vsyncpa [#allocation6], 1 }
 0x1f9   :  { %1481 = vsyncpa [#allocation6 + $0x1], 1 }

// kernel: causal_self_attention.5
= control target key start
LH: loop header
LB: loop body
LE: loop exit
PB: predicated region body
PF: predicated region fallthrough
CT: control target
= control target key end

     0   :  { %8 = vsyncpa [#allocation4], 0  ;;  %s2360_s0 = inlined_call_operand.vmem [shape: bf16[512,256], index: 0, kind: input, shape index: {}]   ;;  %s2361_s1 = inlined_call_operand.vmem [shape: f32[256,256], index: 1, kind: input, shape index: {}]   ;;  %s2362_s2 = inlined_call_operand.vmem [shape: f32[1,256], index: 2, kind: input, shape index: {}]   ;;  %s2363_s3 = inlined_call_operand.hbm [shape: f32[512,256], index: 3, kind: output, shape index: {}]  }
   0x1   :  { %10 = vsyncpa [#allocation4 + $0x1], 0  ;;  %s1851_s12 = smov 0   ;;  %s1853_s13 = smov 0  }
   0x2   :  { %s1855_s14 = smov 0   ;;  %s1857_s15 = smov 0  }
   0x3   :  { %s1859_s16 = smov 0   ;;  %s1861_s17 = smov 0  }
   0x4 LB: > { %s1512_s18 = sadd.s32 4294967295, %s1827_s17   ;;  %s1513_s19 = sadd.s32 4294967294, %s1827_s17   ;;  %s1827_s17 = sphi %s1861_s17, %s16_s17   ;;  %s1823_s16 = sphi %s1859_s16, %s2371_s16   ;;  %s1819_s15 = sphi %s1857_s15, %s2370_s15   ;;  %s1815_s14 = sphi %s1855_s14, %s2369_s14   ;;  %s1811_s13 = sphi %s1853_s13, %s2368_s13   ;;  %s1807_s12 = sphi %s1851_s12, %s2367_s12  }
   0x5   : > { %s35_s20 = sadd.s32 1, %s1823_s16  ;;  %s126_s21 = sadd.s32 1, %s1815_s14 }
   0x6   : > { %p37_p0 = scmp.ge.s32.totalorder %s35_s20, 2  ;;  %p136_p1 = scmp.ne.s32.totalorder %s1815_s14, %s1811_s13 }
   0x7   : > { %p137_p2 = scmp.eq.s32.totalorder %s1512_s18, 1  ;;  %p142_p3 = scmp.ne.s32.totalorder %s1811_s13, %s1807_s12 }
   0x8   : > { %s2373_s20 = smov (%p37_p0, %s35_s20), 0  ;;  %p143_p5 = scmp.eq.s32.totalorder %s1513_s19, 1 }
   0x9   : > { %p1891_p4 = por %p137_p2, %p136_p1  ;;  %s121_s23 = ssub.s32 %s1823_s16, %s2373_s20 }
   0xa   : > { %p1518_p6 = scmp.ge.s32.totalorder %s1827_s17, 1  ;;  %p124_p7 = scmp.eq.s32.totalorder %s121_s23, 0 }
   0xb   : > { %p1898_p8 = por %p143_p5, %p142_p3  ;;  %p199_p9 = scmp.lt.s32.totalorder %s1827_s17, 3 }
   0xc   : > { %s1904_s25 = scalar_select %p124_p7, %s1815_s14, %s126_s21  }
   0xd   : > { %p200_p10 = pnand %p1518_p6, %p199_p9 }
   0xe   : > { %s1520_s18 = sshll.u32 (!%p200_p10), %s1819_s15, 5  ;;  %s239_s27 = sand.u32 (!%p200_p10), 1, %s1811_s13  }
   0xf   : > { %203 = sbr.rel (%p200_p10) target bundleno = 444 (0x1bc), region = 32  ;;  %p2023_p11 = scmp.lt.s32.totalorder (!%p200_p10), %s1520_s18, 63 }
  0x10   : > { %s1519_s29 = sshll.u32 (!%p200_p10), %s239_s27, 9  ;;  %s1691_s4 = sshll.u32 (!%p200_p10), %s1819_s15, 9 }
  0x11   : > { %s2162_s30 = scalar_lea.vmem (!%p200_p10), [#allocation3], %s1519_s29  ;;  %s1393_s7 = scalar_lea.hbm (!%p200_p10), %s2363_s3, %s1691_s4 }
  0x12   : > { %s1394_s9 = sshll.u32 (!%p200_p10), %s2162_s30, 4  ;;  %s1396_s11 = sshll.u32 (!%p200_p10), %s1393_s7, 4  ;;  %s1395_s9 = int_to_ptr.vmem [resolvable:$true] %s1394_s9  ;;  %s1397_s11 = int_to_ptr.hbm [resolvable:$true] %s1396_s11 }
  0x13   : > { %s1379_s15 = scalar_lea.sflag (!%p200_p10), [#allocation4], %s239_s27  ;;  %s1763_s19 = sshra.s32 (!%p200_p10), %s1397_s11, 4  ;;  %s1764_s19 = int_to_ptr.hbm [resolvable:$true] %s1763_s19 }
  0x14   : > { %v465_v0 = vld [vmem:[%s2361_s1 + $0xe0] sm:$0xff]  ;;  %v467_v1 = vld [vmem:[%s2361_s1 + $0xf0] sm:$0xff]  ;;  %v466_v5 = vld [vmem:[%s2361_s1 + $0xe8] sm:$0xff]  ;;  %s2375_s18 = smov (!%p2023_p11, %s1520_s18), 63  ;;  %s1765_s21 = scalar_lea.hbm %s1764_s19, 512 }
  0x15   : > { %v497_v2 = vld [vmem:[%s2361_s1 + $0x1e0] sm:$0xff]  ;;  %v515_v3 = vpack.c.bf16 %v467_v1, %v465_v0  ;;  %v499_v4 = vld [vmem:[%s2361_s1 + $0x1f0] sm:$0xff]  ;;  %v468_v6 = vld [vmem:[%s2361_s1 + $0xf8] sm:$0xff]  ;;  %s1657_s10 = sshll.u32 %s2375_s18, 3  ;;  %p1766_p12 = scmp.ne.s32.totalorder %s1764_s19, %s1765_s21 }
  0x16   : > { %v531_v7 = vpack.c.bf16 %v499_v4, %v497_v2  ;;  %v516_v8 = vpack.c.bf16 %v468_v6, %v466_v5  ;;  %v498_v9 = vld [vmem:[%s2361_s1 + $0x1e8] sm:$0xff]  ;;  %v500_v10 = vld [vmem:[%s2361_s1 + $0x1f8] sm:$0xff]  ;;  %v461_v11 = vld [vmem:[%s2361_s1 + $0xc0] sm:$0xff]  ;;  %s2100_s5 = scalar_lea.vmem %s2360_s0, %s1657_s10  ;;  %s1769_s26 = scalar_lea.hbm %s2363_s3, 1024 }
  0x17   : > { %693 = vmatpush.bf16.msra.mxu0 %v515_v3  ;;  %v532_v12 = vpack.c.bf16 %v500_v10, %v498_v9  ;;  %v463_v13 = vld [vmem:[%s2361_s1 + $0xd0] sm:$0xff]  ;;  %v493_v14 = vld [vmem:[%s2361_s1 + $0x1c0] sm:$0xff]  ;;  %v462_v18 = vld [vmem:[%s2361_s1 + $0xc8] sm:$0xff]  ;;  %p1767_p13 = pnand %p1766_p12, %p1891_p4  ;;  %p1770_p1 = scmp.lt.s32.totalorder %s1764_s19, %s2363_s3 }
  0x18   : > { %v495_v15 = vld [vmem:[%s2361_s1 + $0x1d0] sm:$0xff]  ;;  %782 = vmatpush.bf16.msra.mxu1 %v531_v7  ;;  %871 = vmatpush.bf16.msra.mxu2 %v516_v8  ;;  %v513_v16 = vpack.c.bf16 %v463_v13, %v461_v11  ;;  %v464_v19 = vld [vmem:[%s2361_s1 + $0xd8] sm:$0xff]  ;;  %v494_v20 = vld [vmem:[%s2361_s1 + $0x1c8] sm:$0xff]  ;;  %p1771_p2 = scmp.lt.s32.totalorder %s1769_s26, %s1765_s21 }
  0x19   : > { %v529_v17 = vpack.c.bf16 %v495_v15, %v493_v14  ;;  %960 = vmatpush.bf16.msra.mxu3 %v532_v12  ;;  %v514_v21 = vpack.c.bf16 %v464_v19, %v462_v18  ;;  %v496_v22 = vld [vmem:[%s2361_s1 + $0x1d8] sm:$0xff]  ;;  %v457_v23 = vld [vmem:[%s2361_s1 + $0xa0] sm:$0xff]  ;;  %v459_v24 = vld [vmem:[%s2361_s1 + $0xb0] sm:$0xff]  ;;  %p1768_p0 = pneg %p1767_p13 }
  0x1a   : > { %v530_v25 = vpack.c.bf16 %v496_v22, %v494_v20  ;;  %v489_v26 = vld [vmem:[%s2361_s1 + $0x1a0] sm:$0xff]  ;;  %v491_v27 = vld [vmem:[%s2361_s1 + $0x1b0] sm:$0xff]  ;;  %v458_v28 = vld [vmem:[%s2361_s1 + $0xa8] sm:$0xff]  ;;  %v511_v29 = vpack.c.bf16 %v459_v24, %v457_v23  ;;  %p1772_p3 = por %p1771_p2, %p1770_p1 }
  0x1b   : > { %694 = vmatpush.bf16.msra.mxu0 %v513_v16  ;;  %v460_v30 = vld [vmem:[%s2361_s1 + $0xb8] sm:$0xff]  ;;  %v490_v31 = vld [vmem:[%s2361_s1 + $0x1a8] sm:$0xff]  ;;  %v527_v33 = vpack.c.bf16 %v491_v27, %v489_v26  ;;  %v453_v35 = vld [vmem:[%s2361_s1 + $0x80] sm:$0xff] }
  0x1c   : > { %v492_v32 = vld [vmem:[%s2361_s1 + $0x1b8] sm:$0xff]  ;;  %783 = vmatpush.bf16.msra.mxu1 %v529_v17  ;;  %872 = vmatpush.bf16.msra.mxu2 %v514_v21  ;;  %v512_v34 = vpack.c.bf16 %v460_v30, %v458_v28  ;;  %v455_v36 = vld [vmem:[%s2361_s1 + $0x90] sm:$0xff]  ;;  %v485_v37 = vld [vmem:[%s2361_s1 + $0x180] sm:$0xff]  ;;  %p1773_p5 = pnand %p1772_p3, %p1768_p0 }
  0x1d   : > { %961 = vmatpush.bf16.msra.mxu3 %v530_v25  ;;  %v528_v38 = vpack.c.bf16 %v492_v32, %v490_v31  ;;  %v487_v39 = vld [vmem:[%s2361_s1 + $0x190] sm:$0xff]  ;;  %v454_v40 = vld [vmem:[%s2361_s1 + $0x88] sm:$0xff]  ;;  %v456_v41 = vld [vmem:[%s2361_s1 + $0x98] sm:$0xff]  ;;  %v509_v44 = vpack.c.bf16 %v455_v36, %v453_v35 }
  0x1e   : > { %v486_v42 = vld [vmem:[%s2361_s1 + $0x188] sm:$0xff]  ;;  %v488_v43 = vld [vmem:[%s2361_s1 + $0x198] sm:$0xff]  ;;  %v525_v45 = vpack.c.bf16 %v487_v39, %v485_v37  ;;  %v510_v46 = vpack.c.bf16 %v456_v41, %v454_v40  ;;  %v449_v47 = vld [vmem:[%s2361_s1 + $0x60] sm:$0xff] }
  0x1f   : > { %695 = vmatpush.bf16.msra.mxu0 %v511_v29  ;;  %v451_v48 = vld [vmem:[%s2361_s1 + $0x70] sm:$0xff]  ;;  %v481_v49 = vld [vmem:[%s2361_s1 + $0x160] sm:$0xff]  ;;  %v526_v50 = vpack.c.bf16 %v488_v43, %v486_v42  ;;  %v450_v52 = vld [vmem:[%s2361_s1 + $0x68] sm:$0xff] }
  0x20   : > { %784 = vmatpush.bf16.msra.mxu1 %v527_v33  ;;  %873 = vmatpush.bf16.msra.mxu2 %v512_v34  ;;  %v483_v51 = vld [vmem:[%s2361_s1 + $0x170] sm:$0xff]  ;;  %v452_v53 = vld [vmem:[%s2361_s1 + $0x78] sm:$0xff]  ;;  %v482_v54 = vld [vmem:[%s2361_s1 + $0x168] sm:$0xff]  ;;  %v507_v56 = vpack.c.bf16 %v451_v48, %v449_v47 }
  0x21   : > { %962 = vmatpush.bf16.msra.mxu3 %v528_v38  ;;  %v484_v55 = vld [vmem:[%s2361_s1 + $0x178] sm:$0xff]  ;;  %v523_v57 = vpack.c.bf16 %v483_v51, %v481_v49  ;;  %v508_v58 = vpack.c.bf16 %v452_v53, %v450_v52  ;;  %v445_v59 = vld [vmem:[%s2361_s1 + $0x40] sm:$0xff]  ;;  %v447_v60 = vld [vmem:[%s2361_s1 + $0x50] sm:$0xff] }
  0x22   : > { %v477_v61 = vld [vmem:[%s2361_s1 + $0x140] sm:$0xff]  ;;  %v524_v62 = vpack.c.bf16 %v484_v55, %v482_v54  ;;  %v479_v63 = vld [vmem:[%s2361_s1 + $0x150] sm:$0xff]  ;;  %v446_v0 = vld [vmem:[%s2361_s1 + $0x48] sm:$0xff]  ;;  %v505_v4 = vpack.c.bf16 %v447_v60, %v445_v59 }
  0x23   : > { %696 = vmatpush.bf16.msra.mxu0 %v509_v44  ;;  %v448_v1 = vld [vmem:[%s2361_s1 + $0x58] sm:$0xff]  ;;  %v478_v2 = vld [vmem:[%s2361_s1 + $0x148] sm:$0xff]  ;;  %v521_v5 = vpack.c.bf16 %v479_v63, %v477_v61  ;;  %v441_v7 = vld [vmem:[%s2361_s1 + $0x20] sm:$0xff] }
  0x24   : > { %785 = vmatpush.bf16.msra.mxu1 %v525_v45  ;;  %874 = vmatpush.bf16.msra.mxu2 %v510_v46  ;;  %v480_v3 = vld [vmem:[%s2361_s1 + $0x158] sm:$0xff]  ;;  %v506_v6 = vpack.c.bf16 %v448_v1, %v446_v0  ;;  %v443_v8 = vld [vmem:[%s2361_s1 + $0x30] sm:$0xff]  ;;  %v473_v9 = vld [vmem:[%s2361_s1 + $0x120] sm:$0xff] }
  0x25   : > { %963 = vmatpush.bf16.msra.mxu3 %v526_v50  ;;  %v522_v10 = vpack.c.bf16 %v480_v3, %v478_v2  ;;  %v475_v11 = vld [vmem:[%s2361_s1 + $0x130] sm:$0xff]  ;;  %v442_v12 = vld [vmem:[%s2361_s1 + $0x28] sm:$0xff]  ;;  %v444_v13 = vld [vmem:[%s2361_s1 + $0x38] sm:$0xff]  ;;  %v503_v16 = vpack.c.bf16 %v443_v8, %v441_v7 }
  0x26   : > { %v474_v14 = vld [vmem:[%s2361_s1 + $0x128] sm:$0xff]  ;;  %v476_v15 = vld [vmem:[%s2361_s1 + $0x138] sm:$0xff]  ;;  %v519_v17 = vpack.c.bf16 %v475_v11, %v473_v9  ;;  %v504_v18 = vpack.c.bf16 %v444_v13, %v442_v12  ;;  %v437_v19 = vld [vmem:[%s2361_s1] sm:$0xff] }
  0x27   : > { %697 = vmatpush.bf16.msra.mxu0 %v507_v56  ;;  %v439_v20 = vld [vmem:[%s2361_s1 + $0x10] sm:$0xff]  ;;  %v469_v21 = vld [vmem:[%s2361_s1 + $0x100] sm:$0xff]  ;;  %v520_v22 = vpack.c.bf16 %v476_v15, %v474_v14  ;;  %v438_v24 = vld [vmem:[%s2361_s1 + $0x8] sm:$0xff] }
  0x28   : > { %786 = vmatpush.bf16.msra.mxu1 %v523_v57  ;;  %875 = vmatpush.bf16.msra.mxu2 %v508_v58  ;;  %v471_v23 = vld [vmem:[%s2361_s1 + $0x110] sm:$0xff]  ;;  %v440_v25 = vld [vmem:[%s2361_s1 + $0x18] sm:$0xff]  ;;  %v470_v26 = vld [vmem:[%s2361_s1 + $0x108] sm:$0xff]  ;;  %v501_v28 = vpack.c.bf16 %v439_v20, %v437_v19 }
  0x29   : > { %964 = vmatpush.bf16.msra.mxu3 %v524_v62  ;;  %v472_v27 = vld [vmem:[%s2361_s1 + $0x118] sm:$0xff]  ;;  %v1525_v29 = vld [vmem:[%s2100_s5] sm:$0xf]  ;;  %v1659_v30 = vld [vmem:[%s2100_s5 + $0x4] sm:$0xf0]  ;;  %v517_v31 = vpack.c.bf16 %v471_v23, %v469_v21  ;;  %v502_v32 = vpack.c.bf16 %v440_v25, %v438_v24 }
  0x2a   : > { %v1658_v33 = vld [vmem:[%s2100_s5 + $0x4] sm:$0xf]  ;;  %v1527_v34 = vld [vmem:[%s2100_s5 + $0x8] sm:$0xf0]  ;;  %v518_v35 = vpack.c.bf16 %v472_v27, %v470_v26  ;;  %v1526_v36 = vor.u32 %v1659_v30, %v1525_v29  ;;  %v1533_v38 = vld [vmem:[%s2100_s5 + $0x10] sm:$0xf] }
  0x2b   : > { %698 = vmatpush.bf16.msra.mxu0 %v505_v4  ;;  %v1530_v37 = vor.u32 %v1658_v33, %v1527_v34  ;;  %v1661_v39 = vld [vmem:[%s2100_s5 + $0x14] sm:$0xf0]  ;;  %v1660_v40 = vld [vmem:[%s2100_s5 + $0x14] sm:$0xf]  ;;  %v1535_v41 = vld [vmem:[%s2100_s5 + $0x18] sm:$0xf0] }
  0x2c   : > { %787 = vmatpush.bf16.msra.mxu1 %v521_v5  ;;  %876 = vmatpush.bf16.msra.mxu2 %v506_v6  ;;  %v1534_v42 = vor.u32 %v1661_v39, %v1533_v38  ;;  %v1538_v43 = vor.u32 %v1660_v40, %v1535_v41  ;;  %v1541_v44 = vld [vmem:[%s2100_s5 + $0x20] sm:$0xf]  ;;  %v1663_v45 = vld [vmem:[%s2100_s5 + $0x24] sm:$0xf0]  ;;  %v1662_v46 = vld [vmem:[%s2100_s5 + $0x24] sm:$0xf] }
  0x2d   : > { %965 = vmatpush.bf16.msra.mxu3 %v522_v10  ;;  %v1543_v47 = vld [vmem:[%s2100_s5 + $0x28] sm:$0xf0]  ;;  %v1542_v48 = vor.u32 %v1663_v45, %v1541_v44  ;;  %v1549_v50 = vld [vmem:[%s2100_s5 + $0x30] sm:$0xf]  ;;  %v1665_v51 = vld [vmem:[%s2100_s5 + $0x34] sm:$0xf0] }
  0x2e   : > { %v1546_v49 = vor.u32 %v1662_v46, %v1543_v47  ;;  %v1664_v52 = vld [vmem:[%s2100_s5 + $0x34] sm:$0xf]  ;;  %v1551_v53 = vld [vmem:[%s2100_s5 + $0x38] sm:$0xf0]  ;;  %v1550_v54 = vor.u32 %v1665_v51, %v1549_v50  ;;  %v1557_v56 = vld [vmem:[%s2100_s5 + $0x40] sm:$0xf] }
  0x2f   : > { %699 = vmatpush.bf16.msra.mxu0 %v503_v16  ;;  %v1554_v55 = vor.u32 %v1664_v52, %v1551_v53  ;;  %v1667_v57 = vld [vmem:[%s2100_s5 + $0x44] sm:$0xf0]  ;;  %v1666_v58 = vld [vmem:[%s2100_s5 + $0x44] sm:$0xf]  ;;  %v1559_v59 = vld [vmem:[%s2100_s5 + $0x48] sm:$0xf0] }
  0x30   : > { %788 = vmatpush.bf16.msra.mxu1 %v519_v17  ;;  %877 = vmatpush.bf16.msra.mxu2 %v504_v18  ;;  %v1558_v60 = vor.u32 %v1667_v57, %v1557_v56  ;;  %v1562_v61 = vor.u32 %v1666_v58, %v1559_v59  ;;  %v1565_v62 = vld [vmem:[%s2100_s5 + $0x50] sm:$0xf]  ;;  %v1669_v63 = vld [vmem:[%s2100_s5 + $0x54] sm:$0xf0]  ;;  %v1668_v0 = vld [vmem:[%s2100_s5 + $0x54] sm:$0xf] }
  0x31   : > { %966 = vmatpush.bf16.msra.mxu3 %v520_v22  ;;  %v1567_v1 = vld [vmem:[%s2100_s5 + $0x58] sm:$0xf0]  ;;  %v1566_v2 = vor.u32 %v1669_v63, %v1565_v62  ;;  %v1573_v4 = vld [vmem:[%s2100_s5 + $0x60] sm:$0xf]  ;;  %v1671_v5 = vld [vmem:[%s2100_s5 + $0x64] sm:$0xf0] }
  0x32   : > { %v1570_v3 = vor.u32 %v1668_v0, %v1567_v1  ;;  %v1670_v6 = vld [vmem:[%s2100_s5 + $0x64] sm:$0xf]  ;;  %v1575_v7 = vld [vmem:[%s2100_s5 + $0x68] sm:$0xf0]  ;;  %v1574_v8 = vor.u32 %v1671_v5, %v1573_v4  ;;  %v1581_v10 = vld [vmem:[%s2100_s5 + $0x70] sm:$0xf] }
  0x33   : > { %700 = vmatpush.bf16.msra.mxu0 %v501_v28  ;;  %v1578_v9 = vor.u32 %v1670_v6, %v1575_v7  ;;  %v1673_v11 = vld [vmem:[%s2100_s5 + $0x74] sm:$0xf0]  ;;  %v1672_v12 = vld [vmem:[%s2100_s5 + $0x74] sm:$0xf]  ;;  %v1583_v13 = vld [vmem:[%s2100_s5 + $0x78] sm:$0xf0] }
  0x34   : > { %789 = vmatpush.bf16.msra.mxu1 %v517_v31  ;;  %878 = vmatpush.bf16.msra.mxu2 %v502_v32  ;;  %v1582_v14 = vor.u32 %v1673_v11, %v1581_v10  ;;  %v1586_v15 = vor.u32 %v1672_v12, %v1583_v13  ;;  %v1589_v16 = vld [vmem:[%s2100_s5 + $0x80] sm:$0xf]  ;;  %v1675_v17 = vld [vmem:[%s2100_s5 + $0x84] sm:$0xf0]  ;;  %v1674_v19 = vld [vmem:[%s2100_s5 + $0x84] sm:$0xf] }
  0x35   : > { %967 = vmatpush.bf16.msra.mxu3 %v518_v35  ;;  %v1244_v18 = vld [vmem:[%s2362_s2] sm:$0x3]  ;;  %v1591_v20 = vld [vmem:[%s2100_s5 + $0x88] sm:$0xf0]  ;;  %v1590_v21 = vor.u32 %v1675_v17, %v1589_v16  ;;  %v1677_v38 = vld [vmem:[%s2100_s5 + $0x94] sm:$0xf0] }
  0x36   : > { %701 = vmatmul.bf16.vlgmr.msra.gmra.mxu0 %v1526_v36  ;;  %v2159_v23 = vperm.slane %v1244_v18, 0  ;;  %v1594_v24 = vor.u32 %v1674_v19, %v1591_v20  ;;  %v2165_v29 = vperm.slane %v1244_v18, 1  ;;  %v1676_v39 = vld [vmem:[%s2100_s5 + $0x94] sm:$0xf]  ;;  %v1599_v40 = vld [vmem:[%s2100_s5 + $0x98] sm:$0xf0] }
  0x37   : > { %790 = vmatmul.bf16.vlgmr.msra.gmra.mxu1 %v1530_v37  ;;  %879 = vmatmul.bf16.vlgmr.msra.gmra.mxu2 %v1526_v36  ;;  %v1602_v45 = vor.u32 %v1676_v39, %v1599_v40  ;;  %v1605_v59 = vld [vmem:[%s2100_s5 + $0xa0] sm:$0xf]  ;;  %v1607_v62 = vld [vmem:[%s2100_s5 + $0xa8] sm:$0xf0]  ;;  %v1613_v17 = vld [vmem:[%s2100_s5 + $0xb0] sm:$0xf] }
  0x38   : > { %968 = vmatmul.bf16.vlgmr.msra.gmra.mxu3 %v1530_v37  ;;  %v1597_v37 = vld [vmem:[%s2100_s5 + $0x90] sm:$0xf]  ;;  %v1681_v18 = vld [vmem:[%s2100_s5 + $0xb4] sm:$0xf0]  ;;  %v1680_v19 = vld [vmem:[%s2100_s5 + $0xb4] sm:$0xf] }
  0x39   : > { %v1615_v20 = vld [vmem:[%s2100_s5 + $0xb8] sm:$0xf0] }
  0x46   : > { %706 = vmatmul.bf16.gmra.mxu0 %v1534_v42 }
  0x47   : > { %795 = vmatmul.bf16.gmra.mxu1 %v1538_v43  ;;  %884 = vmatmul.bf16.gmra.mxu2 %v1534_v42  ;;  %v1598_v42 = vor.u32 %v1677_v38, %v1597_v37 }
  0x48   : > { %973 = vmatmul.bf16.gmra.mxu3 %v1538_v43 }
  0x56   : > { %711 = vmatmul.bf16.gmra.mxu0 %v1542_v48 }
  0x57   : > { %800 = vmatmul.bf16.gmra.mxu1 %v1546_v49  ;;  %889 = vmatmul.bf16.gmra.mxu2 %v1542_v48 }
  0x58   : > { %978 = vmatmul.bf16.gmra.mxu3 %v1546_v49 }
  0x66   : > { %716 = vmatmul.bf16.gmra.mxu0 %v1550_v54 }
  0x67   : > { %805 = vmatmul.bf16.gmra.mxu1 %v1554_v55  ;;  %894 = vmatmul.bf16.gmra.mxu2 %v1550_v54 }
  0x68   : > { %983 = vmatmul.bf16.gmra.mxu3 %v1554_v55 }
  0x76   : > { %721 = vmatmul.bf16.gmra.mxu0 %v1558_v60 }
  0x77   : > { %810 = vmatmul.bf16.gmra.mxu1 %v1562_v61  ;;  %899 = vmatmul.bf16.gmra.mxu2 %v1558_v60  ;;  %v1679_v60 = vld [vmem:[%s2100_s5 + $0xa4] sm:$0xf0] }
  0x78   : > { %988 = vmatmul.bf16.gmra.mxu3 %v1562_v61  ;;  %v1678_v61 = vld [vmem:[%s2100_s5 + $0xa4] sm:$0xf]  ;;  %v1606_v0 = vor.u32 %v1679_v60, %v1605_v59 }
  0x86   : > { %726 = vmatmul.bf16.gmra.mxu0 %v1566_v2 }
  0x87   : > { %815 = vmatmul.bf16.gmra.mxu1 %v1570_v3  ;;  %904 = vmatmul.bf16.gmra.mxu2 %v1566_v2 }
  0x88   : > { %993 = vmatmul.bf16.gmra.mxu3 %v1570_v3  ;;  %v1610_v3 = vor.u32 %v1678_v61, %v1607_v62 }
  0x96   : > { %731 = vmatmul.bf16.gmra.mxu0 %v1574_v8 }
  0x97   : > { %820 = vmatmul.bf16.gmra.mxu1 %v1578_v9  ;;  %909 = vmatmul.bf16.gmra.mxu2 %v1574_v8 }
  0x98   : > { %998 = vmatmul.bf16.gmra.mxu3 %v1578_v9 }
  0xa6   : > { %736 = vmatmul.bf16.gmra.mxu0 %v1582_v14 }
  0xa7   : > { %825 = vmatmul.bf16.gmra.mxu1 %v1586_v15  ;;  %914 = vmatmul.bf16.gmra.mxu2 %v1582_v14 }
  0xa8   : > { %1003 = vmatmul.bf16.gmra.mxu3 %v1586_v15 }
  0xb3   : > { %v702_v22 = vpop.f32.mrf.mxu0 }
  0xb4   : > { %v791_v25 = vpop.f32.mrf.mxu1 }
  0xb5   : > { %v792_v26 = vadd.f32 %v791_v25, %v702_v22  ;;  %v1614_v22 = vor.u32 %v1681_v18, %v1613_v17 }
  0xb6   : > { %741 = vmatmul.bf16.gmra.mxu0 %v1590_v21 }
  0xb7   : > { %v1250_v27 = vadd.f32 %v2159_v23, %v792_v26  ;;  %830 = vmatmul.bf16.gmra.mxu1 %v1594_v24  ;;  %919 = vmatmul.bf16.gmra.mxu2 %v1590_v21  ;;  %v1618_v26 = vor.u32 %v1680_v19, %v1615_v20 }
  0xb8   : > { %1008 = vmatmul.bf16.gmra.mxu3 %v1594_v24 }
  0xb9   : > { %1314 = vst [vmem:[%s2162_s30] sm:$0xff] %v1250_v27 }
  0xba   : > { %v880_v28 = vpop.f32.mrf.mxu2 }
  0xbb   : > { %v969_v30 = vpop.f32.mrf.mxu3  ;;  %v704_v31 = vpop.f32.mrf.mxu0 }
  0xbc   : > { %v970_v32 = vadd.f32 %v969_v30, %v880_v28  ;;  %v793_v33 = vpop.f32.mrf.mxu1 }
  0xbd   : > { %v794_v34 = vadd.f32 %v793_v33, %v704_v31 }
  0xbe   : > { %v1251_v35 = vadd.f32 %v2165_v29, %v970_v32 }
  0xbf   : > { %v1252_v36 = vadd.f32 %v2159_v23, %v794_v34 }
  0xc0   : > { %1315 = vst [vmem:[%s2162_s30 + $0x8] sm:$0xff] %v1251_v35 }
  0xc1   : > { %1316 = vst [vmem:[%s2162_s30 + $0x10] sm:$0xff] %v1252_v36 }
  0xc2   : > { %v882_v41 = vpop.f32.mrf.mxu2 }
  0xc3   : > { %v971_v43 = vpop.f32.mrf.mxu3  ;;  %v707_v44 = vpop.f32.mrf.mxu0 }
  0xc4   : > { %v972_v46 = vadd.f32 %v971_v43, %v882_v41  ;;  %v796_v47 = vpop.f32.mrf.mxu1  ;;  %v1621_v41 = vld [vmem:[%s2100_s5 + $0xc0] sm:$0xf]  ;;  %v1682_v43 = vld [vmem:[%s2100_s5 + $0xc4] sm:$0xf] }
  0xc5   : > { %v797_v48 = vadd.f32 %v796_v47, %v707_v44  ;;  %v1623_v44 = vld [vmem:[%s2100_s5 + $0xc8] sm:$0xf0] }
  0xc6   : > { %v1253_v49 = vadd.f32 %v2165_v29, %v972_v46  ;;  %746 = vmatmul.bf16.gmra.mxu0 %v1598_v42 }
  0xc7   : > { %v1254_v50 = vadd.f32 %v2159_v23, %v797_v48  ;;  %835 = vmatmul.bf16.gmra.mxu1 %v1602_v45  ;;  %924 = vmatmul.bf16.gmra.mxu2 %v1598_v42  ;;  %v1683_v42 = vld [vmem:[%s2100_s5 + $0xc4] sm:$0xf0] }
  0xc8   : > { %1317 = vst [vmem:[%s2162_s30 + $0x18] sm:$0xff] %v1253_v49  ;;  %1013 = vmatmul.bf16.gmra.mxu3 %v1602_v45  ;;  %v1622_v46 = vor.u32 %v1683_v42, %v1621_v41  ;;  %v1626_v49 = vor.u32 %v1682_v43, %v1623_v44 }
  0xc9   : > { %1318 = vst [vmem:[%s2162_s30 + $0x20] sm:$0xff] %v1254_v50 }
  0xca   : > { %v885_v51 = vpop.f32.mrf.mxu2 }
  0xcb   : > { %v974_v52 = vpop.f32.mrf.mxu3  ;;  %v709_v53 = vpop.f32.mrf.mxu0 }
  0xcc   : > { %v975_v54 = vadd.f32 %v974_v52, %v885_v51  ;;  %v798_v55 = vpop.f32.mrf.mxu1 }
  0xcd   : > { %v799_v56 = vadd.f32 %v798_v55, %v709_v53 }
  0xce   : > { %v1255_v57 = vadd.f32 %v2165_v29, %v975_v54 }
  0xcf   : > { %v1256_v58 = vadd.f32 %v2159_v23, %v799_v56 }
  0xd0   : > { %1319 = vst [vmem:[%s2162_s30 + $0x28] sm:$0xff] %v1255_v57 }
  0xd1   : > { %1320 = vst [vmem:[%s2162_s30 + $0x30] sm:$0xff] %v1256_v58 }
  0xd2   : > { %v887_v63 = vpop.f32.mrf.mxu2 }
  0xd3   : > { %v976_v1 = vpop.f32.mrf.mxu3  ;;  %v712_v2 = vpop.f32.mrf.mxu0 }
  0xd4   : > { %v977_v4 = vadd.f32 %v976_v1, %v887_v63  ;;  %v801_v5 = vpop.f32.mrf.mxu1  ;;  %v1629_v63 = vld [vmem:[%s2100_s5 + $0xd0] sm:$0xf]  ;;  %v1684_v1 = vld [vmem:[%s2100_s5 + $0xd4] sm:$0xf] }
  0xd5   : > { %v802_v6 = vadd.f32 %v801_v5, %v712_v2  ;;  %v1631_v2 = vld [vmem:[%s2100_s5 + $0xd8] sm:$0xf0] }
  0xd6   : > { %v1257_v7 = vadd.f32 %v2165_v29, %v977_v4  ;;  %751 = vmatmul.bf16.gmra.mxu0 %v1606_v0 }
  0xd7   : > { %v1258_v8 = vadd.f32 %v2159_v23, %v802_v6  ;;  %840 = vmatmul.bf16.gmra.mxu1 %v1610_v3  ;;  %929 = vmatmul.bf16.gmra.mxu2 %v1606_v0  ;;  %v1685_v0 = vld [vmem:[%s2100_s5 + $0xd4] sm:$0xf0] }
  0xd8   : > { %1321 = vst [vmem:[%s2162_s30 + $0x38] sm:$0xff] %v1257_v7  ;;  %1018 = vmatmul.bf16.gmra.mxu3 %v1610_v3  ;;  %v1630_v4 = vor.u32 %v1685_v0, %v1629_v63  ;;  %v1634_v7 = vor.u32 %v1684_v1, %v1631_v2 }
  0xd9   : > { %1322 = vst [vmem:[%s2162_s30 + $0x40] sm:$0xff] %v1258_v8 }
  0xda   : > { %v890_v9 = vpop.f32.mrf.mxu2 }
  0xdb   : > { %v979_v10 = vpop.f32.mrf.mxu3  ;;  %v714_v11 = vpop.f32.mrf.mxu0 }
  0xdc   : > { %v980_v12 = vadd.f32 %v979_v10, %v890_v9  ;;  %v803_v13 = vpop.f32.mrf.mxu1 }
  0xdd   : > { %v804_v14 = vadd.f32 %v803_v13, %v714_v11 }
  0xde   : > { %v1259_v15 = vadd.f32 %v2165_v29, %v980_v12 }
  0xdf   : > { %v1260_v16 = vadd.f32 %v2159_v23, %v804_v14 }
  0xe0   : > { %1323 = vst [vmem:[%s2162_s30 + $0x48] sm:$0xff] %v1259_v15 }
  0xe1   : > { %1324 = vst [vmem:[%s2162_s30 + $0x50] sm:$0xff] %v1260_v16 }
  0xe2   : > { %v892_v21 = vpop.f32.mrf.mxu2 }
  0xe3   : > { %v981_v24 = vpop.f32.mrf.mxu3  ;;  %v717_v25 = vpop.f32.mrf.mxu0 }
  0xe4   : > { %v982_v27 = vadd.f32 %v981_v24, %v892_v21  ;;  %v806_v28 = vpop.f32.mrf.mxu1  ;;  %v1637_v21 = vld [vmem:[%s2100_s5 + $0xe0] sm:$0xf]  ;;  %v1686_v24 = vld [vmem:[%s2100_s5 + $0xe4] sm:$0xf] }
  0xe5   : > { %v807_v30 = vadd.f32 %v806_v28, %v717_v25  ;;  %v1639_v25 = vld [vmem:[%s2100_s5 + $0xe8] sm:$0xf0] }
  0xe6   : > { %v1261_v31 = vadd.f32 %v2165_v29, %v982_v27  ;;  %756 = vmatmul.bf16.gmra.mxu0 %v1614_v22 }
  0xe7   : > { %v1262_v32 = vadd.f32 %v2159_v23, %v807_v30  ;;  %845 = vmatmul.bf16.gmra.mxu1 %v1618_v26  ;;  %934 = vmatmul.bf16.gmra.mxu2 %v1614_v22  ;;  %v1687_v22 = vld [vmem:[%s2100_s5 + $0xe4] sm:$0xf0] }
  0xe8   : > { %1325 = vst [vmem:[%s2162_s30 + $0x58] sm:$0xff] %v1261_v31  ;;  %1023 = vmatmul.bf16.gmra.mxu3 %v1618_v26  ;;  %v1638_v27 = vor.u32 %v1687_v22, %v1637_v21  ;;  %v1642_v31 = vor.u32 %v1686_v24, %v1639_v25 }
  0xe9   : > { %1326 = vst [vmem:[%s2162_s30 + $0x60] sm:$0xff] %v1262_v32 }
  0xea   : > { %v895_v33 = vpop.f32.mrf.mxu2 }
  0xeb   : > { %v984_v34 = vpop.f32.mrf.mxu3  ;;  %v719_v35 = vpop.f32.mrf.mxu0 }
  0xec   : > { %v985_v36 = vadd.f32 %v984_v34, %v895_v33  ;;  %v808_v37 = vpop.f32.mrf.mxu1 }
  0xed   : > { %v809_v38 = vadd.f32 %v808_v37, %v719_v35 }
  0xee   : > { %v1263_v39 = vadd.f32 %v2165_v29, %v985_v36 }
  0xef   : > { %v1264_v40 = vadd.f32 %v2159_v23, %v809_v38 }
  0xf0   : > { %1327 = vst [vmem:[%s2162_s30 + $0x68] sm:$0xff] %v1263_v39 }
  0xf1   : > { %1328 = vst [vmem:[%s2162_s30 + $0x70] sm:$0xff] %v1264_v40 }
  0xf2   : > { %v897_v45 = vpop.f32.mrf.mxu2 }
  0xf3   : > { %v986_v47 = vpop.f32.mrf.mxu3  ;;  %v722_v48 = vpop.f32.mrf.mxu0 }
  0xf4   : > { %v987_v50 = vadd.f32 %v986_v47, %v897_v45  ;;  %v811_v51 = vpop.f32.mrf.mxu1  ;;  %v1645_v45 = vld [vmem:[%s2100_s5 + $0xf0] sm:$0xf]  ;;  %v1688_v47 = vld [vmem:[%s2100_s5 + $0xf4] sm:$0xf] }
  0xf5   : > { %v812_v52 = vadd.f32 %v811_v51, %v722_v48  ;;  %v1647_v48 = vld [vmem:[%s2100_s5 + $0xf8] sm:$0xf0] }
  0xf6   : > { %v1265_v53 = vadd.f32 %v2165_v29, %v987_v50  ;;  %761 = vmatmul.bf16.gmra.mxu0 %v1622_v46 }
  0xf7   : > { %v1266_v54 = vadd.f32 %v2159_v23, %v812_v52  ;;  %850 = vmatmul.bf16.gmra.mxu1 %v1626_v49  ;;  %939 = vmatmul.bf16.gmra.mxu2 %v1622_v46  ;;  %v1689_v46 = vld [vmem:[%s2100_s5 + $0xf4] sm:$0xf0] }
  0xf8   : > { %1329 = vst [vmem:[%s2162_s30 + $0x78] sm:$0xff] %v1265_v53  ;;  %1028 = vmatmul.bf16.gmra.mxu3 %v1626_v49  ;;  %v1646_v50 = vor.u32 %v1689_v46, %v1645_v45  ;;  %v1650_v53 = vor.u32 %v1688_v47, %v1647_v48 }
  0xf9   : > { %1330 = vst [vmem:[%s2162_s30 + $0x80] sm:$0xff] %v1266_v54 }
  0xfa   : > { %v900_v55 = vpop.f32.mrf.mxu2 }
  0xfb   : > { %v989_v56 = vpop.f32.mrf.mxu3  ;;  %v724_v57 = vpop.f32.mrf.mxu0 }
  0xfc   : > { %v990_v58 = vadd.f32 %v989_v56, %v900_v55  ;;  %v813_v59 = vpop.f32.mrf.mxu1 }
  0xfd   : > { %v814_v60 = vadd.f32 %v813_v59, %v724_v57 }
  0xfe   : > { %v1267_v61 = vadd.f32 %v2165_v29, %v990_v58 }
  0xff   : > { %v1268_v62 = vadd.f32 %v2159_v23, %v814_v60 }
 0x100   : > { %1331 = vst [vmem:[%s2162_s30 + $0x88] sm:$0xff] %v1267_v61 }
 0x101   : > { %1332 = vst [vmem:[%s2162_s30 + $0x90] sm:$0xff] %v1268_v62 }
 0x102   : > { %v902_v3 = vpop.f32.mrf.mxu2 }
 0x103   : > { %v991_v5 = vpop.f32.mrf.mxu3  ;;  %v727_v6 = vpop.f32.mrf.mxu0 }
 0x104   : > { %v992_v8 = vadd.f32 %v991_v5, %v902_v3  ;;  %v816_v9 = vpop.f32.mrf.mxu1 }
 0x105   : > { %v817_v10 = vadd.f32 %v816_v9, %v727_v6 }
 0x106   : > { %v1269_v11 = vadd.f32 %v2165_v29, %v992_v8  ;;  %766 = vmatmul.bf16.gmra.mxu0 %v1630_v4 }
 0x107   : > { %v1270_v12 = vadd.f32 %v2159_v23, %v817_v10  ;;  %855 = vmatmul.bf16.gmra.mxu1 %v1634_v7  ;;  %944 = vmatmul.bf16.gmra.mxu2 %v1630_v4 }
 0x108   : > { %1333 = vst [vmem:[%s2162_s30 + $0x98] sm:$0xff] %v1269_v11  ;;  %1033 = vmatmul.bf16.gmra.mxu3 %v1634_v7 }
 0x109   : > { %1334 = vst [vmem:[%s2162_s30 + $0xa0] sm:$0xff] %v1270_v12 }
 0x10a   : > { %v905_v13 = vpop.f32.mrf.mxu2 }
 0x10b   : > { %v994_v14 = vpop.f32.mrf.mxu3  ;;  %v729_v15 = vpop.f32.mrf.mxu0 }
 0x10c   : > { %v995_v16 = vadd.f32 %v994_v14, %v905_v13  ;;  %v818_v17 = vpop.f32.mrf.mxu1 }
 0x10d   : > { %v819_v18 = vadd.f32 %v818_v17, %v729_v15 }
 0x10e   : > { %v1271_v19 = vadd.f32 %v2165_v29, %v995_v16 }
 0x10f   : > { %v1272_v20 = vadd.f32 %v2159_v23, %v819_v18 }
 0x110   : > { %1335 = vst [vmem:[%s2162_s30 + $0xa8] sm:$0xff] %v1271_v19 }
 0x111   : > { %1336 = vst [vmem:[%s2162_s30 + $0xb0] sm:$0xff] %v1272_v20 }
 0x112   : > { %v907_v26 = vpop.f32.mrf.mxu2 }
 0x113   : > { %v996_v28 = vpop.f32.mrf.mxu3  ;;  %v732_v30 = vpop.f32.mrf.mxu0 }
 0x114   : > { %v997_v32 = vadd.f32 %v996_v28, %v907_v26  ;;  %v821_v33 = vpop.f32.mrf.mxu1 }
 0x115   : > { %v822_v34 = vadd.f32 %v821_v33, %v732_v30 }
 0x116   : > { %v1273_v35 = vadd.f32 %v2165_v29, %v997_v32  ;;  %771 = vmatmul.bf16.gmra.mxu0 %v1638_v27 }
 0x117   : > { %v1274_v36 = vadd.f32 %v2159_v23, %v822_v34  ;;  %860 = vmatmul.bf16.gmra.mxu1 %v1642_v31  ;;  %949 = vmatmul.bf16.gmra.mxu2 %v1638_v27 }
 0x118   : > { %1337 = vst [vmem:[%s2162_s30 + $0xb8] sm:$0xff] %v1273_v35  ;;  %1038 = vmatmul.bf16.gmra.mxu3 %v1642_v31 }
 0x119   : > { %1338 = vst [vmem:[%s2162_s30 + $0xc0] sm:$0xff] %v1274_v36 }
 0x11a   : > { %v910_v37 = vpop.f32.mrf.mxu2 }
 0x11b   : > { %v999_v38 = vpop.f32.mrf.mxu3  ;;  %v734_v39 = vpop.f32.mrf.mxu0 }
 0x11c   : > { %v1000_v40 = vadd.f32 %v999_v38, %v910_v37  ;;  %v823_v41 = vpop.f32.mrf.mxu1 }
 0x11d   : > { %v824_v42 = vadd.f32 %v823_v41, %v734_v39 }
 0x11e   : > { %v1275_v43 = vadd.f32 %v2165_v29, %v1000_v40 }
 0x11f   : > { %v1276_v44 = vadd.f32 %v2159_v23, %v824_v42 }
 0x120   : > { %1339 = vst [vmem:[%s2162_s30 + $0xc8] sm:$0xff] %v1275_v43 }
 0x121   : > { %1340 = vst [vmem:[%s2162_s30 + $0xd0] sm:$0xff] %v1276_v44 }
 0x122   : > { %v912_v49 = vpop.f32.mrf.mxu2 }
 0x123   : > { %v1001_v51 = vpop.f32.mrf.mxu3  ;;  %v737_v52 = vpop.f32.mrf.mxu0 }
 0x124   : > { %v1002_v54 = vadd.f32 %v1001_v51, %v912_v49  ;;  %v826_v55 = vpop.f32.mrf.mxu1 }
 0x125   : > { %v827_v56 = vadd.f32 %v826_v55, %v737_v52 }
 0x126   : > { %v1277_v57 = vadd.f32 %v2165_v29, %v1002_v54  ;;  %776 = vmatmul.bf16.gmra.mxu0 %v1646_v50 }
 0x127   : > { %v1278_v58 = vadd.f32 %v2159_v23, %v827_v56  ;;  %865 = vmatmul.bf16.gmra.mxu1 %v1650_v53  ;;  %954 = vmatmul.bf16.gmra.mxu2 %v1646_v50 }
 0x128   : > { %1341 = vst [vmem:[%s2162_s30 + $0xd8] sm:$0xff] %v1277_v57  ;;  %1043 = vmatmul.bf16.gmra.mxu3 %v1650_v53 }
 0x129   : > { %1342 = vst [vmem:[%s2162_s30 + $0xe0] sm:$0xff] %v1278_v58 }
 0x12a   : > { %v915_v59 = vpop.f32.mrf.mxu2 }
 0x12b   : > { %v1004_v60 = vpop.f32.mrf.mxu3  ;;  %v739_v61 = vpop.f32.mrf.mxu0 }
 0x12c   : > { %v1005_v62 = vadd.f32 %v1004_v60, %v915_v59  ;;  %v828_v63 = vpop.f32.mrf.mxu1 }
 0x12d   : > { %v829_v0 = vadd.f32 %v828_v63, %v739_v61 }
 0x12e   : > { %v1279_v1 = vadd.f32 %v2165_v29, %v1005_v62 }
 0x12f   : > { %v1280_v2 = vadd.f32 %v2159_v23, %v829_v0 }
 0x130   : > { %1343 = vst [vmem:[%s2162_s30 + $0xe8] sm:$0xff] %v1279_v1 }
 0x131   : > { %1344 = vst [vmem:[%s2162_s30 + $0xf0] sm:$0xff] %v1280_v2 }
 0x132   : > { %v917_v3 = vpop.f32.mrf.mxu2 }
 0x133   : > { %v1006_v4 = vpop.f32.mrf.mxu3  ;;  %v742_v5 = vpop.f32.mrf.mxu0 }
 0x134   : > { %v1007_v6 = vadd.f32 %v1006_v4, %v917_v3  ;;  %v831_v7 = vpop.f32.mrf.mxu1 }
 0x135   : > { %v832_v8 = vadd.f32 %v831_v7, %v742_v5 }
 0x136   : > { %v1281_v9 = vadd.f32 %v2165_v29, %v1007_v6 }
 0x137   : > { %v1282_v10 = vadd.f32 %v2159_v23, %v832_v8 }
 0x138   : > { %1345 = vst [vmem:[%s2162_s30 + $0xf8] sm:$0xff] %v1281_v9 }
 0x139   : > { %1346 = vst [vmem:[%s2162_s30 + $0x100] sm:$0xff] %v1282_v10 }
 0x13a   : > { %v920_v11 = vpop.f32.mrf.mxu2 }
 0x13b   : > { %v1009_v12 = vpop.f32.mrf.mxu3  ;;  %v744_v13 = vpop.f32.mrf.mxu0 }
 0x13c   : > { %v1010_v14 = vadd.f32 %v1009_v12, %v920_v11  ;;  %v833_v15 = vpop.f32.mrf.mxu1 }
 0x13d   : > { %v834_v16 = vadd.f32 %v833_v15, %v744_v13 }
 0x13e   : > { %v1283_v17 = vadd.f32 %v2165_v29, %v1010_v14 }
 0x13f   : > { %v1284_v18 = vadd.f32 %v2159_v23, %v834_v16 }
 0x140   : > { %1347 = vst [vmem:[%s2162_s30 + $0x108] sm:$0xff] %v1283_v17 }
 0x141   : > { %1348 = vst [vmem:[%s2162_s30 + $0x110] sm:$0xff] %v1284_v18 }
 0x142   : > { %v922_v19 = vpop.f32.mrf.mxu2 }
 0x143   : > { %v1011_v20 = vpop.f32.mrf.mxu3  ;;  %v747_v21 = vpop.f32.mrf.mxu0 }
 0x144   : > { %v1012_v22 = vadd.f32 %v1011_v20, %v922_v19  ;;  %v836_v24 = vpop.f32.mrf.mxu1 }
 0x145   : > { %v837_v25 = vadd.f32 %v836_v24, %v747_v21 }
 0x146   : > { %v1285_v26 = vadd.f32 %v2165_v29, %v1012_v22 }
 0x147   : > { %v1286_v27 = vadd.f32 %v2159_v23, %v837_v25 }
 0x148   : > { %1349 = vst [vmem:[%s2162_s30 + $0x118] sm:$0xff] %v1285_v26 }
 0x149   : > { %1350 = vst [vmem:[%s2162_s30 + $0x120] sm:$0xff] %v1286_v27 }
 0x14a   : > { %v925_v28 = vpop.f32.mrf.mxu2 }
 0x14b   : > { %v1014_v30 = vpop.f32.mrf.mxu3  ;;  %v749_v31 = vpop.f32.mrf.mxu0 }
 0x14c   : > { %v1015_v32 = vadd.f32 %v1014_v30, %v925_v28  ;;  %v838_v33 = vpop.f32.mrf.mxu1 }
 0x14d   : > { %v839_v34 = vadd.f32 %v838_v33, %v749_v31 }
 0x14e   : > { %v1287_v35 = vadd.f32 %v2165_v29, %v1015_v32 }
 0x14f   : > { %v1288_v36 = vadd.f32 %v2159_v23, %v839_v34 }
 0x150   : > { %1351 = vst [vmem:[%s2162_s30 + $0x128] sm:$0xff] %v1287_v35 }
 0x151   : > { %1352 = vst [vmem:[%s2162_s30 + $0x130] sm:$0xff] %v1288_v36 }
 0x152   : > { %v927_v37 = vpop.f32.mrf.mxu2 }
 0x153   : > { %v1016_v38 = vpop.f32.mrf.mxu3  ;;  %v752_v39 = vpop.f32.mrf.mxu0 }
 0x154   : > { %v1017_v40 = vadd.f32 %v1016_v38, %v927_v37  ;;  %v841_v41 = vpop.f32.mrf.mxu1 }
 0x155   : > { %v842_v42 = vadd.f32 %v841_v41, %v752_v39 }
 0x156   : > { %v1289_v43 = vadd.f32 %v2165_v29, %v1017_v40 }
 0x157   : > { %v1290_v44 = vadd.f32 %v2159_v23, %v842_v42 }
 0x158   : > { %1353 = vst [vmem:[%s2162_s30 + $0x138] sm:$0xff] %v1289_v43 }
 0x159   : > { %1354 = vst [vmem:[%s2162_s30 + $0x140] sm:$0xff] %v1290_v44 }
 0x15a   : > { %v930_v45 = vpop.f32.mrf.mxu2 }
 0x15b   : > { %v1019_v46 = vpop.f32.mrf.mxu3  ;;  %v754_v47 = vpop.f32.mrf.mxu0 }
 0x15c   : > { %v1020_v48 = vadd.f32 %v1019_v46, %v930_v45  ;;  %v843_v49 = vpop.f32.mrf.mxu1 }
 0x15d   : > { %v844_v50 = vadd.f32 %v843_v49, %v754_v47 }
 0x15e   : > { %v1291_v51 = vadd.f32 %v2165_v29, %v1020_v48 }
 0x15f   : > { %v1292_v52 = vadd.f32 %v2159_v23, %v844_v50 }
 0x160   : > { %1355 = vst [vmem:[%s2162_s30 + $0x148] sm:$0xff] %v1291_v51 }
 0x161   : > { %1356 = vst [vmem:[%s2162_s30 + $0x150] sm:$0xff] %v1292_v52 }
 0x162   : > { %v932_v53 = vpop.f32.mrf.mxu2 }
 0x163   : > { %v1021_v54 = vpop.f32.mrf.mxu3  ;;  %v757_v55 = vpop.f32.mrf.mxu0 }
 0x164   : > { %v1022_v56 = vadd.f32 %v1021_v54, %v932_v53  ;;  %v846_v57 = vpop.f32.mrf.mxu1 }
 0x165   : > { %v847_v58 = vadd.f32 %v846_v57, %v757_v55 }
 0x166   : > { %v1293_v59 = vadd.f32 %v2165_v29, %v1022_v56 }
 0x167   : > { %v1294_v60 = vadd.f32 %v2159_v23, %v847_v58 }
 0x168   : > { %1357 = vst [vmem:[%s2162_s30 + $0x158] sm:$0xff] %v1293_v59 }
 0x169   : > { %1358 = vst [vmem:[%s2162_s30 + $0x160] sm:$0xff] %v1294_v60 }
 0x16a   : > { %v935_v61 = vpop.f32.mrf.mxu2 }
 0x16b   : > { %v1024_v62 = vpop.f32.mrf.mxu3  ;;  %v759_v63 = vpop.f32.mrf.mxu0 }
 0x16c   : > { %v1025_v0 = vadd.f32 %v1024_v62, %v935_v61  ;;  %v848_v1 = vpop.f32.mrf.mxu1 }
 0x16d   : > { %v849_v2 = vadd.f32 %v848_v1, %v759_v63 }
 0x16e   : > { %v1295_v3 = vadd.f32 %v2165_v29, %v1025_v0 }
 0x16f   : > { %v1296_v4 = vadd.f32 %v2159_v23, %v849_v2 }
 0x170   : > { %1359 = vst [vmem:[%s2162_s30 + $0x168] sm:$0xff] %v1295_v3 }
 0x171   : > { %1360 = vst [vmem:[%s2162_s30 + $0x170] sm:$0xff] %v1296_v4 }
 0x172   : > { %v937_v5 = vpop.f32.mrf.mxu2 }
 0x173   : > { %v1026_v6 = vpop.f32.mrf.mxu3  ;;  %v762_v7 = vpop.f32.mrf.mxu0 }
 0x174   : > { %v1027_v8 = vadd.f32 %v1026_v6, %v937_v5  ;;  %v851_v9 = vpop.f32.mrf.mxu1 }
 0x175   : > { %v852_v10 = vadd.f32 %v851_v9, %v762_v7 }
 0x176   : > { %v1297_v11 = vadd.f32 %v2165_v29, %v1027_v8 }
 0x177   : > { %v1298_v12 = vadd.f32 %v2159_v23, %v852_v10 }
 0x178   : > { %1361 = vst [vmem:[%s2162_s30 + $0x178] sm:$0xff] %v1297_v11 }
 0x179   : > { %1362 = vst [vmem:[%s2162_s30 + $0x180] sm:$0xff] %v1298_v12 }
 0x17a   : > { %v940_v13 = vpop.f32.mrf.mxu2 }
 0x17b   : > { %v1029_v14 = vpop.f32.mrf.mxu3  ;;  %v764_v15 = vpop.f32.mrf.mxu0 }
 0x17c   : > { %v1030_v16 = vadd.f32 %v1029_v14, %v940_v13  ;;  %v853_v17 = vpop.f32.mrf.mxu1 }
 0x17d   : > { %v854_v18 = vadd.f32 %v853_v17, %v764_v15 }
 0x17e   : > { %v1299_v19 = vadd.f32 %v2165_v29, %v1030_v16 }
 0x17f   : > { %v1300_v20 = vadd.f32 %v2159_v23, %v854_v18 }
 0x180   : > { %1363 = vst [vmem:[%s2162_s30 + $0x188] sm:$0xff] %v1299_v19 }
 0x181   : > { %1364 = vst [vmem:[%s2162_s30 + $0x190] sm:$0xff] %v1300_v20 }
 0x182   : > { %v942_v21 = vpop.f32.mrf.mxu2 }
 0x183   : > { %v1031_v22 = vpop.f32.mrf.mxu3  ;;  %v767_v24 = vpop.f32.mrf.mxu0 }
 0x184   : > { %v1032_v25 = vadd.f32 %v1031_v22, %v942_v21  ;;  %v856_v26 = vpop.f32.mrf.mxu1 }
 0x185   : > { %v857_v27 = vadd.f32 %v856_v26, %v767_v24 }
 0x186   : > { %v1301_v28 = vadd.f32 %v2165_v29, %v1032_v25 }
 0x187   : > { %v1302_v30 = vadd.f32 %v2159_v23, %v857_v27 }
 0x188   : > { %1365 = vst [vmem:[%s2162_s30 + $0x198] sm:$0xff] %v1301_v28 }
 0x189   : > { %1366 = vst [vmem:[%s2162_s30 + $0x1a0] sm:$0xff] %v1302_v30 }
 0x18a   : > { %v945_v31 = vpop.f32.mrf.mxu2 }
 0x18b   : > { %v1034_v32 = vpop.f32.mrf.mxu3  ;;  %v769_v33 = vpop.f32.mrf.mxu0 }
 0x18c   : > { %v1035_v34 = vadd.f32 %v1034_v32, %v945_v31  ;;  %v858_v35 = vpop.f32.mrf.mxu1 }
 0x18d   : > { %v859_v36 = vadd.f32 %v858_v35, %v769_v33 }
 0x18e   : > { %v1303_v37 = vadd.f32 %v2165_v29, %v1035_v34 }
 0x18f   : > { %v1304_v38 = vadd.f32 %v2159_v23, %v859_v36 }
 0x190   : > { %1367 = vst [vmem:[%s2162_s30 + $0x1a8] sm:$0xff] %v1303_v37 }
 0x191   : > { %1368 = vst [vmem:[%s2162_s30 + $0x1b0] sm:$0xff] %v1304_v38 }
 0x192   : > { %v947_v39 = vpop.f32.mrf.mxu2 }
 0x193   : > { %v1036_v40 = vpop.f32.mrf.mxu3  ;;  %v772_v41 = vpop.f32.mrf.mxu0 }
 0x194   : > { %v1037_v42 = vadd.f32 %v1036_v40, %v947_v39  ;;  %v861_v43 = vpop.f32.mrf.mxu1 }
 0x195   : > { %v862_v44 = vadd.f32 %v861_v43, %v772_v41 }
 0x196   : > { %v1305_v45 = vadd.f32 %v2165_v29, %v1037_v42 }
 0x197   : > { %v1306_v46 = vadd.f32 %v2159_v23, %v862_v44 }
 0x198   : > { %1369 = vst [vmem:[%s2162_s30 + $0x1b8] sm:$0xff] %v1305_v45 }
 0x199   : > { %1370 = vst [vmem:[%s2162_s30 + $0x1c0] sm:$0xff] %v1306_v46 }
 0x19a   : > { %v950_v47 = vpop.f32.mrf.mxu2 }
 0x19b   : > { %v1039_v48 = vpop.f32.mrf.mxu3  ;;  %v774_v49 = vpop.f32.mrf.mxu0 }
 0x19c   : > { %v1040_v50 = vadd.f32 %v1039_v48, %v950_v47  ;;  %v863_v51 = vpop.f32.mrf.mxu1 }
 0x19d   : > { %v864_v52 = vadd.f32 %v863_v51, %v774_v49 }
 0x19e   : > { %v1307_v53 = vadd.f32 %v2165_v29, %v1040_v50 }
 0x19f   : > { %v1308_v54 = vadd.f32 %v2159_v23, %v864_v52 }
 0x1a0   : > { %1371 = vst [vmem:[%s2162_s30 + $0x1c8] sm:$0xff] %v1307_v53 }
 0x1a1   : > { %1372 = vst [vmem:[%s2162_s30 + $0x1d0] sm:$0xff] %v1308_v54 }
 0x1a2   : > { %v952_v55 = vpop.f32.mrf.mxu2 }
 0x1a3   : > { %v1041_v56 = vpop.f32.mrf.mxu3  ;;  %v777_v57 = vpop.f32.mrf.mxu0 }
 0x1a4   : > { %v1042_v58 = vadd.f32 %v1041_v56, %v952_v55  ;;  %v866_v59 = vpop.f32.mrf.mxu1 }
 0x1a5   : > { %v867_v60 = vadd.f32 %v866_v59, %v777_v57 }
 0x1a6   : > { %v1309_v61 = vadd.f32 %v2165_v29, %v1042_v58 }
 0x1a7   : > { %v1310_v62 = vadd.f32 %v2159_v23, %v867_v60 }
 0x1a8   : > { %1373 = vst [vmem:[%s2162_s30 + $0x1d8] sm:$0xff] %v1309_v61 }
 0x1a9   : > { %1374 = vst [vmem:[%s2162_s30 + $0x1e0] sm:$0xff] %v1310_v62 }
 0x1aa   : > { %v955_v63 = vpop.f32.mrf.mxu2 }
 0x1ab   : > { %v1044_v0 = vpop.f32.mrf.mxu3  ;;  %v779_v1 = vpop.f32.mrf.mxu0 }
 0x1ac   : > { %v1045_v2 = vadd.f32 %v1044_v0, %v955_v63  ;;  %v868_v3 = vpop.f32.mrf.mxu1 }
 0x1ad   : > { %v869_v4 = vadd.f32 %v868_v3, %v779_v1 }
 0x1ae   : > { %v1311_v5 = vadd.f32 %v2165_v29, %v1045_v2 }
 0x1af   : > { %v1312_v6 = vadd.f32 %v2159_v23, %v869_v4 }
 0x1b0   : > { %1375 = vst [vmem:[%s2162_s30 + $0x1e8] sm:$0xff] %v1311_v5 }
 0x1b1   : > { %1376 = vst [vmem:[%s2162_s30 + $0x1f0] sm:$0xff] %v1312_v6 }
 0x1b2   : > { %v957_v7 = vpop.f32.mrf.mxu2 }
 0x1b3   : > { %v1046_v8 = vpop.f32.mrf.mxu3 }
 0x1b4   : > { %v1047_v9 = vadd.f32 %v1046_v8, %v957_v7 }
 0x1b6   : > { %v1313_v10 = vadd.f32 %v2165_v29, %v1047_v9 }
 0x1b8   : > { %1377 = vst [vmem:[%s2162_s30 + $0x1f8] sm:$0xff] %v1313_v10 }
 0x1b9   : > { %1776 = shalt.err (!%p1773_p5)
}
 0x1ba   : > { %s1829_s27 = smov 256   ;;  %s1830_s28 = smov 16  }
 0x1bb   : > { %1692 = dma.vmem_to_hbm [thread:$0]  (%p1891_p4), %s1395_s9, 8192, %s1397_s11, %s1379_s15, %s1829_s27, %s1829_s27, %s1830_s28  }
 0x1bc PF: > { %p1698_p6 = scmp.ge.s32.totalorder %s1827_s17, 2  ;;  %s1411_s29 = sand.u32 1, %s1807_s12  }
 0x1bd   : > { %s1412_s30 = scalar_lea.sflag [#allocation4], %s1411_s29 }
 0x1be   : > { %p1695_p7 = pnand %p1698_p6, %p1898_p8 }
 0x1c0   : > { %p1696_p9 = pneg %p1695_p7 }
 0x1c2   : > { %1802 = dma.done.wait (%p1696_p9), %s1412_s30, 8192  }
 0x1c3   : > { %1804 = vsyncadd (%p1696_p9), %s1412_s30, 4294959104  ;;  %s16_s17 = sadd.s32 1, %s1827_s17   ;;  %s2367_s12 = smov %s1811_s13 }
 0x1c4   : > { %p13_p10 = scmp.ge.s32.totalorder %s16_s17, 4   ;;  %s2368_s13 = smov %s1815_s14 }
 0x1c5   : > { %s2369_s14 = smov %s1904_s25  ;;  %s2370_s15 = smov %s1823_s16 }
 0x1c6   : > { %s2371_s16 = smov %s2373_s20  ;;  %15 = sbr.rel (!%p13_p10) target bundleno = 4 (0x4), region = 81 }
 0x1cb   :  { %1418 = vsyncpa [#allocation4], 1 }
 0x1cc   :  { %1420 = vsyncpa [#allocation4 + $0x1], 1 }

</bundles_post_ra>
